<compile_context>
chip_gen: v5e
topology: v5e:2x2
jax: 0.10.0
libtpu: 0.0.40
codegen_flags: <defaults>
</compile_context>

<pallas_src>
import functools

import jax
import jax.numpy as jnp
from jax.experimental import pallas as pl
from jax.experimental.pallas import tpu as pltpu


# ----------------------------------------------------------------------------
# Single fused kernel: conv stack -> BiLSTM x2 -> MLP head
# ----------------------------------------------------------------------------
def fused_forward_kernel(
        x_ref,                                                   # (C, B*L) channels-first, n = l*B + b
        c1w_ref, c1b_ref, c1g_ref, c1be_ref,
        c2w_ref, c2b_ref, c2g_ref, c2be_ref,
        c3w_ref, c3b_ref, c3g_ref, c3be_ref,
        wih1_ref, whh1_ref, lb1_ref,
        wih2_ref, whh2_ref, lb2_ref,
        fw1_ref, fb1_ref, fw2_ref, fb2_ref, fw3_ref, fb3_ref,
        out_ref,                                                 # (B, output_dim)
        p_ref, raw_ref, seq0_ref,                                # VMEM scratch
        *, B, L, H):
    f32 = jnp.float32
    N = B * L                    # flattened positions on the lane axis, n = l*B + b
    H2 = 2 * H
    eps = 1e-5

    # ----------------- hoisted masks (computed once, shared) -----------------
    lane = jax.lax.broadcasted_iota(jnp.int32, (1, N), 1)
    keep_left = (lane >= B).astype(f32)                  # zero the l == 0 boundary
    keep_right = (lane < (L - 1) * B).astype(f32)        # zero the l == L-1 boundary

    gcol = jax.lax.broadcasted_iota(jnp.int32, (B, 8 * H), 1)
    is_g_gate = jnp.logical_and(gcol >= 2 * H2, gcol < 3 * H2)   # tanh ("g") gate block
    is_fwd_col = (gcol % H2) < H                                 # forward-direction columns

    # --------- conv1d(k=3, pad=1) -> BatchNorm(train stats) -> ReLU ----------
    def conv_bn_relu(x, w_ref, cb_ref, gamma_ref, beta_ref):
        # x: (Cin, N) channels-first, time-major columns (n = l*B + b)
        xl = pltpu.roll(x, shift=B, axis=1) * keep_left          # x[:, l-1], zero pad
        xr = pltpu.roll(x, shift=N - B, axis=1) * keep_right     # x[:, l+1], zero pad
        xs = jnp.concatenate([xl, x, xr], axis=0)                # (3*Cin, N)
        y = jnp.dot(w_ref[...], xs, preferred_element_type=f32) + cb_ref[...]
        mean = jnp.mean(y, axis=1, keepdims=True)
        msq = jnp.mean(y * y, axis=1, keepdims=True)             # independent reductions
        var = msq - mean * mean                                  # biased (PyTorch BN norm)
        y = (y - mean) * jax.lax.rsqrt(var + eps)
        return jnp.maximum(y * gamma_ref[...] + beta_ref[...], 0.0)

    h = conv_bn_relu(x_ref[...], c1w_ref, c1b_ref, c1g_ref, c1be_ref)
    h = conv_bn_relu(h, c2w_ref, c2b_ref, c2g_ref, c2be_ref)
    h = conv_bn_relu(h, c3w_ref, c3b_ref, c3g_ref, c3be_ref)

    # TODO(synk): nn.Dropout(0.2) treated as identity (eval / inference mode).

    # -------------------- fused bidirectional LSTM layer ---------------------
    # Packed layouts (gate-major, direction-minor):
    #   gate columns : [i_f i_b | f_f f_b | g_f g_b | o_f o_b], each block H wide
    #   state columns: h / c = [fwd (H) | bwd (H)]
    # NOTE: the g-gate columns of wih/whh/b are PRE-SCALED by 2 in init_params,
    # so tanh(z) = 2*sigmoid(2z) - 1 needs only one sigmoid per step.
    def bilstm_layer(x_seq, wih_ref, whh_ref, b_ref, store_seq):
        # Hoisted input projection for BOTH directions (+ both biases).
        p_ref[...] = (jnp.dot(x_seq, wih_ref[...], preferred_element_type=f32)
                      + b_ref[...])
        # Hoisted direction merge: p[t] <- where(is_fwd_col, p[t], p[L-1-t]),
        # done pair-wise in place, entirely off the recurrence critical path.
        for t in range(L // 2):
            rt = L - 1 - t
            a = p_ref[t * B:(t + 1) * B, :]
            bb = p_ref[rt * B:(rt + 1) * B, :]
            p_ref[t * B:(t + 1) * B, :] = jnp.where(is_fwd_col, a, bb)
            p_ref[rt * B:(rt + 1) * B, :] = jnp.where(is_fwd_col, bb, a)

        whh = whh_ref[...]                                   # (2H, 8H) block-diagonal
        hcat = jnp.zeros((B, H2), f32)
        ccat = jnp.zeros((B, H2), f32)
        fwd_last = None
        bwd_last = None
        for t in range(L):                                   # fully unrolled (L static)
            gates = (p_ref[t * B:(t + 1) * B, :]
                     + jnp.dot(hcat, whh, preferred_element_type=f32))   # (B, 8H)
            s = jax.nn.sigmoid(gates)                        # single full-width EUP pass
            act = jnp.where(is_g_gate, 2.0 * s - 1.0, s)     # g block -> tanh(z)
            i_g = act[:, 0:H2]
            f_g = act[:, H2:2 * H2]
            g_g = act[:, 2 * H2:3 * H2]
            o_g = act[:, 3 * H2:4 * H2]
            ccat = f_g * ccat + i_g * g_g
            hcat = o_g * jnp.tanh(ccat)
            if store_seq:
                # one aligned full-width store per step, step-ordered
                raw_ref[t * B:(t + 1) * B, :] = hcat
            if t == 0:
                bwd_last = hcat[:, H:H2]                     # bwd state at position L-1
            if t == L - 1:
                fwd_last = hcat[:, 0:H]                      # fwd state at position L-1
        return fwd_last, bwd_last

    x_seq1 = jnp.transpose(h)                                # (N, 8) time-major rows
    bilstm_layer(x_seq1, wih1_ref, whh1_ref, lb1_ref, store_seq=True)

    # Reorder the step-ordered layer-1 output into position order (the bwd
    # half is time-reversed); this is off the serial recurrence chain.
    seq0_ref[:, 0:H] = raw_ref[:, 0:H]                       # fwd half: step t == pos t
    for l in range(L):
        seq0_ref[l * B:(l + 1) * B, H:H2] = raw_ref[(L - 1 - l) * B:(L - l) * B, H:H2]

    # Layer 2: no sequence materialization, only output[:, -1, :] is needed.
    fwd_last, bwd_last = bilstm_layer(seq0_ref[...], wih2_ref, whh2_ref,
                                      lb2_ref, store_seq=False)
    last = jnp.concatenate([fwd_last, bwd_last], axis=1)     # (B, 2H)

    # ------------------------------- MLP head --------------------------------
    z = jnp.maximum(jnp.dot(last, fw1_ref[...], preferred_element_type=f32)
                    + fb1_ref[...], 0.0)
    z = jnp.maximum(jnp.dot(z, fw2_ref[...], preferred_element_type=f32)
                    + fb2_ref[...], 0.0)
    out_ref[...] = (jnp.dot(z, fw3_ref[...], preferred_element_type=f32)
                    + fb3_ref[...])


# ----------------------------------------------------------------------------
# Wrapper: one tiny layout transpose + one pallas_call
# ----------------------------------------------------------------------------
def attention_lstm_cnn2_forward(x, params):
    """x: (B, C=8, L) in PyTorch NCL layout -> (B, output_dim)."""
    B, C, L = x.shape
    H = params['lstm'][0]['whh'].shape[0] // 2
    out_dim = params['fc']['w3'].shape[1]
    assert len(params['lstm']) == 2, "module fixes num_layers=2"

    # NCL -> channels-first with time-major flattening: column n = l*B + b.
    x_cf = jnp.transpose(x, (1, 2, 0)).reshape(C, L * B)

    kernel = functools.partial(fused_forward_kernel, B=B, L=L, H=H)

    args = [x_cf]
    for c in params['conv']:
        args += [c['w'], c['b'], c['gamma'], c['beta']]
    for lyr in params['lstm']:
        args += [lyr['wih'], lyr['whh'], lyr['b']]
    fc = params['fc']
    args += [fc['w1'], fc['b1'], fc['w2'], fc['b2'], fc['w3'], fc['b3']]

    return pl.pallas_call(
        kernel,
        out_shape=jax.ShapeDtypeStruct((B, out_dim), jnp.float32),
        scratch_shapes=[
            pltpu.VMEM((L * B, 8 * H), jnp.float32),   # hoisted + merged gate projection
            pltpu.VMEM((L * B, 2 * H), jnp.float32),   # layer-1 step-ordered output
            pltpu.VMEM((L * B, 2 * H), jnp.float32),   # layer-1 position-ordered output
        ],
    )(*args)


# ----------------------------------------------------------------------------
# Deterministic parameter init mirroring the nn.Module __init__ (packed layout)
# ----------------------------------------------------------------------------
def init_params(key, input_dim=8, hidden_dim=32, output_dim=2):
    H = hidden_dim // 2
    keys = iter(jax.random.split(key, 256))
    nk = lambda: next(keys)

    def xavier_normal(shape, fan_in, fan_out, gain=1.0):
        std = gain * (2.0 / (fan_in + fan_out)) ** 0.5
        return std * jax.random.normal(nk(), shape, jnp.float32)

    def uniform(shape, bound):
        return jax.random.uniform(nk(), shape, jnp.float32, -bound, bound)

    # conv1: 8->8, conv2: 8->32, conv3: 32->8 ; kernel size 3, padding 1
    conv = []
    for cin, cout in [(input_dim, 8), (8, 32), (32, input_dim)]:
        fan_in, fan_out = cin * 3, cout * 3
        w = xavier_normal((cout, cin, 3), fan_in, fan_out)               # PyTorch (Cout,Cin,K)
        w_packed = jnp.transpose(w, (0, 2, 1)).reshape(cout, 3 * cin)    # [tap0|tap1|tap2]
        conv.append({
            'w': w_packed,
            'b': uniform((cout, 1), 1.0 / (fan_in ** 0.5)),
            'gamma': jnp.ones((cout, 1), jnp.float32),                   # BN weight
            'beta': jnp.zeros((cout, 1), jnp.float32),                   # BN bias
        })

    # Bidirectional LSTM, num_layers = 2 (fixed in the module). Pack both
    # directions gate-major: columns [i_f i_b | f_f f_b | g_f g_b | o_f o_b].
    # The g-gate columns are pre-scaled by 2 (tanh(z) = 2*sigmoid(2z) - 1 in
    # the kernel); this is purely a packing convention, not a semantic change.
    def pack_direction(wih_cat, whh_bd, b_cat, wih_d, whh_d, b_d, d):
        for q in range(4):
            cols = slice(q * 2 * H + d * H, q * 2 * H + (d + 1) * H)
            wih_cat = wih_cat.at[:, cols].set(wih_d[:, q * H:(q + 1) * H])
            whh_bd = whh_bd.at[d * H:(d + 1) * H, cols].set(whh_d[:, q * H:(q + 1) * H])
            b_cat = b_cat.at[:, cols].set(b_d[:, q * H:(q + 1) * H])
        return wih_cat, whh_bd, b_cat

    k_bound = 1.0 / (H ** 0.5)
    g_cols = slice(2 * 2 * H, 3 * 2 * H)                         # the "g" gate block
    lstm = []
    for layer in range(2):
        in_size = input_dim if layer == 0 else 2 * H
        wih_cat = jnp.zeros((in_size, 8 * H), jnp.float32)
        whh_bd = jnp.zeros((2 * H, 8 * H), jnp.float32)          # block-diagonal
        b_cat = jnp.zeros((1, 8 * H), jnp.float32)
        for d in range(2):                                       # 0 = fwd, 1 = bwd
            wih_d = uniform((in_size, 4 * H), k_bound)           # W_ih^T, gates i,f,g,o
            whh_d = uniform((H, 4 * H), k_bound)                 # W_hh^T
            b_d = uniform((1, 4 * H), k_bound) + uniform((1, 4 * H), k_bound)  # b_ih+b_hh
            wih_cat, whh_bd, b_cat = pack_direction(wih_cat, whh_bd, b_cat,
                                                    wih_d, whh_d, b_d, d)
        # Pre-scale the tanh gate's pre-activation by 2 (single-sigmoid trick).
        wih_cat = wih_cat.at[:, g_cols].multiply(2.0)
        whh_bd = whh_bd.at[:, g_cols].multiply(2.0)
        b_cat = b_cat.at[:, g_cols].multiply(2.0)
        lstm.append({'wih': wih_cat, 'whh': whh_bd, 'b': b_cat})

    relu_gain = 2.0 ** 0.5
    fc = {
        'w1': xavier_normal((hidden_dim, 64), hidden_dim, 64, relu_gain),
        'b1': uniform((1, 64), 1.0 / (hidden_dim ** 0.5)),
        'w2': xavier_normal((64, 16), 64, 16, relu_gain),
        'b2': uniform((1, 16), 1.0 / 8.0),
        'w3': xavier_normal((16, output_dim), 16, output_dim, relu_gain),
        'b3': uniform((1, output_dim), 0.25),
    }
    return {'conv': conv, 'lstm': lstm, 'fc': fc}


if __name__ == "__main__":
    B, C, L = 8, 8, 16            # batch, input_dim (module fixes 8), sequence length
    hidden_dim, output_dim = 32, 2

    x = jax.random.normal(jax.random.PRNGKey(0), (B, C, L), jnp.float32)
    params = init_params(jax.random.PRNGKey(1), input_dim=C,
                         hidden_dim=hidden_dim, output_dim=output_dim)

    fwd = jax.jit(attention_lstm_cnn2_forward)
    out = jax.block_until_ready(fwd(x, params))
    assert out.shape == (B, output_dim), out.shape
    assert bool(jnp.all(jnp.isfinite(out)))
    print("KERNEL_OK")
</pallas_src>

<mosaic_0001>
module attributes {stable_mosaic.version = 11 : i64} {
  func.func @fused_forward_kernel(%arg0: memref<8x128xf32, #tpu.memory_space<vmem>>, %arg1: memref<8x24xf32, #tpu.memory_space<vmem>>, %arg2: memref<8x1xf32, #tpu.memory_space<vmem>>, %arg3: memref<8x1xf32, #tpu.memory_space<vmem>>, %arg4: memref<8x1xf32, #tpu.memory_space<vmem>>, %arg5: memref<32x24xf32, #tpu.memory_space<vmem>>, %arg6: memref<32x1xf32, #tpu.memory_space<vmem>>, %arg7: memref<32x1xf32, #tpu.memory_space<vmem>>, %arg8: memref<32x1xf32, #tpu.memory_space<vmem>>, %arg9: memref<8x96xf32, #tpu.memory_space<vmem>>, %arg10: memref<8x1xf32, #tpu.memory_space<vmem>>, %arg11: memref<8x1xf32, #tpu.memory_space<vmem>>, %arg12: memref<8x1xf32, #tpu.memory_space<vmem>>, %arg13: memref<8x128xf32, #tpu.memory_space<vmem>>, %arg14: memref<32x128xf32, #tpu.memory_space<vmem>>, %arg15: memref<1x128xf32, #tpu.memory_space<vmem>>, %arg16: memref<32x128xf32, #tpu.memory_space<vmem>>, %arg17: memref<32x128xf32, #tpu.memory_space<vmem>>, %arg18: memref<1x128xf32, #tpu.memory_space<vmem>>, %arg19: memref<32x64xf32, #tpu.memory_space<vmem>>, %arg20: memref<1x64xf32, #tpu.memory_space<vmem>>, %arg21: memref<64x16xf32, #tpu.memory_space<vmem>>, %arg22: memref<1x16xf32, #tpu.memory_space<vmem>>, %arg23: memref<16x2xf32, #tpu.memory_space<vmem>>, %arg24: memref<1x2xf32, #tpu.memory_space<vmem>>, %arg25: memref<8x2xf32, #tpu.memory_space<vmem>>, %arg26: memref<128x128xf32, #tpu.memory_space<vmem>>, %arg27: memref<128x32xf32, #tpu.memory_space<vmem>>, %arg28: memref<128x32xf32, #tpu.memory_space<vmem>>) attributes {dimension_semantics = [], scalar_prefetch = 0 : i64, scratch_operands = 3 : i64, tpu.core_type = #tpu.core_type<tc>} {
    %0 = tpu.iota {dimensions = array<i32: 1>} : vector<1x128xi32>
    %c8_i32 = arith.constant 8 : i32
    %1 = vector.broadcast %c8_i32 : i32 to vector<1x128xi32>
    %2 = arith.cmpi sge, %0, %1 : vector<1x128xi32>
    %3 = arith.extui %2 : vector<1x128xi1> to vector<1x128xi32>
    %4 = arith.sitofp %3 : vector<1x128xi32> to vector<1x128xf32>
    %c120_i32 = arith.constant 120 : i32
    %5 = vector.broadcast %c120_i32 : i32 to vector<1x128xi32>
    %6 = arith.cmpi slt, %0, %5 : vector<1x128xi32>
    %7 = arith.extui %6 : vector<1x128xi1> to vector<1x128xi32>
    %8 = arith.sitofp %7 : vector<1x128xi32> to vector<1x128xf32>
    %9 = tpu.iota {dimensions = array<i32: 1>} : vector<8x128xi32>
    %c64_i32 = arith.constant 64 : i32
    %10 = vector.broadcast %c64_i32 : i32 to vector<8x128xi32>
    %11 = arith.cmpi sge, %9, %10 : vector<8x128xi32>
    %c96_i32 = arith.constant 96 : i32
    %12 = vector.broadcast %c96_i32 : i32 to vector<8x128xi32>
    %13 = arith.cmpi slt, %9, %12 : vector<8x128xi32>
    %14 = arith.andi %11, %13 : vector<8x128xi1>
    %c32_i32 = arith.constant 32 : i32
    %c0_i32 = arith.constant 0 : i32
    %15 = arith.cmpi eq, %c32_i32, %c0_i32 : i32
    %c1_i32 = arith.constant 1 : i32
    %16 = arith.select %15, %c1_i32, %c32_i32 : i32
    %17 = vector.broadcast %16 : i32 to vector<8x128xi32>
    %18 = arith.remsi %9, %17 : vector<8x128xi32>
    %c0_i32_0 = arith.constant 0 : i32
    %19 = vector.broadcast %c0_i32_0 : i32 to vector<8x128xi32>
    %20 = arith.cmpi ne, %18, %19 : vector<8x128xi32>
    %c0_i32_1 = arith.constant 0 : i32
    %21 = vector.broadcast %c0_i32_1 : i32 to vector<8x128xi32>
    %22 = arith.cmpi slt, %18, %21 : vector<8x128xi32>
    %c0_i32_2 = arith.constant 0 : i32
    %23 = arith.cmpi slt, %16, %c0_i32_2 : i32
    %24 = vector.broadcast %23 : i1 to vector<8x128xi1>
    %25 = vector.broadcast %24 : vector<8x128xi1> to vector<8x128xi1>
    %26 = arith.xori %22, %25 : vector<8x128xi1>
    %27 = arith.andi %26, %20 : vector<8x128xi1>
    %28 = vector.broadcast %16 : i32 to vector<8x128xi32>
    %29 = arith.addi %18, %28 : vector<8x128xi32>
    %30 = arith.select %27, %29, %18 : vector<8x128xi1>, vector<8x128xi32>
    %c16_i32 = arith.constant 16 : i32
    %31 = vector.broadcast %c16_i32 : i32 to vector<8x128xi32>
    %32 = arith.cmpi slt, %30, %31 : vector<8x128xi32>
    %c0 = arith.constant 0 : index
    %c0_3 = arith.constant 0 : index
    %33 = vector.load %arg0[%c0, %c0_3] : memref<8x128xf32, #tpu.memory_space<vmem>>, vector<8x128xf32>
    %c8_i32_4 = arith.constant 8 : i32
    %34 = tpu.dynamic_rotate %33 by %c8_i32_4 dim 1 : vector<8x128xf32>, i32 -> vector<8x128xf32>
    %35 = vector.broadcast %4 : vector<1x128xf32> to vector<8x128xf32>
    %36 = arith.mulf %34, %35 : vector<8x128xf32>
    %c120_i32_5 = arith.constant 120 : i32
    %37 = tpu.dynamic_rotate %33 by %c120_i32_5 dim 1 : vector<8x128xf32>, i32 -> vector<8x128xf32>
    %38 = vector.broadcast %8 : vector<1x128xf32> to vector<8x128xf32>
    %39 = arith.mulf %37, %38 : vector<8x128xf32>
    %40 = tpu.concatenate %36, %33, %39 in 0 : vector<8x128xf32>, vector<8x128xf32>, vector<8x128xf32> -> vector<24x128xf32>
    %c0_6 = arith.constant 0 : index
    %c0_7 = arith.constant 0 : index
    %41 = vector.load %arg1[%c0_6, %c0_7] : memref<8x24xf32, #tpu.memory_space<vmem>>, vector<8x24xf32>
    %cst = arith.constant dense<0.000000e+00> : vector<8x128xf32>
    %42 = tpu.matmul %41, %40, %cst {dimension_numbers = #tpu.dot_dimension_numbers<[1], [0], [0], [1], [0, 0, 1, 1], [], []>} : vector<8x24xf32>, vector<24x128xf32>, vector<8x128xf32> -> vector<8x128xf32>
    %c0_8 = arith.constant 0 : index
    %c0_9 = arith.constant 0 : index
    %43 = vector.load %arg2[%c0_8, %c0_9] : memref<8x1xf32, #tpu.memory_space<vmem>>, vector<8x1xf32>
    %44 = vector.broadcast %43 : vector<8x1xf32> to vector<8x128xf32>
    %45 = arith.addf %42, %44 : vector<8x128xf32>
    %cst_10 = arith.constant dense<0.000000e+00> : vector<8xf32>
    %46 = vector.multi_reduction <add>, %45, %cst_10 [1] : vector<8x128xf32> to vector<8xf32>
    %47 = vector.shape_cast %46 : vector<8xf32> to vector<8x1xf32>
    %cst_11 = arith.constant 1.280000e+02 : f32
    %48 = vector.broadcast %cst_11 : f32 to vector<8x1xf32>
    %49 = arith.divf %47, %48 : vector<8x1xf32>
    %50 = arith.mulf %45, %45 : vector<8x128xf32>
    %cst_12 = arith.constant dense<0.000000e+00> : vector<8xf32>
    %51 = vector.multi_reduction <add>, %50, %cst_12 [1] : vector<8x128xf32> to vector<8xf32>
    %52 = vector.shape_cast %51 : vector<8xf32> to vector<8x1xf32>
    %cst_13 = arith.constant 1.280000e+02 : f32
    %53 = vector.broadcast %cst_13 : f32 to vector<8x1xf32>
    %54 = arith.divf %52, %53 : vector<8x1xf32>
    %55 = arith.mulf %49, %49 : vector<8x1xf32>
    %56 = arith.subf %54, %55 : vector<8x1xf32>
    %57 = vector.broadcast %49 : vector<8x1xf32> to vector<8x128xf32>
    %58 = arith.subf %45, %57 : vector<8x128xf32>
    %cst_14 = arith.constant 9.99999974E-6 : f32
    %59 = vector.broadcast %cst_14 : f32 to vector<8x1xf32>
    %60 = arith.addf %56, %59 : vector<8x1xf32>
    %61 = math.rsqrt %60 : vector<8x1xf32>
    %62 = vector.broadcast %61 : vector<8x1xf32> to vector<8x128xf32>
    %63 = arith.mulf %58, %62 : vector<8x128xf32>
    %c0_15 = arith.constant 0 : index
    %c0_16 = arith.constant 0 : index
    %64 = vector.load %arg3[%c0_15, %c0_16] : memref<8x1xf32, #tpu.memory_space<vmem>>, vector<8x1xf32>
    %65 = vector.broadcast %64 : vector<8x1xf32> to vector<8x128xf32>
    %66 = arith.mulf %63, %65 : vector<8x128xf32>
    %c0_17 = arith.constant 0 : index
    %c0_18 = arith.constant 0 : index
    %67 = vector.load %arg4[%c0_17, %c0_18] : memref<8x1xf32, #tpu.memory_space<vmem>>, vector<8x1xf32>
    %68 = vector.broadcast %67 : vector<8x1xf32> to vector<8x128xf32>
    %69 = arith.addf %66, %68 : vector<8x128xf32>
    %cst_19 = arith.constant 0.000000e+00 : f32
    %70 = vector.broadcast %cst_19 : f32 to vector<8x128xf32>
    %71 = arith.maximumf %69, %70 : vector<8x128xf32>
    %c8_i32_20 = arith.constant 8 : i32
    %72 = tpu.dynamic_rotate %71 by %c8_i32_20 dim 1 : vector<8x128xf32>, i32 -> vector<8x128xf32>
    %73 = vector.broadcast %4 : vector<1x128xf32> to vector<8x128xf32>
    %74 = arith.mulf %72, %73 : vector<8x128xf32>
    %c120_i32_21 = arith.constant 120 : i32
    %75 = tpu.dynamic_rotate %71 by %c120_i32_21 dim 1 : vector<8x128xf32>, i32 -> vector<8x128xf32>
    %76 = vector.broadcast %8 : vector<1x128xf32> to vector<8x128xf32>
    %77 = arith.mulf %75, %76 : vector<8x128xf32>
    %78 = tpu.concatenate %74, %71, %77 in 0 : vector<8x128xf32>, vector<8x128xf32>, vector<8x128xf32> -> vector<24x128xf32>
    %c0_22 = arith.constant 0 : index
    %c0_23 = arith.constant 0 : index
    %79 = vector.load %arg5[%c0_22, %c0_23] : memref<32x24xf32, #tpu.memory_space<vmem>>, vector<32x24xf32>
    %cst_24 = arith.constant dense<0.000000e+00> : vector<32x128xf32>
    %80 = tpu.matmul %79, %78, %cst_24 {dimension_numbers = #tpu.dot_dimension_numbers<[1], [0], [0], [1], [0, 0, 1, 1], [], []>} : vector<32x24xf32>, vector<24x128xf32>, vector<32x128xf32> -> vector<32x128xf32>
    %c0_25 = arith.constant 0 : index
    %c0_26 = arith.constant 0 : index
    %81 = vector.load %arg6[%c0_25, %c0_26] : memref<32x1xf32, #tpu.memory_space<vmem>>, vector<32x1xf32>
    %82 = vector.broadcast %81 : vector<32x1xf32> to vector<32x128xf32>
    %83 = arith.addf %80, %82 : vector<32x128xf32>
    %cst_27 = arith.constant dense<0.000000e+00> : vector<32xf32>
    %84 = vector.multi_reduction <add>, %83, %cst_27 [1] : vector<32x128xf32> to vector<32xf32>
    %85 = vector.shape_cast %84 : vector<32xf32> to vector<32x1xf32>
    %cst_28 = arith.constant 1.280000e+02 : f32
    %86 = vector.broadcast %cst_28 : f32 to vector<32x1xf32>
    %87 = arith.divf %85, %86 : vector<32x1xf32>
    %88 = arith.mulf %83, %83 : vector<32x128xf32>
    %cst_29 = arith.constant dense<0.000000e+00> : vector<32xf32>
    %89 = vector.multi_reduction <add>, %88, %cst_29 [1] : vector<32x128xf32> to vector<32xf32>
    %90 = vector.shape_cast %89 : vector<32xf32> to vector<32x1xf32>
    %cst_30 = arith.constant 1.280000e+02 : f32
    %91 = vector.broadcast %cst_30 : f32 to vector<32x1xf32>
    %92 = arith.divf %90, %91 : vector<32x1xf32>
    %93 = arith.mulf %87, %87 : vector<32x1xf32>
    %94 = arith.subf %92, %93 : vector<32x1xf32>
    %95 = vector.broadcast %87 : vector<32x1xf32> to vector<32x128xf32>
    %96 = arith.subf %83, %95 : vector<32x128xf32>
    %cst_31 = arith.constant 9.99999974E-6 : f32
    %97 = vector.broadcast %cst_31 : f32 to vector<32x1xf32>
    %98 = arith.addf %94, %97 : vector<32x1xf32>
    %99 = math.rsqrt %98 : vector<32x1xf32>
    %100 = vector.broadcast %99 : vector<32x1xf32> to vector<32x128xf32>
    %101 = arith.mulf %96, %100 : vector<32x128xf32>
    %c0_32 = arith.constant 0 : index
    %c0_33 = arith.constant 0 : index
    %102 = vector.load %arg7[%c0_32, %c0_33] : memref<32x1xf32, #tpu.memory_space<vmem>>, vector<32x1xf32>
    %103 = vector.broadcast %102 : vector<32x1xf32> to vector<32x128xf32>
    %104 = arith.mulf %101, %103 : vector<32x128xf32>
    %c0_34 = arith.constant 0 : index
    %c0_35 = arith.constant 0 : index
    %105 = vector.load %arg8[%c0_34, %c0_35] : memref<32x1xf32, #tpu.memory_space<vmem>>, vector<32x1xf32>
    %106 = vector.broadcast %105 : vector<32x1xf32> to vector<32x128xf32>
    %107 = arith.addf %104, %106 : vector<32x128xf32>
    %cst_36 = arith.constant 0.000000e+00 : f32
    %108 = vector.broadcast %cst_36 : f32 to vector<32x128xf32>
    %109 = arith.maximumf %107, %108 : vector<32x128xf32>
    %c8_i32_37 = arith.constant 8 : i32
    %110 = tpu.dynamic_rotate %109 by %c8_i32_37 dim 1 : vector<32x128xf32>, i32 -> vector<32x128xf32>
    %111 = vector.broadcast %4 : vector<1x128xf32> to vector<32x128xf32>
    %112 = arith.mulf %110, %111 : vector<32x128xf32>
    %c120_i32_38 = arith.constant 120 : i32
    %113 = tpu.dynamic_rotate %109 by %c120_i32_38 dim 1 : vector<32x128xf32>, i32 -> vector<32x128xf32>
    %114 = vector.broadcast %8 : vector<1x128xf32> to vector<32x128xf32>
    %115 = arith.mulf %113, %114 : vector<32x128xf32>
    %116 = tpu.concatenate %112, %109, %115 in 0 : vector<32x128xf32>, vector<32x128xf32>, vector<32x128xf32> -> vector<96x128xf32>
    %c0_39 = arith.constant 0 : index
    %c0_40 = arith.constant 0 : index
    %117 = vector.load %arg9[%c0_39, %c0_40] : memref<8x96xf32, #tpu.memory_space<vmem>>, vector<8x96xf32>
    %cst_41 = arith.constant dense<0.000000e+00> : vector<8x128xf32>
    %118 = tpu.matmul %117, %116, %cst_41 {dimension_numbers = #tpu.dot_dimension_numbers<[1], [0], [0], [1], [0, 0, 1, 1], [], []>} : vector<8x96xf32>, vector<96x128xf32>, vector<8x128xf32> -> vector<8x128xf32>
    %c0_42 = arith.constant 0 : index
    %c0_43 = arith.constant 0 : index
    %119 = vector.load %arg10[%c0_42, %c0_43] : memref<8x1xf32, #tpu.memory_space<vmem>>, vector<8x1xf32>
    %120 = vector.broadcast %119 : vector<8x1xf32> to vector<8x128xf32>
    %121 = arith.addf %118, %120 : vector<8x128xf32>
    %cst_44 = arith.constant dense<0.000000e+00> : vector<8xf32>
    %122 = vector.multi_reduction <add>, %121, %cst_44 [1] : vector<8x128xf32> to vector<8xf32>
    %123 = vector.shape_cast %122 : vector<8xf32> to vector<8x1xf32>
    %cst_45 = arith.constant 1.280000e+02 : f32
    %124 = vector.broadcast %cst_45 : f32 to vector<8x1xf32>
    %125 = arith.divf %123, %124 : vector<8x1xf32>
    %126 = arith.mulf %121, %121 : vector<8x128xf32>
    %cst_46 = arith.constant dense<0.000000e+00> : vector<8xf32>
    %127 = vector.multi_reduction <add>, %126, %cst_46 [1] : vector<8x128xf32> to vector<8xf32>
    %128 = vector.shape_cast %127 : vector<8xf32> to vector<8x1xf32>
    %cst_47 = arith.constant 1.280000e+02 : f32
    %129 = vector.broadcast %cst_47 : f32 to vector<8x1xf32>
    %130 = arith.divf %128, %129 : vector<8x1xf32>
    %131 = arith.mulf %125, %125 : vector<8x1xf32>
    %132 = arith.subf %130, %131 : vector<8x1xf32>
    %133 = vector.broadcast %125 : vector<8x1xf32> to vector<8x128xf32>
    %134 = arith.subf %121, %133 : vector<8x128xf32>
    %cst_48 = arith.constant 9.99999974E-6 : f32
    %135 = vector.broadcast %cst_48 : f32 to vector<8x1xf32>
    %136 = arith.addf %132, %135 : vector<8x1xf32>
    %137 = math.rsqrt %136 : vector<8x1xf32>
    %138 = vector.broadcast %137 : vector<8x1xf32> to vector<8x128xf32>
    %139 = arith.mulf %134, %138 : vector<8x128xf32>
    %c0_49 = arith.constant 0 : index
    %c0_50 = arith.constant 0 : index
    %140 = vector.load %arg11[%c0_49, %c0_50] : memref<8x1xf32, #tpu.memory_space<vmem>>, vector<8x1xf32>
    %141 = vector.broadcast %140 : vector<8x1xf32> to vector<8x128xf32>
    %142 = arith.mulf %139, %141 : vector<8x128xf32>
    %c0_51 = arith.constant 0 : index
    %c0_52 = arith.constant 0 : index
    %143 = vector.load %arg12[%c0_51, %c0_52] : memref<8x1xf32, #tpu.memory_space<vmem>>, vector<8x1xf32>
    %144 = vector.broadcast %143 : vector<8x1xf32> to vector<8x128xf32>
    %145 = arith.addf %142, %144 : vector<8x128xf32>
    %cst_53 = arith.constant 0.000000e+00 : f32
    %146 = vector.broadcast %cst_53 : f32 to vector<8x128xf32>
    %147 = arith.maximumf %145, %146 : vector<8x128xf32>
    %148 = tpu.transpose %147, [1, 0] : vector<8x128xf32> -> vector<128x8xf32>
    %c0_54 = arith.constant 0 : index
    %c0_55 = arith.constant 0 : index
    %149 = vector.load %arg13[%c0_54, %c0_55] : memref<8x128xf32, #tpu.memory_space<vmem>>, vector<8x128xf32>
    %cst_56 = arith.constant dense<0.000000e+00> : vector<128x128xf32>
    %150 = tpu.matmul %148, %149, %cst_56 {dimension_numbers = #tpu.dot_dimension_numbers<[1], [0], [0], [1], [0, 0, 1, 1], [], []>} : vector<128x8xf32>, vector<8x128xf32>, vector<128x128xf32> -> vector<128x128xf32>
    %c0_57 = arith.constant 0 : index
    %c0_58 = arith.constant 0 : index
    %151 = vector.load %arg15[%c0_57, %c0_58] : memref<1x128xf32, #tpu.memory_space<vmem>>, vector<1x128xf32>
    %152 = vector.broadcast %151 : vector<1x128xf32> to vector<128x128xf32>
    %153 = arith.addf %150, %152 : vector<128x128xf32>
    %c0_59 = arith.constant 0 : index
    %c0_60 = arith.constant 0 : index
    %154 = vector.load %arg26[%c0_59, %c0_60] : memref<128x128xf32, #tpu.memory_space<vmem>>, vector<128x128xf32>
    tpu.vector_store %arg26[%c0_59, %c0_60], %153 {strides = array<i32>} : memref<128x128xf32, #tpu.memory_space<vmem>>, vector<128x128xf32>,
    %c0_61 = arith.constant 0 : index
    %c0_62 = arith.constant 0 : index
    %155 = vector.load %arg26[%c0_61, %c0_62] : memref<128x128xf32, #tpu.memory_space<vmem>>, vector<8x128xf32>
    %c120 = arith.constant 120 : index
    %c0_63 = arith.constant 0 : index
    %156 = vector.load %arg26[%c120, %c0_63] : memref<128x128xf32, #tpu.memory_space<vmem>>, vector<8x128xf32>
    %157 = arith.select %32, %155, %156 : vector<8x128xi1>, vector<8x128xf32>
    %c0_64 = arith.constant 0 : index
    %c0_65 = arith.constant 0 : index
    %158 = vector.load %arg26[%c0_64, %c0_65] : memref<128x128xf32, #tpu.memory_space<vmem>>, vector<8x128xf32>
    tpu.vector_store %arg26[%c0_64, %c0_65], %157 {strides = array<i32>} : memref<128x128xf32, #tpu.memory_space<vmem>>, vector<8x128xf32>,
    %159 = arith.select %32, %156, %155 : vector<8x128xi1>, vector<8x128xf32>
    %c120_66 = arith.constant 120 : index
    %c0_67 = arith.constant 0 : index
    %160 = vector.load %arg26[%c120_66, %c0_67] : memref<128x128xf32, #tpu.memory_space<vmem>>, vector<8x128xf32>
    tpu.vector_store %arg26[%c120_66, %c0_67], %159 {strides = array<i32>} : memref<128x128xf32, #tpu.memory_space<vmem>>, vector<8x128xf32>,
    %c8 = arith.constant 8 : index
    %c0_68 = arith.constant 0 : index
    %161 = vector.load %arg26[%c8, %c0_68] : memref<128x128xf32, #tpu.memory_space<vmem>>, vector<8x128xf32>
    %c112 = arith.constant 112 : index
    %c0_69 = arith.constant 0 : index
    %162 = vector.load %arg26[%c112, %c0_69] : memref<128x128xf32, #tpu.memory_space<vmem>>, vector<8x128xf32>
    %163 = arith.select %32, %161, %162 : vector<8x128xi1>, vector<8x128xf32>
    %c8_70 = arith.constant 8 : index
    %c0_71 = arith.constant 0 : index
    %164 = vector.load %arg26[%c8_70, %c0_71] : memref<128x128xf32, #tpu.memory_space<vmem>>, vector<8x128xf32>
    tpu.vector_store %arg26[%c8_70, %c0_71], %163 {strides = array<i32>} : memref<128x128xf32, #tpu.memory_space<vmem>>, vector<8x128xf32>,
    %165 = arith.select %32, %162, %161 : vector<8x128xi1>, vector<8x128xf32>
    %c112_72 = arith.constant 112 : index
    %c0_73 = arith.constant 0 : index
    %166 = vector.load %arg26[%c112_72, %c0_73] : memref<128x128xf32, #tpu.memory_space<vmem>>, vector<8x128xf32>
    tpu.vector_store %arg26[%c112_72, %c0_73], %165 {strides = array<i32>} : memref<128x128xf32, #tpu.memory_space<vmem>>, vector<8x128xf32>,
    %c16 = arith.constant 16 : index
    %c0_74 = arith.constant 0 : index
    %167 = vector.load %arg26[%c16, %c0_74] : memref<128x128xf32, #tpu.memory_space<vmem>>, vector<8x128xf32>
    %c104 = arith.constant 104 : index
    %c0_75 = arith.constant 0 : index
    %168 = vector.load %arg26[%c104, %c0_75] : memref<128x128xf32, #tpu.memory_space<vmem>>, vector<8x128xf32>
    %169 = arith.select %32, %167, %168 : vector<8x128xi1>, vector<8x128xf32>
    %c16_76 = arith.constant 16 : index
    %c0_77 = arith.constant 0 : index
    %170 = vector.load %arg26[%c16_76, %c0_77] : memref<128x128xf32, #tpu.memory_space<vmem>>, vector<8x128xf32>
    tpu.vector_store %arg26[%c16_76, %c0_77], %169 {strides = array<i32>} : memref<128x128xf32, #tpu.memory_space<vmem>>, vector<8x128xf32>,
    %171 = arith.select %32, %168, %167 : vector<8x128xi1>, vector<8x128xf32>
    %c104_78 = arith.constant 104 : index
    %c0_79 = arith.constant 0 : index
    %172 = vector.load %arg26[%c104_78, %c0_79] : memref<128x128xf32, #tpu.memory_space<vmem>>, vector<8x128xf32>
    tpu.vector_store %arg26[%c104_78, %c0_79], %171 {strides = array<i32>} : memref<128x128xf32, #tpu.memory_space<vmem>>, vector<8x128xf32>,
    %c24 = arith.constant 24 : index
    %c0_80 = arith.constant 0 : index
    %173 = vector.load %arg26[%c24, %c0_80] : memref<128x128xf32, #tpu.memory_space<vmem>>, vector<8x128xf32>
    %c96 = arith.constant 96 : index
    %c0_81 = arith.constant 0 : index
    %174 = vector.load %arg26[%c96, %c0_81] : memref<128x128xf32, #tpu.memory_space<vmem>>, vector<8x128xf32>
    %175 = arith.select %32, %173, %174 : vector<8x128xi1>, vector<8x128xf32>
    %c24_82 = arith.constant 24 : index
    %c0_83 = arith.constant 0 : index
    %176 = vector.load %arg26[%c24_82, %c0_83] : memref<128x128xf32, #tpu.memory_space<vmem>>, vector<8x128xf32>
    tpu.vector_store %arg26[%c24_82, %c0_83], %175 {strides = array<i32>} : memref<128x128xf32, #tpu.memory_space<vmem>>, vector<8x128xf32>,
    %177 = arith.select %32, %174, %173 : vector<8x128xi1>, vector<8x128xf32>
    %c96_84 = arith.constant 96 : index
    %c0_85 = arith.constant 0 : index
    %178 = vector.load %arg26[%c96_84, %c0_85] : memref<128x128xf32, #tpu.memory_space<vmem>>, vector<8x128xf32>
    tpu.vector_store %arg26[%c96_84, %c0_85], %177 {strides = array<i32>} : memref<128x128xf32, #tpu.memory_space<vmem>>, vector<8x128xf32>,
    %c32 = arith.constant 32 : index
    %c0_86 = arith.constant 0 : index
    %179 = vector.load %arg26[%c32, %c0_86] : memref<128x128xf32, #tpu.memory_space<vmem>>, vector<8x128xf32>
    %c88 = arith.constant 88 : index
    %c0_87 = arith.constant 0 : index
    %180 = vector.load %arg26[%c88, %c0_87] : memref<128x128xf32, #tpu.memory_space<vmem>>, vector<8x128xf32>
    %181 = arith.select %32, %179, %180 : vector<8x128xi1>, vector<8x128xf32>
    %c32_88 = arith.constant 32 : index
    %c0_89 = arith.constant 0 : index
    %182 = vector.load %arg26[%c32_88, %c0_89] : memref<128x128xf32, #tpu.memory_space<vmem>>, vector<8x128xf32>
    tpu.vector_store %arg26[%c32_88, %c0_89], %181 {strides = array<i32>} : memref<128x128xf32, #tpu.memory_space<vmem>>, vector<8x128xf32>,
    %183 = arith.select %32, %180, %179 : vector<8x128xi1>, vector<8x128xf32>
    %c88_90 = arith.constant 88 : index
    %c0_91 = arith.constant 0 : index
    %184 = vector.load %arg26[%c88_90, %c0_91] : memref<128x128xf32, #tpu.memory_space<vmem>>, vector<8x128xf32>
    tpu.vector_store %arg26[%c88_90, %c0_91], %183 {strides = array<i32>} : memref<128x128xf32, #tpu.memory_space<vmem>>, vector<8x128xf32>,
    %c40 = arith.constant 40 : index
    %c0_92 = arith.constant 0 : index
    %185 = vector.load %arg26[%c40, %c0_92] : memref<128x128xf32, #tpu.memory_space<vmem>>, vector<8x128xf32>
    %c80 = arith.constant 80 : index
    %c0_93 = arith.constant 0 : index
    %186 = vector.load %arg26[%c80, %c0_93] : memref<128x128xf32, #tpu.memory_space<vmem>>, vector<8x128xf32>
    %187 = arith.select %32, %185, %186 : vector<8x128xi1>, vector<8x128xf32>
    %c40_94 = arith.constant 40 : index
    %c0_95 = arith.constant 0 : index
    %188 = vector.load %arg26[%c40_94, %c0_95] : memref<128x128xf32, #tpu.memory_space<vmem>>, vector<8x128xf32>
    tpu.vector_store %arg26[%c40_94, %c0_95], %187 {strides = array<i32>} : memref<128x128xf32, #tpu.memory_space<vmem>>, vector<8x128xf32>,
    %189 = arith.select %32, %186, %185 : vector<8x128xi1>, vector<8x128xf32>
    %c80_96 = arith.constant 80 : index
    %c0_97 = arith.constant 0 : index
    %190 = vector.load %arg26[%c80_96, %c0_97] : memref<128x128xf32, #tpu.memory_space<vmem>>, vector<8x128xf32>
    tpu.vector_store %arg26[%c80_96, %c0_97], %189 {strides = array<i32>} : memref<128x128xf32, #tpu.memory_space<vmem>>, vector<8x128xf32>,
    %c48 = arith.constant 48 : index
    %c0_98 = arith.constant 0 : index
    %191 = vector.load %arg26[%c48, %c0_98] : memref<128x128xf32, #tpu.memory_space<vmem>>, vector<8x128xf32>
    %c72 = arith.constant 72 : index
    %c0_99 = arith.constant 0 : index
    %192 = vector.load %arg26[%c72, %c0_99] : memref<128x128xf32, #tpu.memory_space<vmem>>, vector<8x128xf32>
    %193 = arith.select %32, %191, %192 : vector<8x128xi1>, vector<8x128xf32>
    %c48_100 = arith.constant 48 : index
    %c0_101 = arith.constant 0 : index
    %194 = vector.load %arg26[%c48_100, %c0_101] : memref<128x128xf32, #tpu.memory_space<vmem>>, vector<8x128xf32>
    tpu.vector_store %arg26[%c48_100, %c0_101], %193 {strides = array<i32>} : memref<128x128xf32, #tpu.memory_space<vmem>>, vector<8x128xf32>,
    %195 = arith.select %32, %192, %191 : vector<8x128xi1>, vector<8x128xf32>
    %c72_102 = arith.constant 72 : index
    %c0_103 = arith.constant 0 : index
    %196 = vector.load %arg26[%c72_102, %c0_103] : memref<128x128xf32, #tpu.memory_space<vmem>>, vector<8x128xf32>
    tpu.vector_store %arg26[%c72_102, %c0_103], %195 {strides = array<i32>} : memref<128x128xf32, #tpu.memory_space<vmem>>, vector<8x128xf32>,
    %c56 = arith.constant 56 : index
    %c0_104 = arith.constant 0 : index
    %197 = vector.load %arg26[%c56, %c0_104] : memref<128x128xf32, #tpu.memory_space<vmem>>, vector<8x128xf32>
    %c64 = arith.constant 64 : index
    %c0_105 = arith.constant 0 : index
    %198 = vector.load %arg26[%c64, %c0_105] : memref<128x128xf32, #tpu.memory_space<vmem>>, vector<8x128xf32>
    %199 = arith.select %32, %197, %198 : vector<8x128xi1>, vector<8x128xf32>
    %c56_106 = arith.constant 56 : index
    %c0_107 = arith.constant 0 : index
    %200 = vector.load %arg26[%c56_106, %c0_107] : memref<128x128xf32, #tpu.memory_space<vmem>>, vector<8x128xf32>
    tpu.vector_store %arg26[%c56_106, %c0_107], %199 {strides = array<i32>} : memref<128x128xf32, #tpu.memory_space<vmem>>, vector<8x128xf32>,
    %201 = arith.select %32, %198, %197 : vector<8x128xi1>, vector<8x128xf32>
    %c64_108 = arith.constant 64 : index
    %c0_109 = arith.constant 0 : index
    %202 = vector.load %arg26[%c64_108, %c0_109] : memref<128x128xf32, #tpu.memory_space<vmem>>, vector<8x128xf32>
    tpu.vector_store %arg26[%c64_108, %c0_109], %201 {strides = array<i32>} : memref<128x128xf32, #tpu.memory_space<vmem>>, vector<8x128xf32>,
    %c0_110 = arith.constant 0 : index
    %c0_111 = arith.constant 0 : index
    %203 = vector.load %arg14[%c0_110, %c0_111] : memref<32x128xf32, #tpu.memory_space<vmem>>, vector<32x128xf32>
    %cst_112 = arith.constant 0.000000e+00 : f32
    %204 = vector.broadcast %cst_112 : f32 to vector<8x32xf32>
    %cst_113 = arith.constant 0.000000e+00 : f32
    %205 = vector.broadcast %cst_113 : f32 to vector<8x32xf32>
    %c0_114 = arith.constant 0 : index
    %c0_115 = arith.constant 0 : index
    %206 = vector.load %arg26[%c0_114, %c0_115] : memref<128x128xf32, #tpu.memory_space<vmem>>, vector<8x128xf32>
    %cst_116 = arith.constant dense<0.000000e+00> : vector<8x128xf32>
    %207 = tpu.matmul %204, %203, %cst_116 {dimension_numbers = #tpu.dot_dimension_numbers<[1], [0], [0], [1], [0, 0, 1, 1], [], []>} : vector<8x32xf32>, vector<32x128xf32>, vector<8x128xf32> -> vector<8x128xf32>
    %208 = arith.addf %206, %207 : vector<8x128xf32>
    %209 = arith.negf %208 : vector<8x128xf32>
    %210 = math.exp %209 : vector<8x128xf32>
    %cst_117 = arith.constant 1.000000e+00 : f32
    %211 = vector.broadcast %cst_117 : f32 to vector<8x128xf32>
    %212 = arith.addf %211, %210 : vector<8x128xf32>
    %213 = arith.divf %211, %212 : vector<8x128xf32>
    %cst_118 = arith.constant 2.000000e+00 : f32
    %214 = vector.broadcast %cst_118 : f32 to vector<8x128xf32>
    %215 = arith.mulf %214, %213 : vector<8x128xf32>
    %cst_119 = arith.constant 1.000000e+00 : f32
    %216 = vector.broadcast %cst_119 : f32 to vector<8x128xf32>
    %217 = arith.subf %215, %216 : vector<8x128xf32>
    %218 = arith.select %14, %217, %213 : vector<8x128xi1>, vector<8x128xf32>
    %219 = vector.extract_strided_slice %218 {offsets = [0, 0], sizes = [8, 32], strides = [1, 1]} : vector<8x128xf32> to vector<8x32xf32>
    %220 = vector.extract_strided_slice %218 {offsets = [0, 32], sizes = [8, 32], strides = [1, 1]} : vector<8x128xf32> to vector<8x32xf32>
    %221 = vector.extract_strided_slice %218 {offsets = [0, 64], sizes = [8, 32], strides = [1, 1]} : vector<8x128xf32> to vector<8x32xf32>
    %222 = vector.extract_strided_slice %218 {offsets = [0, 96], sizes = [8, 32], strides = [1, 1]} : vector<8x128xf32> to vector<8x32xf32>
    %223 = arith.mulf %220, %205 : vector<8x32xf32>
    %224 = arith.mulf %219, %221 : vector<8x32xf32>
    %225 = arith.addf %223, %224 : vector<8x32xf32>
    %226 = math.tanh %225 : vector<8x32xf32>
    %227 = arith.mulf %222, %226 : vector<8x32xf32>
    %c0_120 = arith.constant 0 : index
    %c0_121 = arith.constant 0 : index
    %228 = vector.load %arg27[%c0_120, %c0_121] : memref<128x32xf32, #tpu.memory_space<vmem>>, vector<8x32xf32>
    tpu.vector_store %arg27[%c0_120, %c0_121], %227 {strides = array<i32>} : memref<128x32xf32, #tpu.memory_space<vmem>>, vector<8x32xf32>,
    %c8_122 = arith.constant 8 : index
    %c0_123 = arith.constant 0 : index
    %229 = vector.load %arg26[%c8_122, %c0_123] : memref<128x128xf32, #tpu.memory_space<vmem>>, vector<8x128xf32>
    %cst_124 = arith.constant dense<0.000000e+00> : vector<8x128xf32>
    %230 = tpu.matmul %227, %203, %cst_124 {dimension_numbers = #tpu.dot_dimension_numbers<[1], [0], [0], [1], [0, 0, 1, 1], [], []>} : vector<8x32xf32>, vector<32x128xf32>, vector<8x128xf32> -> vector<8x128xf32>
    %231 = arith.addf %229, %230 : vector<8x128xf32>
    %232 = arith.negf %231 : vector<8x128xf32>
    %233 = math.exp %232 : vector<8x128xf32>
    %cst_125 = arith.constant 1.000000e+00 : f32
    %234 = vector.broadcast %cst_125 : f32 to vector<8x128xf32>
    %235 = arith.addf %234, %233 : vector<8x128xf32>
    %236 = arith.divf %234, %235 : vector<8x128xf32>
    %cst_126 = arith.constant 2.000000e+00 : f32
    %237 = vector.broadcast %cst_126 : f32 to vector<8x128xf32>
    %238 = arith.mulf %237, %236 : vector<8x128xf32>
    %cst_127 = arith.constant 1.000000e+00 : f32
    %239 = vector.broadcast %cst_127 : f32 to vector<8x128xf32>
    %240 = arith.subf %238, %239 : vector<8x128xf32>
    %241 = arith.select %14, %240, %236 : vector<8x128xi1>, vector<8x128xf32>
    %242 = vector.extract_strided_slice %241 {offsets = [0, 0], sizes = [8, 32], strides = [1, 1]} : vector<8x128xf32> to vector<8x32xf32>
    %243 = vector.extract_strided_slice %241 {offsets = [0, 32], sizes = [8, 32], strides = [1, 1]} : vector<8x128xf32> to vector<8x32xf32>
    %244 = vector.extract_strided_slice %241 {offsets = [0, 64], sizes = [8, 32], strides = [1, 1]} : vector<8x128xf32> to vector<8x32xf32>
    %245 = vector.extract_strided_slice %241 {offsets = [0, 96], sizes = [8, 32], strides = [1, 1]} : vector<8x128xf32> to vector<8x32xf32>
    %246 = arith.mulf %243, %225 : vector<8x32xf32>
    %247 = arith.mulf %242, %244 : vector<8x32xf32>
    %248 = arith.addf %246, %247 : vector<8x32xf32>
    %249 = math.tanh %248 : vector<8x32xf32>
    %250 = arith.mulf %245, %249 : vector<8x32xf32>
    %c8_128 = arith.constant 8 : index
    %c0_129 = arith.constant 0 : index
    %251 = vector.load %arg27[%c8_128, %c0_129] : memref<128x32xf32, #tpu.memory_space<vmem>>, vector<8x32xf32>
    tpu.vector_store %arg27[%c8_128, %c0_129], %250 {strides = array<i32>} : memref<128x32xf32, #tpu.memory_space<vmem>>, vector<8x32xf32>,
    %c16_130 = arith.constant 16 : index
    %c0_131 = arith.constant 0 : index
    %252 = vector.load %arg26[%c16_130, %c0_131] : memref<128x128xf32, #tpu.memory_space<vmem>>, vector<8x128xf32>
    %cst_132 = arith.constant dense<0.000000e+00> : vector<8x128xf32>
    %253 = tpu.matmul %250, %203, %cst_132 {dimension_numbers = #tpu.dot_dimension_numbers<[1], [0], [0], [1], [0, 0, 1, 1], [], []>} : vector<8x32xf32>, vector<32x128xf32>, vector<8x128xf32> -> vector<8x128xf32>
    %254 = arith.addf %252, %253 : vector<8x128xf32>
    %255 = arith.negf %254 : vector<8x128xf32>
    %256 = math.exp %255 : vector<8x128xf32>
    %cst_133 = arith.constant 1.000000e+00 : f32
    %257 = vector.broadcast %cst_133 : f32 to vector<8x128xf32>
    %258 = arith.addf %257, %256 : vector<8x128xf32>
    %259 = arith.divf %257, %258 : vector<8x128xf32>
    %cst_134 = arith.constant 2.000000e+00 : f32
    %260 = vector.broadcast %cst_134 : f32 to vector<8x128xf32>
    %261 = arith.mulf %260, %259 : vector<8x128xf32>
    %cst_135 = arith.constant 1.000000e+00 : f32
    %262 = vector.broadcast %cst_135 : f32 to vector<8x128xf32>
    %263 = arith.subf %261, %262 : vector<8x128xf32>
    %264 = arith.select %14, %263, %259 : vector<8x128xi1>, vector<8x128xf32>
    %265 = vector.extract_strided_slice %264 {offsets = [0, 0], sizes = [8, 32], strides = [1, 1]} : vector<8x128xf32> to vector<8x32xf32>
    %266 = vector.extract_strided_slice %264 {offsets = [0, 32], sizes = [8, 32], strides = [1, 1]} : vector<8x128xf32> to vector<8x32xf32>
    %267 = vector.extract_strided_slice %264 {offsets = [0, 64], sizes = [8, 32], strides = [1, 1]} : vector<8x128xf32> to vector<8x32xf32>
    %268 = vector.extract_strided_slice %264 {offsets = [0, 96], sizes = [8, 32], strides = [1, 1]} : vector<8x128xf32> to vector<8x32xf32>
    %269 = arith.mulf %266, %248 : vector<8x32xf32>
    %270 = arith.mulf %265, %267 : vector<8x32xf32>
    %271 = arith.addf %269, %270 : vector<8x32xf32>
    %272 = math.tanh %271 : vector<8x32xf32>
    %273 = arith.mulf %268, %272 : vector<8x32xf32>
    %c16_136 = arith.constant 16 : index
    %c0_137 = arith.constant 0 : index
    %274 = vector.load %arg27[%c16_136, %c0_137] : memref<128x32xf32, #tpu.memory_space<vmem>>, vector<8x32xf32>
    tpu.vector_store %arg27[%c16_136, %c0_137], %273 {strides = array<i32>} : memref<128x32xf32, #tpu.memory_space<vmem>>, vector<8x32xf32>,
    %c24_138 = arith.constant 24 : index
    %c0_139 = arith.constant 0 : index
    %275 = vector.load %arg26[%c24_138, %c0_139] : memref<128x128xf32, #tpu.memory_space<vmem>>, vector<8x128xf32>
    %cst_140 = arith.constant dense<0.000000e+00> : vector<8x128xf32>
    %276 = tpu.matmul %273, %203, %cst_140 {dimension_numbers = #tpu.dot_dimension_numbers<[1], [0], [0], [1], [0, 0, 1, 1], [], []>} : vector<8x32xf32>, vector<32x128xf32>, vector<8x128xf32> -> vector<8x128xf32>
    %277 = arith.addf %275, %276 : vector<8x128xf32>
    %278 = arith.negf %277 : vector<8x128xf32>
    %279 = math.exp %278 : vector<8x128xf32>
    %cst_141 = arith.constant 1.000000e+00 : f32
    %280 = vector.broadcast %cst_141 : f32 to vector<8x128xf32>
    %281 = arith.addf %280, %279 : vector<8x128xf32>
    %282 = arith.divf %280, %281 : vector<8x128xf32>
    %cst_142 = arith.constant 2.000000e+00 : f32
    %283 = vector.broadcast %cst_142 : f32 to vector<8x128xf32>
    %284 = arith.mulf %283, %282 : vector<8x128xf32>
    %cst_143 = arith.constant 1.000000e+00 : f32
    %285 = vector.broadcast %cst_143 : f32 to vector<8x128xf32>
    %286 = arith.subf %284, %285 : vector<8x128xf32>
    %287 = arith.select %14, %286, %282 : vector<8x128xi1>, vector<8x128xf32>
    %288 = vector.extract_strided_slice %287 {offsets = [0, 0], sizes = [8, 32], strides = [1, 1]} : vector<8x128xf32> to vector<8x32xf32>
    %289 = vector.extract_strided_slice %287 {offsets = [0, 32], sizes = [8, 32], strides = [1, 1]} : vector<8x128xf32> to vector<8x32xf32>
    %290 = vector.extract_strided_slice %287 {offsets = [0, 64], sizes = [8, 32], strides = [1, 1]} : vector<8x128xf32> to vector<8x32xf32>
    %291 = vector.extract_strided_slice %287 {offsets = [0, 96], sizes = [8, 32], strides = [1, 1]} : vector<8x128xf32> to vector<8x32xf32>
    %292 = arith.mulf %289, %271 : vector<8x32xf32>
    %293 = arith.mulf %288, %290 : vector<8x32xf32>
    %294 = arith.addf %292, %293 : vector<8x32xf32>
    %295 = math.tanh %294 : vector<8x32xf32>
    %296 = arith.mulf %291, %295 : vector<8x32xf32>
    %c24_144 = arith.constant 24 : index
    %c0_145 = arith.constant 0 : index
    %297 = vector.load %arg27[%c24_144, %c0_145] : memref<128x32xf32, #tpu.memory_space<vmem>>, vector<8x32xf32>
    tpu.vector_store %arg27[%c24_144, %c0_145], %296 {strides = array<i32>} : memref<128x32xf32, #tpu.memory_space<vmem>>, vector<8x32xf32>,
    %c32_146 = arith.constant 32 : index
    %c0_147 = arith.constant 0 : index
    %298 = vector.load %arg26[%c32_146, %c0_147] : memref<128x128xf32, #tpu.memory_space<vmem>>, vector<8x128xf32>
    %cst_148 = arith.constant dense<0.000000e+00> : vector<8x128xf32>
    %299 = tpu.matmul %296, %203, %cst_148 {dimension_numbers = #tpu.dot_dimension_numbers<[1], [0], [0], [1], [0, 0, 1, 1], [], []>} : vector<8x32xf32>, vector<32x128xf32>, vector<8x128xf32> -> vector<8x128xf32>
    %300 = arith.addf %298, %299 : vector<8x128xf32>
    %301 = arith.negf %300 : vector<8x128xf32>
    %302 = math.exp %301 : vector<8x128xf32>
    %cst_149 = arith.constant 1.000000e+00 : f32
    %303 = vector.broadcast %cst_149 : f32 to vector<8x128xf32>
    %304 = arith.addf %303, %302 : vector<8x128xf32>
    %305 = arith.divf %303, %304 : vector<8x128xf32>
    %cst_150 = arith.constant 2.000000e+00 : f32
    %306 = vector.broadcast %cst_150 : f32 to vector<8x128xf32>
    %307 = arith.mulf %306, %305 : vector<8x128xf32>
    %cst_151 = arith.constant 1.000000e+00 : f32
    %308 = vector.broadcast %cst_151 : f32 to vector<8x128xf32>
    %309 = arith.subf %307, %308 : vector<8x128xf32>
    %310 = arith.select %14, %309, %305 : vector<8x128xi1>, vector<8x128xf32>
    %311 = vector.extract_strided_slice %310 {offsets = [0, 0], sizes = [8, 32], strides = [1, 1]} : vector<8x128xf32> to vector<8x32xf32>
    %312 = vector.extract_strided_slice %310 {offsets = [0, 32], sizes = [8, 32], strides = [1, 1]} : vector<8x128xf32> to vector<8x32xf32>
    %313 = vector.extract_strided_slice %310 {offsets = [0, 64], sizes = [8, 32], strides = [1, 1]} : vector<8x128xf32> to vector<8x32xf32>
    %314 = vector.extract_strided_slice %310 {offsets = [0, 96], sizes = [8, 32], strides = [1, 1]} : vector<8x128xf32> to vector<8x32xf32>
    %315 = arith.mulf %312, %294 : vector<8x32xf32>
    %316 = arith.mulf %311, %313 : vector<8x32xf32>
    %317 = arith.addf %315, %316 : vector<8x32xf32>
    %318 = math.tanh %317 : vector<8x32xf32>
    %319 = arith.mulf %314, %318 : vector<8x32xf32>
    %c32_152 = arith.constant 32 : index
    %c0_153 = arith.constant 0 : index
    %320 = vector.load %arg27[%c32_152, %c0_153] : memref<128x32xf32, #tpu.memory_space<vmem>>, vector<8x32xf32>
    tpu.vector_store %arg27[%c32_152, %c0_153], %319 {strides = array<i32>} : memref<128x32xf32, #tpu.memory_space<vmem>>, vector<8x32xf32>,
    %c40_154 = arith.constant 40 : index
    %c0_155 = arith.constant 0 : index
    %321 = vector.load %arg26[%c40_154, %c0_155] : memref<128x128xf32, #tpu.memory_space<vmem>>, vector<8x128xf32>
    %cst_156 = arith.constant dense<0.000000e+00> : vector<8x128xf32>
    %322 = tpu.matmul %319, %203, %cst_156 {dimension_numbers = #tpu.dot_dimension_numbers<[1], [0], [0], [1], [0, 0, 1, 1], [], []>} : vector<8x32xf32>, vector<32x128xf32>, vector<8x128xf32> -> vector<8x128xf32>
    %323 = arith.addf %321, %322 : vector<8x128xf32>
    %324 = arith.negf %323 : vector<8x128xf32>
    %325 = math.exp %324 : vector<8x128xf32>
    %cst_157 = arith.constant 1.000000e+00 : f32
    %326 = vector.broadcast %cst_157 : f32 to vector<8x128xf32>
    %327 = arith.addf %326, %325 : vector<8x128xf32>
    %328 = arith.divf %326, %327 : vector<8x128xf32>
    %cst_158 = arith.constant 2.000000e+00 : f32
    %329 = vector.broadcast %cst_158 : f32 to vector<8x128xf32>
    %330 = arith.mulf %329, %328 : vector<8x128xf32>
    %cst_159 = arith.constant 1.000000e+00 : f32
    %331 = vector.broadcast %cst_159 : f32 to vector<8x128xf32>
    %332 = arith.subf %330, %331 : vector<8x128xf32>
    %333 = arith.select %14, %332, %328 : vector<8x128xi1>, vector<8x128xf32>
    %334 = vector.extract_strided_slice %333 {offsets = [0, 0], sizes = [8, 32], strides = [1, 1]} : vector<8x128xf32> to vector<8x32xf32>
    %335 = vector.extract_strided_slice %333 {offsets = [0, 32], sizes = [8, 32], strides = [1, 1]} : vector<8x128xf32> to vector<8x32xf32>
    %336 = vector.extract_strided_slice %333 {offsets = [0, 64], sizes = [8, 32], strides = [1, 1]} : vector<8x128xf32> to vector<8x32xf32>
    %337 = vector.extract_strided_slice %333 {offsets = [0, 96], sizes = [8, 32], strides = [1, 1]} : vector<8x128xf32> to vector<8x32xf32>
    %338 = arith.mulf %335, %317 : vector<8x32xf32>
    %339 = arith.mulf %334, %336 : vector<8x32xf32>
    %340 = arith.addf %338, %339 : vector<8x32xf32>
    %341 = math.tanh %340 : vector<8x32xf32>
    %342 = arith.mulf %337, %341 : vector<8x32xf32>
    %c40_160 = arith.constant 40 : index
    %c0_161 = arith.constant 0 : index
    %343 = vector.load %arg27[%c40_160, %c0_161] : memref<128x32xf32, #tpu.memory_space<vmem>>, vector<8x32xf32>
    tpu.vector_store %arg27[%c40_160, %c0_161], %342 {strides = array<i32>} : memref<128x32xf32, #tpu.memory_space<vmem>>, vector<8x32xf32>,
    %c48_162 = arith.constant 48 : index
    %c0_163 = arith.constant 0 : index
    %344 = vector.load %arg26[%c48_162, %c0_163] : memref<128x128xf32, #tpu.memory_space<vmem>>, vector<8x128xf32>
    %cst_164 = arith.constant dense<0.000000e+00> : vector<8x128xf32>
    %345 = tpu.matmul %342, %203, %cst_164 {dimension_numbers = #tpu.dot_dimension_numbers<[1], [0], [0], [1], [0, 0, 1, 1], [], []>} : vector<8x32xf32>, vector<32x128xf32>, vector<8x128xf32> -> vector<8x128xf32>
    %346 = arith.addf %344, %345 : vector<8x128xf32>
    %347 = arith.negf %346 : vector<8x128xf32>
    %348 = math.exp %347 : vector<8x128xf32>
    %cst_165 = arith.constant 1.000000e+00 : f32
    %349 = vector.broadcast %cst_165 : f32 to vector<8x128xf32>
    %350 = arith.addf %349, %348 : vector<8x128xf32>
    %351 = arith.divf %349, %350 : vector<8x128xf32>
    %cst_166 = arith.constant 2.000000e+00 : f32
    %352 = vector.broadcast %cst_166 : f32 to vector<8x128xf32>
    %353 = arith.mulf %352, %351 : vector<8x128xf32>
    %cst_167 = arith.constant 1.000000e+00 : f32
    %354 = vector.broadcast %cst_167 : f32 to vector<8x128xf32>
    %355 = arith.subf %353, %354 : vector<8x128xf32>
    %356 = arith.select %14, %355, %351 : vector<8x128xi1>, vector<8x128xf32>
    %357 = vector.extract_strided_slice %356 {offsets = [0, 0], sizes = [8, 32], strides = [1, 1]} : vector<8x128xf32> to vector<8x32xf32>
    %358 = vector.extract_strided_slice %356 {offsets = [0, 32], sizes = [8, 32], strides = [1, 1]} : vector<8x128xf32> to vector<8x32xf32>
    %359 = vector.extract_strided_slice %356 {offsets = [0, 64], sizes = [8, 32], strides = [1, 1]} : vector<8x128xf32> to vector<8x32xf32>
    %360 = vector.extract_strided_slice %356 {offsets = [0, 96], sizes = [8, 32], strides = [1, 1]} : vector<8x128xf32> to vector<8x32xf32>
    %361 = arith.mulf %358, %340 : vector<8x32xf32>
    %362 = arith.mulf %357, %359 : vector<8x32xf32>
    %363 = arith.addf %361, %362 : vector<8x32xf32>
    %364 = math.tanh %363 : vector<8x32xf32>
    %365 = arith.mulf %360, %364 : vector<8x32xf32>
    %c48_168 = arith.constant 48 : index
    %c0_169 = arith.constant 0 : index
    %366 = vector.load %arg27[%c48_168, %c0_169] : memref<128x32xf32, #tpu.memory_space<vmem>>, vector<8x32xf32>
    tpu.vector_store %arg27[%c48_168, %c0_169], %365 {strides = array<i32>} : memref<128x32xf32, #tpu.memory_space<vmem>>, vector<8x32xf32>,
    %c56_170 = arith.constant 56 : index
    %c0_171 = arith.constant 0 : index
    %367 = vector.load %arg26[%c56_170, %c0_171] : memref<128x128xf32, #tpu.memory_space<vmem>>, vector<8x128xf32>
    %cst_172 = arith.constant dense<0.000000e+00> : vector<8x128xf32>
    %368 = tpu.matmul %365, %203, %cst_172 {dimension_numbers = #tpu.dot_dimension_numbers<[1], [0], [0], [1], [0, 0, 1, 1], [], []>} : vector<8x32xf32>, vector<32x128xf32>, vector<8x128xf32> -> vector<8x128xf32>
    %369 = arith.addf %367, %368 : vector<8x128xf32>
    %370 = arith.negf %369 : vector<8x128xf32>
    %371 = math.exp %370 : vector<8x128xf32>
    %cst_173 = arith.constant 1.000000e+00 : f32
    %372 = vector.broadcast %cst_173 : f32 to vector<8x128xf32>
    %373 = arith.addf %372, %371 : vector<8x128xf32>
    %374 = arith.divf %372, %373 : vector<8x128xf32>
    %cst_174 = arith.constant 2.000000e+00 : f32
    %375 = vector.broadcast %cst_174 : f32 to vector<8x128xf32>
    %376 = arith.mulf %375, %374 : vector<8x128xf32>
    %cst_175 = arith.constant 1.000000e+00 : f32
    %377 = vector.broadcast %cst_175 : f32 to vector<8x128xf32>
    %378 = arith.subf %376, %377 : vector<8x128xf32>
    %379 = arith.select %14, %378, %374 : vector<8x128xi1>, vector<8x128xf32>
    %380 = vector.extract_strided_slice %379 {offsets = [0, 0], sizes = [8, 32], strides = [1, 1]} : vector<8x128xf32> to vector<8x32xf32>
    %381 = vector.extract_strided_slice %379 {offsets = [0, 32], sizes = [8, 32], strides = [1, 1]} : vector<8x128xf32> to vector<8x32xf32>
    %382 = vector.extract_strided_slice %379 {offsets = [0, 64], sizes = [8, 32], strides = [1, 1]} : vector<8x128xf32> to vector<8x32xf32>
    %383 = vector.extract_strided_slice %379 {offsets = [0, 96], sizes = [8, 32], strides = [1, 1]} : vector<8x128xf32> to vector<8x32xf32>
    %384 = arith.mulf %381, %363 : vector<8x32xf32>
    %385 = arith.mulf %380, %382 : vector<8x32xf32>
    %386 = arith.addf %384, %385 : vector<8x32xf32>
    %387 = math.tanh %386 : vector<8x32xf32>
    %388 = arith.mulf %383, %387 : vector<8x32xf32>
    %c56_176 = arith.constant 56 : index
    %c0_177 = arith.constant 0 : index
    %389 = vector.load %arg27[%c56_176, %c0_177] : memref<128x32xf32, #tpu.memory_space<vmem>>, vector<8x32xf32>
    tpu.vector_store %arg27[%c56_176, %c0_177], %388 {strides = array<i32>} : memref<128x32xf32, #tpu.memory_space<vmem>>, vector<8x32xf32>,
    %c64_178 = arith.constant 64 : index
    %c0_179 = arith.constant 0 : index
    %390 = vector.load %arg26[%c64_178, %c0_179] : memref<128x128xf32, #tpu.memory_space<vmem>>, vector<8x128xf32>
    %cst_180 = arith.constant dense<0.000000e+00> : vector<8x128xf32>
    %391 = tpu.matmul %388, %203, %cst_180 {dimension_numbers = #tpu.dot_dimension_numbers<[1], [0], [0], [1], [0, 0, 1, 1], [], []>} : vector<8x32xf32>, vector<32x128xf32>, vector<8x128xf32> -> vector<8x128xf32>
    %392 = arith.addf %390, %391 : vector<8x128xf32>
    %393 = arith.negf %392 : vector<8x128xf32>
    %394 = math.exp %393 : vector<8x128xf32>
    %cst_181 = arith.constant 1.000000e+00 : f32
    %395 = vector.broadcast %cst_181 : f32 to vector<8x128xf32>
    %396 = arith.addf %395, %394 : vector<8x128xf32>
    %397 = arith.divf %395, %396 : vector<8x128xf32>
    %cst_182 = arith.constant 2.000000e+00 : f32
    %398 = vector.broadcast %cst_182 : f32 to vector<8x128xf32>
    %399 = arith.mulf %398, %397 : vector<8x128xf32>
    %cst_183 = arith.constant 1.000000e+00 : f32
    %400 = vector.broadcast %cst_183 : f32 to vector<8x128xf32>
    %401 = arith.subf %399, %400 : vector<8x128xf32>
    %402 = arith.select %14, %401, %397 : vector<8x128xi1>, vector<8x128xf32>
    %403 = vector.extract_strided_slice %402 {offsets = [0, 0], sizes = [8, 32], strides = [1, 1]} : vector<8x128xf32> to vector<8x32xf32>
    %404 = vector.extract_strided_slice %402 {offsets = [0, 32], sizes = [8, 32], strides = [1, 1]} : vector<8x128xf32> to vector<8x32xf32>
    %405 = vector.extract_strided_slice %402 {offsets = [0, 64], sizes = [8, 32], strides = [1, 1]} : vector<8x128xf32> to vector<8x32xf32>
    %406 = vector.extract_strided_slice %402 {offsets = [0, 96], sizes = [8, 32], strides = [1, 1]} : vector<8x128xf32> to vector<8x32xf32>
    %407 = arith.mulf %404, %386 : vector<8x32xf32>
    %408 = arith.mulf %403, %405 : vector<8x32xf32>
    %409 = arith.addf %407, %408 : vector<8x32xf32>
    %410 = math.tanh %409 : vector<8x32xf32>
    %411 = arith.mulf %406, %410 : vector<8x32xf32>
    %c64_184 = arith.constant 64 : index
    %c0_185 = arith.constant 0 : index
    %412 = vector.load %arg27[%c64_184, %c0_185] : memref<128x32xf32, #tpu.memory_space<vmem>>, vector<8x32xf32>
    tpu.vector_store %arg27[%c64_184, %c0_185], %411 {strides = array<i32>} : memref<128x32xf32, #tpu.memory_space<vmem>>, vector<8x32xf32>,
    %c72_186 = arith.constant 72 : index
    %c0_187 = arith.constant 0 : index
    %413 = vector.load %arg26[%c72_186, %c0_187] : memref<128x128xf32, #tpu.memory_space<vmem>>, vector<8x128xf32>
    %cst_188 = arith.constant dense<0.000000e+00> : vector<8x128xf32>
    %414 = tpu.matmul %411, %203, %cst_188 {dimension_numbers = #tpu.dot_dimension_numbers<[1], [0], [0], [1], [0, 0, 1, 1], [], []>} : vector<8x32xf32>, vector<32x128xf32>, vector<8x128xf32> -> vector<8x128xf32>
    %415 = arith.addf %413, %414 : vector<8x128xf32>
    %416 = arith.negf %415 : vector<8x128xf32>
    %417 = math.exp %416 : vector<8x128xf32>
    %cst_189 = arith.constant 1.000000e+00 : f32
    %418 = vector.broadcast %cst_189 : f32 to vector<8x128xf32>
    %419 = arith.addf %418, %417 : vector<8x128xf32>
    %420 = arith.divf %418, %419 : vector<8x128xf32>
    %cst_190 = arith.constant 2.000000e+00 : f32
    %421 = vector.broadcast %cst_190 : f32 to vector<8x128xf32>
    %422 = arith.mulf %421, %420 : vector<8x128xf32>
    %cst_191 = arith.constant 1.000000e+00 : f32
    %423 = vector.broadcast %cst_191 : f32 to vector<8x128xf32>
    %424 = arith.subf %422, %423 : vector<8x128xf32>
    %425 = arith.select %14, %424, %420 : vector<8x128xi1>, vector<8x128xf32>
    %426 = vector.extract_strided_slice %425 {offsets = [0, 0], sizes = [8, 32], strides = [1, 1]} : vector<8x128xf32> to vector<8x32xf32>
    %427 = vector.extract_strided_slice %425 {offsets = [0, 32], sizes = [8, 32], strides = [1, 1]} : vector<8x128xf32> to vector<8x32xf32>
    %428 = vector.extract_strided_slice %425 {offsets = [0, 64], sizes = [8, 32], strides = [1, 1]} : vector<8x128xf32> to vector<8x32xf32>
    %429 = vector.extract_strided_slice %425 {offsets = [0, 96], sizes = [8, 32], strides = [1, 1]} : vector<8x128xf32> to vector<8x32xf32>
    %430 = arith.mulf %427, %409 : vector<8x32xf32>
    %431 = arith.mulf %426, %428 : vector<8x32xf32>
    %432 = arith.addf %430, %431 : vector<8x32xf32>
    %433 = math.tanh %432 : vector<8x32xf32>
    %434 = arith.mulf %429, %433 : vector<8x32xf32>
    %c72_192 = arith.constant 72 : index
    %c0_193 = arith.constant 0 : index
    %435 = vector.load %arg27[%c72_192, %c0_193] : memref<128x32xf32, #tpu.memory_space<vmem>>, vector<8x32xf32>
    tpu.vector_store %arg27[%c72_192, %c0_193], %434 {strides = array<i32>} : memref<128x32xf32, #tpu.memory_space<vmem>>, vector<8x32xf32>,
    %c80_194 = arith.constant 80 : index
    %c0_195 = arith.constant 0 : index
    %436 = vector.load %arg26[%c80_194, %c0_195] : memref<128x128xf32, #tpu.memory_space<vmem>>, vector<8x128xf32>
    %cst_196 = arith.constant dense<0.000000e+00> : vector<8x128xf32>
    %437 = tpu.matmul %434, %203, %cst_196 {dimension_numbers = #tpu.dot_dimension_numbers<[1], [0], [0], [1], [0, 0, 1, 1], [], []>} : vector<8x32xf32>, vector<32x128xf32>, vector<8x128xf32> -> vector<8x128xf32>
    %438 = arith.addf %436, %437 : vector<8x128xf32>
    %439 = arith.negf %438 : vector<8x128xf32>
    %440 = math.exp %439 : vector<8x128xf32>
    %cst_197 = arith.constant 1.000000e+00 : f32
    %441 = vector.broadcast %cst_197 : f32 to vector<8x128xf32>
    %442 = arith.addf %441, %440 : vector<8x128xf32>
    %443 = arith.divf %441, %442 : vector<8x128xf32>
    %cst_198 = arith.constant 2.000000e+00 : f32
    %444 = vector.broadcast %cst_198 : f32 to vector<8x128xf32>
    %445 = arith.mulf %444, %443 : vector<8x128xf32>
    %cst_199 = arith.constant 1.000000e+00 : f32
    %446 = vector.broadcast %cst_199 : f32 to vector<8x128xf32>
    %447 = arith.subf %445, %446 : vector<8x128xf32>
    %448 = arith.select %14, %447, %443 : vector<8x128xi1>, vector<8x128xf32>
    %449 = vector.extract_strided_slice %448 {offsets = [0, 0], sizes = [8, 32], strides = [1, 1]} : vector<8x128xf32> to vector<8x32xf32>
    %450 = vector.extract_strided_slice %448 {offsets = [0, 32], sizes = [8, 32], strides = [1, 1]} : vector<8x128xf32> to vector<8x32xf32>
    %451 = vector.extract_strided_slice %448 {offsets = [0, 64], sizes = [8, 32], strides = [1, 1]} : vector<8x128xf32> to vector<8x32xf32>
    %452 = vector.extract_strided_slice %448 {offsets = [0, 96], sizes = [8, 32], strides = [1, 1]} : vector<8x128xf32> to vector<8x32xf32>
    %453 = arith.mulf %450, %432 : vector<8x32xf32>
    %454 = arith.mulf %449, %451 : vector<8x32xf32>
    %455 = arith.addf %453, %454 : vector<8x32xf32>
    %456 = math.tanh %455 : vector<8x32xf32>
    %457 = arith.mulf %452, %456 : vector<8x32xf32>
    %c80_200 = arith.constant 80 : index
    %c0_201 = arith.constant 0 : index
    %458 = vector.load %arg27[%c80_200, %c0_201] : memref<128x32xf32, #tpu.memory_space<vmem>>, vector<8x32xf32>
    tpu.vector_store %arg27[%c80_200, %c0_201], %457 {strides = array<i32>} : memref<128x32xf32, #tpu.memory_space<vmem>>, vector<8x32xf32>,
    %c88_202 = arith.constant 88 : index
    %c0_203 = arith.constant 0 : index
    %459 = vector.load %arg26[%c88_202, %c0_203] : memref<128x128xf32, #tpu.memory_space<vmem>>, vector<8x128xf32>
    %cst_204 = arith.constant dense<0.000000e+00> : vector<8x128xf32>
    %460 = tpu.matmul %457, %203, %cst_204 {dimension_numbers = #tpu.dot_dimension_numbers<[1], [0], [0], [1], [0, 0, 1, 1], [], []>} : vector<8x32xf32>, vector<32x128xf32>, vector<8x128xf32> -> vector<8x128xf32>
    %461 = arith.addf %459, %460 : vector<8x128xf32>
    %462 = arith.negf %461 : vector<8x128xf32>
    %463 = math.exp %462 : vector<8x128xf32>
    %cst_205 = arith.constant 1.000000e+00 : f32
    %464 = vector.broadcast %cst_205 : f32 to vector<8x128xf32>
    %465 = arith.addf %464, %463 : vector<8x128xf32>
    %466 = arith.divf %464, %465 : vector<8x128xf32>
    %cst_206 = arith.constant 2.000000e+00 : f32
    %467 = vector.broadcast %cst_206 : f32 to vector<8x128xf32>
    %468 = arith.mulf %467, %466 : vector<8x128xf32>
    %cst_207 = arith.constant 1.000000e+00 : f32
    %469 = vector.broadcast %cst_207 : f32 to vector<8x128xf32>
    %470 = arith.subf %468, %469 : vector<8x128xf32>
    %471 = arith.select %14, %470, %466 : vector<8x128xi1>, vector<8x128xf32>
    %472 = vector.extract_strided_slice %471 {offsets = [0, 0], sizes = [8, 32], strides = [1, 1]} : vector<8x128xf32> to vector<8x32xf32>
    %473 = vector.extract_strided_slice %471 {offsets = [0, 32], sizes = [8, 32], strides = [1, 1]} : vector<8x128xf32> to vector<8x32xf32>
    %474 = vector.extract_strided_slice %471 {offsets = [0, 64], sizes = [8, 32], strides = [1, 1]} : vector<8x128xf32> to vector<8x32xf32>
    %475 = vector.extract_strided_slice %471 {offsets = [0, 96], sizes = [8, 32], strides = [1, 1]} : vector<8x128xf32> to vector<8x32xf32>
    %476 = arith.mulf %473, %455 : vector<8x32xf32>
    %477 = arith.mulf %472, %474 : vector<8x32xf32>
    %478 = arith.addf %476, %477 : vector<8x32xf32>
    %479 = math.tanh %478 : vector<8x32xf32>
    %480 = arith.mulf %475, %479 : vector<8x32xf32>
    %c88_208 = arith.constant 88 : index
    %c0_209 = arith.constant 0 : index
    %481 = vector.load %arg27[%c88_208, %c0_209] : memref<128x32xf32, #tpu.memory_space<vmem>>, vector<8x32xf32>
    tpu.vector_store %arg27[%c88_208, %c0_209], %480 {strides = array<i32>} : memref<128x32xf32, #tpu.memory_space<vmem>>, vector<8x32xf32>,
    %c96_210 = arith.constant 96 : index
    %c0_211 = arith.constant 0 : index
    %482 = vector.load %arg26[%c96_210, %c0_211] : memref<128x128xf32, #tpu.memory_space<vmem>>, vector<8x128xf32>
    %cst_212 = arith.constant dense<0.000000e+00> : vector<8x128xf32>
    %483 = tpu.matmul %480, %203, %cst_212 {dimension_numbers = #tpu.dot_dimension_numbers<[1], [0], [0], [1], [0, 0, 1, 1], [], []>} : vector<8x32xf32>, vector<32x128xf32>, vector<8x128xf32> -> vector<8x128xf32>
    %484 = arith.addf %482, %483 : vector<8x128xf32>
    %485 = arith.negf %484 : vector<8x128xf32>
    %486 = math.exp %485 : vector<8x128xf32>
    %cst_213 = arith.constant 1.000000e+00 : f32
    %487 = vector.broadcast %cst_213 : f32 to vector<8x128xf32>
    %488 = arith.addf %487, %486 : vector<8x128xf32>
    %489 = arith.divf %487, %488 : vector<8x128xf32>
    %cst_214 = arith.constant 2.000000e+00 : f32
    %490 = vector.broadcast %cst_214 : f32 to vector<8x128xf32>
    %491 = arith.mulf %490, %489 : vector<8x128xf32>
    %cst_215 = arith.constant 1.000000e+00 : f32
    %492 = vector.broadcast %cst_215 : f32 to vector<8x128xf32>
    %493 = arith.subf %491, %492 : vector<8x128xf32>
    %494 = arith.select %14, %493, %489 : vector<8x128xi1>, vector<8x128xf32>
    %495 = vector.extract_strided_slice %494 {offsets = [0, 0], sizes = [8, 32], strides = [1, 1]} : vector<8x128xf32> to vector<8x32xf32>
    %496 = vector.extract_strided_slice %494 {offsets = [0, 32], sizes = [8, 32], strides = [1, 1]} : vector<8x128xf32> to vector<8x32xf32>
    %497 = vector.extract_strided_slice %494 {offsets = [0, 64], sizes = [8, 32], strides = [1, 1]} : vector<8x128xf32> to vector<8x32xf32>
    %498 = vector.extract_strided_slice %494 {offsets = [0, 96], sizes = [8, 32], strides = [1, 1]} : vector<8x128xf32> to vector<8x32xf32>
    %499 = arith.mulf %496, %478 : vector<8x32xf32>
    %500 = arith.mulf %495, %497 : vector<8x32xf32>
    %501 = arith.addf %499, %500 : vector<8x32xf32>
    %502 = math.tanh %501 : vector<8x32xf32>
    %503 = arith.mulf %498, %502 : vector<8x32xf32>
    %c96_216 = arith.constant 96 : index
    %c0_217 = arith.constant 0 : index
    %504 = vector.load %arg27[%c96_216, %c0_217] : memref<128x32xf32, #tpu.memory_space<vmem>>, vector<8x32xf32>
    tpu.vector_store %arg27[%c96_216, %c0_217], %503 {strides = array<i32>} : memref<128x32xf32, #tpu.memory_space<vmem>>, vector<8x32xf32>,
    %c104_218 = arith.constant 104 : index
    %c0_219 = arith.constant 0 : index
    %505 = vector.load %arg26[%c104_218, %c0_219] : memref<128x128xf32, #tpu.memory_space<vmem>>, vector<8x128xf32>
    %cst_220 = arith.constant dense<0.000000e+00> : vector<8x128xf32>
    %506 = tpu.matmul %503, %203, %cst_220 {dimension_numbers = #tpu.dot_dimension_numbers<[1], [0], [0], [1], [0, 0, 1, 1], [], []>} : vector<8x32xf32>, vector<32x128xf32>, vector<8x128xf32> -> vector<8x128xf32>
    %507 = arith.addf %505, %506 : vector<8x128xf32>
    %508 = arith.negf %507 : vector<8x128xf32>
    %509 = math.exp %508 : vector<8x128xf32>
    %cst_221 = arith.constant 1.000000e+00 : f32
    %510 = vector.broadcast %cst_221 : f32 to vector<8x128xf32>
    %511 = arith.addf %510, %509 : vector<8x128xf32>
    %512 = arith.divf %510, %511 : vector<8x128xf32>
    %cst_222 = arith.constant 2.000000e+00 : f32
    %513 = vector.broadcast %cst_222 : f32 to vector<8x128xf32>
    %514 = arith.mulf %513, %512 : vector<8x128xf32>
    %cst_223 = arith.constant 1.000000e+00 : f32
    %515 = vector.broadcast %cst_223 : f32 to vector<8x128xf32>
    %516 = arith.subf %514, %515 : vector<8x128xf32>
    %517 = arith.select %14, %516, %512 : vector<8x128xi1>, vector<8x128xf32>
    %518 = vector.extract_strided_slice %517 {offsets = [0, 0], sizes = [8, 32], strides = [1, 1]} : vector<8x128xf32> to vector<8x32xf32>
    %519 = vector.extract_strided_slice %517 {offsets = [0, 32], sizes = [8, 32], strides = [1, 1]} : vector<8x128xf32> to vector<8x32xf32>
    %520 = vector.extract_strided_slice %517 {offsets = [0, 64], sizes = [8, 32], strides = [1, 1]} : vector<8x128xf32> to vector<8x32xf32>
    %521 = vector.extract_strided_slice %517 {offsets = [0, 96], sizes = [8, 32], strides = [1, 1]} : vector<8x128xf32> to vector<8x32xf32>
    %522 = arith.mulf %519, %501 : vector<8x32xf32>
    %523 = arith.mulf %518, %520 : vector<8x32xf32>
    %524 = arith.addf %522, %523 : vector<8x32xf32>
    %525 = math.tanh %524 : vector<8x32xf32>
    %526 = arith.mulf %521, %525 : vector<8x32xf32>
    %c104_224 = arith.constant 104 : index
    %c0_225 = arith.constant 0 : index
    %527 = vector.load %arg27[%c104_224, %c0_225] : memref<128x32xf32, #tpu.memory_space<vmem>>, vector<8x32xf32>
    tpu.vector_store %arg27[%c104_224, %c0_225], %526 {strides = array<i32>} : memref<128x32xf32, #tpu.memory_space<vmem>>, vector<8x32xf32>,
    %c112_226 = arith.constant 112 : index
    %c0_227 = arith.constant 0 : index
    %528 = vector.load %arg26[%c112_226, %c0_227] : memref<128x128xf32, #tpu.memory_space<vmem>>, vector<8x128xf32>
    %cst_228 = arith.constant dense<0.000000e+00> : vector<8x128xf32>
    %529 = tpu.matmul %526, %203, %cst_228 {dimension_numbers = #tpu.dot_dimension_numbers<[1], [0], [0], [1], [0, 0, 1, 1], [], []>} : vector<8x32xf32>, vector<32x128xf32>, vector<8x128xf32> -> vector<8x128xf32>
    %530 = arith.addf %528, %529 : vector<8x128xf32>
    %531 = arith.negf %530 : vector<8x128xf32>
    %532 = math.exp %531 : vector<8x128xf32>
    %cst_229 = arith.constant 1.000000e+00 : f32
    %533 = vector.broadcast %cst_229 : f32 to vector<8x128xf32>
    %534 = arith.addf %533, %532 : vector<8x128xf32>
    %535 = arith.divf %533, %534 : vector<8x128xf32>
    %cst_230 = arith.constant 2.000000e+00 : f32
    %536 = vector.broadcast %cst_230 : f32 to vector<8x128xf32>
    %537 = arith.mulf %536, %535 : vector<8x128xf32>
    %cst_231 = arith.constant 1.000000e+00 : f32
    %538 = vector.broadcast %cst_231 : f32 to vector<8x128xf32>
    %539 = arith.subf %537, %538 : vector<8x128xf32>
    %540 = arith.select %14, %539, %535 : vector<8x128xi1>, vector<8x128xf32>
    %541 = vector.extract_strided_slice %540 {offsets = [0, 0], sizes = [8, 32], strides = [1, 1]} : vector<8x128xf32> to vector<8x32xf32>
    %542 = vector.extract_strided_slice %540 {offsets = [0, 32], sizes = [8, 32], strides = [1, 1]} : vector<8x128xf32> to vector<8x32xf32>
    %543 = vector.extract_strided_slice %540 {offsets = [0, 64], sizes = [8, 32], strides = [1, 1]} : vector<8x128xf32> to vector<8x32xf32>
    %544 = vector.extract_strided_slice %540 {offsets = [0, 96], sizes = [8, 32], strides = [1, 1]} : vector<8x128xf32> to vector<8x32xf32>
    %545 = arith.mulf %542, %524 : vector<8x32xf32>
    %546 = arith.mulf %541, %543 : vector<8x32xf32>
    %547 = arith.addf %545, %546 : vector<8x32xf32>
    %548 = math.tanh %547 : vector<8x32xf32>
    %549 = arith.mulf %544, %548 : vector<8x32xf32>
    %c112_232 = arith.constant 112 : index
    %c0_233 = arith.constant 0 : index
    %550 = vector.load %arg27[%c112_232, %c0_233] : memref<128x32xf32, #tpu.memory_space<vmem>>, vector<8x32xf32>
    tpu.vector_store %arg27[%c112_232, %c0_233], %549 {strides = array<i32>} : memref<128x32xf32, #tpu.memory_space<vmem>>, vector<8x32xf32>,
    %c120_234 = arith.constant 120 : index
    %c0_235 = arith.constant 0 : index
    %551 = vector.load %arg26[%c120_234, %c0_235] : memref<128x128xf32, #tpu.memory_space<vmem>>, vector<8x128xf32>
    %cst_236 = arith.constant dense<0.000000e+00> : vector<8x128xf32>
    %552 = tpu.matmul %549, %203, %cst_236 {dimension_numbers = #tpu.dot_dimension_numbers<[1], [0], [0], [1], [0, 0, 1, 1], [], []>} : vector<8x32xf32>, vector<32x128xf32>, vector<8x128xf32> -> vector<8x128xf32>
    %553 = arith.addf %551, %552 : vector<8x128xf32>
    %554 = arith.negf %553 : vector<8x128xf32>
    %555 = math.exp %554 : vector<8x128xf32>
    %cst_237 = arith.constant 1.000000e+00 : f32
    %556 = vector.broadcast %cst_237 : f32 to vector<8x128xf32>
    %557 = arith.addf %556, %555 : vector<8x128xf32>
    %558 = arith.divf %556, %557 : vector<8x128xf32>
    %cst_238 = arith.constant 2.000000e+00 : f32
    %559 = vector.broadcast %cst_238 : f32 to vector<8x128xf32>
    %560 = arith.mulf %559, %558 : vector<8x128xf32>
    %cst_239 = arith.constant 1.000000e+00 : f32
    %561 = vector.broadcast %cst_239 : f32 to vector<8x128xf32>
    %562 = arith.subf %560, %561 : vector<8x128xf32>
    %563 = arith.select %14, %562, %558 : vector<8x128xi1>, vector<8x128xf32>
    %564 = vector.extract_strided_slice %563 {offsets = [0, 0], sizes = [8, 32], strides = [1, 1]} : vector<8x128xf32> to vector<8x32xf32>
    %565 = vector.extract_strided_slice %563 {offsets = [0, 32], sizes = [8, 32], strides = [1, 1]} : vector<8x128xf32> to vector<8x32xf32>
    %566 = vector.extract_strided_slice %563 {offsets = [0, 64], sizes = [8, 32], strides = [1, 1]} : vector<8x128xf32> to vector<8x32xf32>
    %567 = vector.extract_strided_slice %563 {offsets = [0, 96], sizes = [8, 32], strides = [1, 1]} : vector<8x128xf32> to vector<8x32xf32>
    %568 = arith.mulf %565, %547 : vector<8x32xf32>
    %569 = arith.mulf %564, %566 : vector<8x32xf32>
    %570 = arith.addf %568, %569 : vector<8x32xf32>
    %571 = math.tanh %570 : vector<8x32xf32>
    %572 = arith.mulf %567, %571 : vector<8x32xf32>
    %c120_240 = arith.constant 120 : index
    %c0_241 = arith.constant 0 : index
    %573 = vector.load %arg27[%c120_240, %c0_241] : memref<128x32xf32, #tpu.memory_space<vmem>>, vector<8x32xf32>
    tpu.vector_store %arg27[%c120_240, %c0_241], %572 {strides = array<i32>} : memref<128x32xf32, #tpu.memory_space<vmem>>, vector<8x32xf32>,
    %c0_242 = arith.constant 0 : index
    %c0_243 = arith.constant 0 : index
    %574 = vector.load %arg27[%c0_242, %c0_243] : memref<128x32xf32, #tpu.memory_space<vmem>>, vector<128x16xf32>
    %c0_244 = arith.constant 0 : index
    %c0_245 = arith.constant 0 : index
    %575 = vector.load %arg28[%c0_244, %c0_245] : memref<128x32xf32, #tpu.memory_space<vmem>>, vector<128x16xf32>
    tpu.vector_store %arg28[%c0_244, %c0_245], %574 {strides = array<i32>} : memref<128x32xf32, #tpu.memory_space<vmem>>, vector<128x16xf32>,
    %c120_246 = arith.constant 120 : index
    %c16_247 = arith.constant 16 : index
    %576 = vector.load %arg27[%c120_246, %c16_247] : memref<128x32xf32, #tpu.memory_space<vmem>>, vector<8x16xf32>
    %c0_248 = arith.constant 0 : index
    %c16_249 = arith.constant 16 : index
    %577 = vector.load %arg28[%c0_248, %c16_249] : memref<128x32xf32, #tpu.memory_space<vmem>>, vector<8x16xf32>
    tpu.vector_store %arg28[%c0_248, %c16_249], %576 {strides = array<i32>} : memref<128x32xf32, #tpu.memory_space<vmem>>, vector<8x16xf32>,
    %c112_250 = arith.constant 112 : index
    %c16_251 = arith.constant 16 : index
    %578 = vector.load %arg27[%c112_250, %c16_251] : memref<128x32xf32, #tpu.memory_space<vmem>>, vector<8x16xf32>
    %c8_252 = arith.constant 8 : index
    %c16_253 = arith.constant 16 : index
    %579 = vector.load %arg28[%c8_252, %c16_253] : memref<128x32xf32, #tpu.memory_space<vmem>>, vector<8x16xf32>
    tpu.vector_store %arg28[%c8_252, %c16_253], %578 {strides = array<i32>} : memref<128x32xf32, #tpu.memory_space<vmem>>, vector<8x16xf32>,
    %c104_254 = arith.constant 104 : index
    %c16_255 = arith.constant 16 : index
    %580 = vector.load %arg27[%c104_254, %c16_255] : memref<128x32xf32, #tpu.memory_space<vmem>>, vector<8x16xf32>
    %c16_256 = arith.constant 16 : index
    %c16_257 = arith.constant 16 : index
    %581 = vector.load %arg28[%c16_256, %c16_257] : memref<128x32xf32, #tpu.memory_space<vmem>>, vector<8x16xf32>
    tpu.vector_store %arg28[%c16_256, %c16_257], %580 {strides = array<i32>} : memref<128x32xf32, #tpu.memory_space<vmem>>, vector<8x16xf32>,
    %c96_258 = arith.constant 96 : index
    %c16_259 = arith.constant 16 : index
    %582 = vector.load %arg27[%c96_258, %c16_259] : memref<128x32xf32, #tpu.memory_space<vmem>>, vector<8x16xf32>
    %c24_260 = arith.constant 24 : index
    %c16_261 = arith.constant 16 : index
    %583 = vector.load %arg28[%c24_260, %c16_261] : memref<128x32xf32, #tpu.memory_space<vmem>>, vector<8x16xf32>
    tpu.vector_store %arg28[%c24_260, %c16_261], %582 {strides = array<i32>} : memref<128x32xf32, #tpu.memory_space<vmem>>, vector<8x16xf32>,
    %c88_262 = arith.constant 88 : index
    %c16_263 = arith.constant 16 : index
    %584 = vector.load %arg27[%c88_262, %c16_263] : memref<128x32xf32, #tpu.memory_space<vmem>>, vector<8x16xf32>
    %c32_264 = arith.constant 32 : index
    %c16_265 = arith.constant 16 : index
    %585 = vector.load %arg28[%c32_264, %c16_265] : memref<128x32xf32, #tpu.memory_space<vmem>>, vector<8x16xf32>
    tpu.vector_store %arg28[%c32_264, %c16_265], %584 {strides = array<i32>} : memref<128x32xf32, #tpu.memory_space<vmem>>, vector<8x16xf32>,
    %c80_266 = arith.constant 80 : index
    %c16_267 = arith.constant 16 : index
    %586 = vector.load %arg27[%c80_266, %c16_267] : memref<128x32xf32, #tpu.memory_space<vmem>>, vector<8x16xf32>
    %c40_268 = arith.constant 40 : index
    %c16_269 = arith.constant 16 : index
    %587 = vector.load %arg28[%c40_268, %c16_269] : memref<128x32xf32, #tpu.memory_space<vmem>>, vector<8x16xf32>
    tpu.vector_store %arg28[%c40_268, %c16_269], %586 {strides = array<i32>} : memref<128x32xf32, #tpu.memory_space<vmem>>, vector<8x16xf32>,
    %c72_270 = arith.constant 72 : index
    %c16_271 = arith.constant 16 : index
    %588 = vector.load %arg27[%c72_270, %c16_271] : memref<128x32xf32, #tpu.memory_space<vmem>>, vector<8x16xf32>
    %c48_272 = arith.constant 48 : index
    %c16_273 = arith.constant 16 : index
    %589 = vector.load %arg28[%c48_272, %c16_273] : memref<128x32xf32, #tpu.memory_space<vmem>>, vector<8x16xf32>
    tpu.vector_store %arg28[%c48_272, %c16_273], %588 {strides = array<i32>} : memref<128x32xf32, #tpu.memory_space<vmem>>, vector<8x16xf32>,
    %c64_274 = arith.constant 64 : index
    %c16_275 = arith.constant 16 : index
    %590 = vector.load %arg27[%c64_274, %c16_275] : memref<128x32xf32, #tpu.memory_space<vmem>>, vector<8x16xf32>
    %c56_276 = arith.constant 56 : index
    %c16_277 = arith.constant 16 : index
    %591 = vector.load %arg28[%c56_276, %c16_277] : memref<128x32xf32, #tpu.memory_space<vmem>>, vector<8x16xf32>
    tpu.vector_store %arg28[%c56_276, %c16_277], %590 {strides = array<i32>} : memref<128x32xf32, #tpu.memory_space<vmem>>, vector<8x16xf32>,
    %c56_278 = arith.constant 56 : index
    %c16_279 = arith.constant 16 : index
    %592 = vector.load %arg27[%c56_278, %c16_279] : memref<128x32xf32, #tpu.memory_space<vmem>>, vector<8x16xf32>
    %c64_280 = arith.constant 64 : index
    %c16_281 = arith.constant 16 : index
    %593 = vector.load %arg28[%c64_280, %c16_281] : memref<128x32xf32, #tpu.memory_space<vmem>>, vector<8x16xf32>
    tpu.vector_store %arg28[%c64_280, %c16_281], %592 {strides = array<i32>} : memref<128x32xf32, #tpu.memory_space<vmem>>, vector<8x16xf32>,
    %c48_282 = arith.constant 48 : index
    %c16_283 = arith.constant 16 : index
    %594 = vector.load %arg27[%c48_282, %c16_283] : memref<128x32xf32, #tpu.memory_space<vmem>>, vector<8x16xf32>
    %c72_284 = arith.constant 72 : index
    %c16_285 = arith.constant 16 : index
    %595 = vector.load %arg28[%c72_284, %c16_285] : memref<128x32xf32, #tpu.memory_space<vmem>>, vector<8x16xf32>
    tpu.vector_store %arg28[%c72_284, %c16_285], %594 {strides = array<i32>} : memref<128x32xf32, #tpu.memory_space<vmem>>, vector<8x16xf32>,
    %c40_286 = arith.constant 40 : index
    %c16_287 = arith.constant 16 : index
    %596 = vector.load %arg27[%c40_286, %c16_287] : memref<128x32xf32, #tpu.memory_space<vmem>>, vector<8x16xf32>
    %c80_288 = arith.constant 80 : index
    %c16_289 = arith.constant 16 : index
    %597 = vector.load %arg28[%c80_288, %c16_289] : memref<128x32xf32, #tpu.memory_space<vmem>>, vector<8x16xf32>
    tpu.vector_store %arg28[%c80_288, %c16_289], %596 {strides = array<i32>} : memref<128x32xf32, #tpu.memory_space<vmem>>, vector<8x16xf32>,
    %c32_290 = arith.constant 32 : index
    %c16_291 = arith.constant 16 : index
    %598 = vector.load %arg27[%c32_290, %c16_291] : memref<128x32xf32, #tpu.memory_space<vmem>>, vector<8x16xf32>
    %c88_292 = arith.constant 88 : index
    %c16_293 = arith.constant 16 : index
    %599 = vector.load %arg28[%c88_292, %c16_293] : memref<128x32xf32, #tpu.memory_space<vmem>>, vector<8x16xf32>
    tpu.vector_store %arg28[%c88_292, %c16_293], %598 {strides = array<i32>} : memref<128x32xf32, #tpu.memory_space<vmem>>, vector<8x16xf32>,
    %c24_294 = arith.constant 24 : index
    %c16_295 = arith.constant 16 : index
    %600 = vector.load %arg27[%c24_294, %c16_295] : memref<128x32xf32, #tpu.memory_space<vmem>>, vector<8x16xf32>
    %c96_296 = arith.constant 96 : index
    %c16_297 = arith.constant 16 : index
    %601 = vector.load %arg28[%c96_296, %c16_297] : memref<128x32xf32, #tpu.memory_space<vmem>>, vector<8x16xf32>
    tpu.vector_store %arg28[%c96_296, %c16_297], %600 {strides = array<i32>} : memref<128x32xf32, #tpu.memory_space<vmem>>, vector<8x16xf32>,
    %c16_298 = arith.constant 16 : index
    %c16_299 = arith.constant 16 : index
    %602 = vector.load %arg27[%c16_298, %c16_299] : memref<128x32xf32, #tpu.memory_space<vmem>>, vector<8x16xf32>
    %c104_300 = arith.constant 104 : index
    %c16_301 = arith.constant 16 : index
    %603 = vector.load %arg28[%c104_300, %c16_301] : memref<128x32xf32, #tpu.memory_space<vmem>>, vector<8x16xf32>
    tpu.vector_store %arg28[%c104_300, %c16_301], %602 {strides = array<i32>} : memref<128x32xf32, #tpu.memory_space<vmem>>, vector<8x16xf32>,
    %c8_302 = arith.constant 8 : index
    %c16_303 = arith.constant 16 : index
    %604 = vector.load %arg27[%c8_302, %c16_303] : memref<128x32xf32, #tpu.memory_space<vmem>>, vector<8x16xf32>
    %c112_304 = arith.constant 112 : index
    %c16_305 = arith.constant 16 : index
    %605 = vector.load %arg28[%c112_304, %c16_305] : memref<128x32xf32, #tpu.memory_space<vmem>>, vector<8x16xf32>
    tpu.vector_store %arg28[%c112_304, %c16_305], %604 {strides = array<i32>} : memref<128x32xf32, #tpu.memory_space<vmem>>, vector<8x16xf32>,
    %c0_306 = arith.constant 0 : index
    %c16_307 = arith.constant 16 : index
    %606 = vector.load %arg27[%c0_306, %c16_307] : memref<128x32xf32, #tpu.memory_space<vmem>>, vector<8x16xf32>
    %c120_308 = arith.constant 120 : index
    %c16_309 = arith.constant 16 : index
    %607 = vector.load %arg28[%c120_308, %c16_309] : memref<128x32xf32, #tpu.memory_space<vmem>>, vector<8x16xf32>
    tpu.vector_store %arg28[%c120_308, %c16_309], %606 {strides = array<i32>} : memref<128x32xf32, #tpu.memory_space<vmem>>, vector<8x16xf32>,
    %c0_310 = arith.constant 0 : index
    %c0_311 = arith.constant 0 : index
    %608 = vector.load %arg28[%c0_310, %c0_311] : memref<128x32xf32, #tpu.memory_space<vmem>>, vector<128x32xf32>
    %c0_312 = arith.constant 0 : index
    %c0_313 = arith.constant 0 : index
    %609 = vector.load %arg16[%c0_312, %c0_313] : memref<32x128xf32, #tpu.memory_space<vmem>>, vector<32x128xf32>
    %cst_314 = arith.constant dense<0.000000e+00> : vector<128x128xf32>
    %610 = tpu.matmul %608, %609, %cst_314 {dimension_numbers = #tpu.dot_dimension_numbers<[1], [0], [0], [1], [0, 0, 1, 1], [], []>} : vector<128x32xf32>, vector<32x128xf32>, vector<128x128xf32> -> vector<128x128xf32>
    %c0_315 = arith.constant 0 : index
    %c0_316 = arith.constant 0 : index
    %611 = vector.load %arg18[%c0_315, %c0_316] : memref<1x128xf32, #tpu.memory_space<vmem>>, vector<1x128xf32>
    %612 = vector.broadcast %611 : vector<1x128xf32> to vector<128x128xf32>
    %613 = arith.addf %610, %612 : vector<128x128xf32>
    %c0_317 = arith.constant 0 : index
    %c0_318 = arith.constant 0 : index
    %614 = vector.load %arg26[%c0_317, %c0_318] : memref<128x128xf32, #tpu.memory_space<vmem>>, vector<128x128xf32>
    tpu.vector_store %arg26[%c0_317, %c0_318], %613 {strides = array<i32>} : memref<128x128xf32, #tpu.memory_space<vmem>>, vector<128x128xf32>,
    %c0_319 = arith.constant 0 : index
    %c0_320 = arith.constant 0 : index
    %615 = vector.load %arg26[%c0_319, %c0_320] : memref<128x128xf32, #tpu.memory_space<vmem>>, vector<8x128xf32>
    %c120_321 = arith.constant 120 : index
    %c0_322 = arith.constant 0 : index
    %616 = vector.load %arg26[%c120_321, %c0_322] : memref<128x128xf32, #tpu.memory_space<vmem>>, vector<8x128xf32>
    %617 = arith.select %32, %615, %616 : vector<8x128xi1>, vector<8x128xf32>
    %c0_323 = arith.constant 0 : index
    %c0_324 = arith.constant 0 : index
    %618 = vector.load %arg26[%c0_323, %c0_324] : memref<128x128xf32, #tpu.memory_space<vmem>>, vector<8x128xf32>
    tpu.vector_store %arg26[%c0_323, %c0_324], %617 {strides = array<i32>} : memref<128x128xf32, #tpu.memory_space<vmem>>, vector<8x128xf32>,
    %619 = arith.select %32, %616, %615 : vector<8x128xi1>, vector<8x128xf32>
    %c120_325 = arith.constant 120 : index
    %c0_326 = arith.constant 0 : index
    %620 = vector.load %arg26[%c120_325, %c0_326] : memref<128x128xf32, #tpu.memory_space<vmem>>, vector<8x128xf32>
    tpu.vector_store %arg26[%c120_325, %c0_326], %619 {strides = array<i32>} : memref<128x128xf32, #tpu.memory_space<vmem>>, vector<8x128xf32>,
    %c8_327 = arith.constant 8 : index
    %c0_328 = arith.constant 0 : index
    %621 = vector.load %arg26[%c8_327, %c0_328] : memref<128x128xf32, #tpu.memory_space<vmem>>, vector<8x128xf32>
    %c112_329 = arith.constant 112 : index
    %c0_330 = arith.constant 0 : index
    %622 = vector.load %arg26[%c112_329, %c0_330] : memref<128x128xf32, #tpu.memory_space<vmem>>, vector<8x128xf32>
    %623 = arith.select %32, %621, %622 : vector<8x128xi1>, vector<8x128xf32>
    %c8_331 = arith.constant 8 : index
    %c0_332 = arith.constant 0 : index
    %624 = vector.load %arg26[%c8_331, %c0_332] : memref<128x128xf32, #tpu.memory_space<vmem>>, vector<8x128xf32>
    tpu.vector_store %arg26[%c8_331, %c0_332], %623 {strides = array<i32>} : memref<128x128xf32, #tpu.memory_space<vmem>>, vector<8x128xf32>,
    %625 = arith.select %32, %622, %621 : vector<8x128xi1>, vector<8x128xf32>
    %c112_333 = arith.constant 112 : index
    %c0_334 = arith.constant 0 : index
    %626 = vector.load %arg26[%c112_333, %c0_334] : memref<128x128xf32, #tpu.memory_space<vmem>>, vector<8x128xf32>
    tpu.vector_store %arg26[%c112_333, %c0_334], %625 {strides = array<i32>} : memref<128x128xf32, #tpu.memory_space<vmem>>, vector<8x128xf32>,
    %c16_335 = arith.constant 16 : index
    %c0_336 = arith.constant 0 : index
    %627 = vector.load %arg26[%c16_335, %c0_336] : memref<128x128xf32, #tpu.memory_space<vmem>>, vector<8x128xf32>
    %c104_337 = arith.constant 104 : index
    %c0_338 = arith.constant 0 : index
    %628 = vector.load %arg26[%c104_337, %c0_338] : memref<128x128xf32, #tpu.memory_space<vmem>>, vector<8x128xf32>
    %629 = arith.select %32, %627, %628 : vector<8x128xi1>, vector<8x128xf32>
    %c16_339 = arith.constant 16 : index
    %c0_340 = arith.constant 0 : index
    %630 = vector.load %arg26[%c16_339, %c0_340] : memref<128x128xf32, #tpu.memory_space<vmem>>, vector<8x128xf32>
    tpu.vector_store %arg26[%c16_339, %c0_340], %629 {strides = array<i32>} : memref<128x128xf32, #tpu.memory_space<vmem>>, vector<8x128xf32>,
    %631 = arith.select %32, %628, %627 : vector<8x128xi1>, vector<8x128xf32>
    %c104_341 = arith.constant 104 : index
    %c0_342 = arith.constant 0 : index
    %632 = vector.load %arg26[%c104_341, %c0_342] : memref<128x128xf32, #tpu.memory_space<vmem>>, vector<8x128xf32>
    tpu.vector_store %arg26[%c104_341, %c0_342], %631 {strides = array<i32>} : memref<128x128xf32, #tpu.memory_space<vmem>>, vector<8x128xf32>,
    %c24_343 = arith.constant 24 : index
    %c0_344 = arith.constant 0 : index
    %633 = vector.load %arg26[%c24_343, %c0_344] : memref<128x128xf32, #tpu.memory_space<vmem>>, vector<8x128xf32>
    %c96_345 = arith.constant 96 : index
    %c0_346 = arith.constant 0 : index
    %634 = vector.load %arg26[%c96_345, %c0_346] : memref<128x128xf32, #tpu.memory_space<vmem>>, vector<8x128xf32>
    %635 = arith.select %32, %633, %634 : vector<8x128xi1>, vector<8x128xf32>
    %c24_347 = arith.constant 24 : index
    %c0_348 = arith.constant 0 : index
    %636 = vector.load %arg26[%c24_347, %c0_348] : memref<128x128xf32, #tpu.memory_space<vmem>>, vector<8x128xf32>
    tpu.vector_store %arg26[%c24_347, %c0_348], %635 {strides = array<i32>} : memref<128x128xf32, #tpu.memory_space<vmem>>, vector<8x128xf32>,
    %637 = arith.select %32, %634, %633 : vector<8x128xi1>, vector<8x128xf32>
    %c96_349 = arith.constant 96 : index
    %c0_350 = arith.constant 0 : index
    %638 = vector.load %arg26[%c96_349, %c0_350] : memref<128x128xf32, #tpu.memory_space<vmem>>, vector<8x128xf32>
    tpu.vector_store %arg26[%c96_349, %c0_350], %637 {strides = array<i32>} : memref<128x128xf32, #tpu.memory_space<vmem>>, vector<8x128xf32>,
    %c32_351 = arith.constant 32 : index
    %c0_352 = arith.constant 0 : index
    %639 = vector.load %arg26[%c32_351, %c0_352] : memref<128x128xf32, #tpu.memory_space<vmem>>, vector<8x128xf32>
    %c88_353 = arith.constant 88 : index
    %c0_354 = arith.constant 0 : index
    %640 = vector.load %arg26[%c88_353, %c0_354] : memref<128x128xf32, #tpu.memory_space<vmem>>, vector<8x128xf32>
    %641 = arith.select %32, %639, %640 : vector<8x128xi1>, vector<8x128xf32>
    %c32_355 = arith.constant 32 : index
    %c0_356 = arith.constant 0 : index
    %642 = vector.load %arg26[%c32_355, %c0_356] : memref<128x128xf32, #tpu.memory_space<vmem>>, vector<8x128xf32>
    tpu.vector_store %arg26[%c32_355, %c0_356], %641 {strides = array<i32>} : memref<128x128xf32, #tpu.memory_space<vmem>>, vector<8x128xf32>,
    %643 = arith.select %32, %640, %639 : vector<8x128xi1>, vector<8x128xf32>
    %c88_357 = arith.constant 88 : index
    %c0_358 = arith.constant 0 : index
    %644 = vector.load %arg26[%c88_357, %c0_358] : memref<128x128xf32, #tpu.memory_space<vmem>>, vector<8x128xf32>
    tpu.vector_store %arg26[%c88_357, %c0_358], %643 {strides = array<i32>} : memref<128x128xf32, #tpu.memory_space<vmem>>, vector<8x128xf32>,
    %c40_359 = arith.constant 40 : index
    %c0_360 = arith.constant 0 : index
    %645 = vector.load %arg26[%c40_359, %c0_360] : memref<128x128xf32, #tpu.memory_space<vmem>>, vector<8x128xf32>
    %c80_361 = arith.constant 80 : index
    %c0_362 = arith.constant 0 : index
    %646 = vector.load %arg26[%c80_361, %c0_362] : memref<128x128xf32, #tpu.memory_space<vmem>>, vector<8x128xf32>
    %647 = arith.select %32, %645, %646 : vector<8x128xi1>, vector<8x128xf32>
    %c40_363 = arith.constant 40 : index
    %c0_364 = arith.constant 0 : index
    %648 = vector.load %arg26[%c40_363, %c0_364] : memref<128x128xf32, #tpu.memory_space<vmem>>, vector<8x128xf32>
    tpu.vector_store %arg26[%c40_363, %c0_364], %647 {strides = array<i32>} : memref<128x128xf32, #tpu.memory_space<vmem>>, vector<8x128xf32>,
    %649 = arith.select %32, %646, %645 : vector<8x128xi1>, vector<8x128xf32>
    %c80_365 = arith.constant 80 : index
    %c0_366 = arith.constant 0 : index
    %650 = vector.load %arg26[%c80_365, %c0_366] : memref<128x128xf32, #tpu.memory_space<vmem>>, vector<8x128xf32>
    tpu.vector_store %arg26[%c80_365, %c0_366], %649 {strides = array<i32>} : memref<128x128xf32, #tpu.memory_space<vmem>>, vector<8x128xf32>,
    %c48_367 = arith.constant 48 : index
    %c0_368 = arith.constant 0 : index
    %651 = vector.load %arg26[%c48_367, %c0_368] : memref<128x128xf32, #tpu.memory_space<vmem>>, vector<8x128xf32>
    %c72_369 = arith.constant 72 : index
    %c0_370 = arith.constant 0 : index
    %652 = vector.load %arg26[%c72_369, %c0_370] : memref<128x128xf32, #tpu.memory_space<vmem>>, vector<8x128xf32>
    %653 = arith.select %32, %651, %652 : vector<8x128xi1>, vector<8x128xf32>
    %c48_371 = arith.constant 48 : index
    %c0_372 = arith.constant 0 : index
    %654 = vector.load %arg26[%c48_371, %c0_372] : memref<128x128xf32, #tpu.memory_space<vmem>>, vector<8x128xf32>
    tpu.vector_store %arg26[%c48_371, %c0_372], %653 {strides = array<i32>} : memref<128x128xf32, #tpu.memory_space<vmem>>, vector<8x128xf32>,
    %655 = arith.select %32, %652, %651 : vector<8x128xi1>, vector<8x128xf32>
    %c72_373 = arith.constant 72 : index
    %c0_374 = arith.constant 0 : index
    %656 = vector.load %arg26[%c72_373, %c0_374] : memref<128x128xf32, #tpu.memory_space<vmem>>, vector<8x128xf32>
    tpu.vector_store %arg26[%c72_373, %c0_374], %655 {strides = array<i32>} : memref<128x128xf32, #tpu.memory_space<vmem>>, vector<8x128xf32>,
    %c56_375 = arith.constant 56 : index
    %c0_376 = arith.constant 0 : index
    %657 = vector.load %arg26[%c56_375, %c0_376] : memref<128x128xf32, #tpu.memory_space<vmem>>, vector<8x128xf32>
    %c64_377 = arith.constant 64 : index
    %c0_378 = arith.constant 0 : index
    %658 = vector.load %arg26[%c64_377, %c0_378] : memref<128x128xf32, #tpu.memory_space<vmem>>, vector<8x128xf32>
    %659 = arith.select %32, %657, %658 : vector<8x128xi1>, vector<8x128xf32>
    %c56_379 = arith.constant 56 : index
    %c0_380 = arith.constant 0 : index
    %660 = vector.load %arg26[%c56_379, %c0_380] : memref<128x128xf32, #tpu.memory_space<vmem>>, vector<8x128xf32>
    tpu.vector_store %arg26[%c56_379, %c0_380], %659 {strides = array<i32>} : memref<128x128xf32, #tpu.memory_space<vmem>>, vector<8x128xf32>,
    %661 = arith.select %32, %658, %657 : vector<8x128xi1>, vector<8x128xf32>
    %c64_381 = arith.constant 64 : index
    %c0_382 = arith.constant 0 : index
    %662 = vector.load %arg26[%c64_381, %c0_382] : memref<128x128xf32, #tpu.memory_space<vmem>>, vector<8x128xf32>
    tpu.vector_store %arg26[%c64_381, %c0_382], %661 {strides = array<i32>} : memref<128x128xf32, #tpu.memory_space<vmem>>, vector<8x128xf32>,
    %c0_383 = arith.constant 0 : index
    %c0_384 = arith.constant 0 : index
    %663 = vector.load %arg17[%c0_383, %c0_384] : memref<32x128xf32, #tpu.memory_space<vmem>>, vector<32x128xf32>
    %cst_385 = arith.constant 0.000000e+00 : f32
    %664 = vector.broadcast %cst_385 : f32 to vector<8x32xf32>
    %cst_386 = arith.constant 0.000000e+00 : f32
    %665 = vector.broadcast %cst_386 : f32 to vector<8x32xf32>
    %c0_387 = arith.constant 0 : index
    %c0_388 = arith.constant 0 : index
    %666 = vector.load %arg26[%c0_387, %c0_388] : memref<128x128xf32, #tpu.memory_space<vmem>>, vector<8x128xf32>
    %cst_389 = arith.constant dense<0.000000e+00> : vector<8x128xf32>
    %667 = tpu.matmul %664, %663, %cst_389 {dimension_numbers = #tpu.dot_dimension_numbers<[1], [0], [0], [1], [0, 0, 1, 1], [], []>} : vector<8x32xf32>, vector<32x128xf32>, vector<8x128xf32> -> vector<8x128xf32>
    %668 = arith.addf %666, %667 : vector<8x128xf32>
    %669 = arith.negf %668 : vector<8x128xf32>
    %670 = math.exp %669 : vector<8x128xf32>
    %cst_390 = arith.constant 1.000000e+00 : f32
    %671 = vector.broadcast %cst_390 : f32 to vector<8x128xf32>
    %672 = arith.addf %671, %670 : vector<8x128xf32>
    %673 = arith.divf %671, %672 : vector<8x128xf32>
    %cst_391 = arith.constant 2.000000e+00 : f32
    %674 = vector.broadcast %cst_391 : f32 to vector<8x128xf32>
    %675 = arith.mulf %674, %673 : vector<8x128xf32>
    %cst_392 = arith.constant 1.000000e+00 : f32
    %676 = vector.broadcast %cst_392 : f32 to vector<8x128xf32>
    %677 = arith.subf %675, %676 : vector<8x128xf32>
    %678 = arith.select %14, %677, %673 : vector<8x128xi1>, vector<8x128xf32>
    %679 = vector.extract_strided_slice %678 {offsets = [0, 0], sizes = [8, 32], strides = [1, 1]} : vector<8x128xf32> to vector<8x32xf32>
    %680 = vector.extract_strided_slice %678 {offsets = [0, 32], sizes = [8, 32], strides = [1, 1]} : vector<8x128xf32> to vector<8x32xf32>
    %681 = vector.extract_strided_slice %678 {offsets = [0, 64], sizes = [8, 32], strides = [1, 1]} : vector<8x128xf32> to vector<8x32xf32>
    %682 = vector.extract_strided_slice %678 {offsets = [0, 96], sizes = [8, 32], strides = [1, 1]} : vector<8x128xf32> to vector<8x32xf32>
    %683 = arith.mulf %680, %665 : vector<8x32xf32>
    %684 = arith.mulf %679, %681 : vector<8x32xf32>
    %685 = arith.addf %683, %684 : vector<8x32xf32>
    %686 = math.tanh %685 : vector<8x32xf32>
    %687 = arith.mulf %682, %686 : vector<8x32xf32>
    %688 = vector.extract_strided_slice %687 {offsets = [0, 16], sizes = [8, 16], strides = [1, 1]} : vector<8x32xf32> to vector<8x16xf32>
    %c8_393 = arith.constant 8 : index
    %c0_394 = arith.constant 0 : index
    %689 = vector.load %arg26[%c8_393, %c0_394] : memref<128x128xf32, #tpu.memory_space<vmem>>, vector<8x128xf32>
    %cst_395 = arith.constant dense<0.000000e+00> : vector<8x128xf32>
    %690 = tpu.matmul %687, %663, %cst_395 {dimension_numbers = #tpu.dot_dimension_numbers<[1], [0], [0], [1], [0, 0, 1, 1], [], []>} : vector<8x32xf32>, vector<32x128xf32>, vector<8x128xf32> -> vector<8x128xf32>
    %691 = arith.addf %689, %690 : vector<8x128xf32>
    %692 = arith.negf %691 : vector<8x128xf32>
    %693 = math.exp %692 : vector<8x128xf32>
    %cst_396 = arith.constant 1.000000e+00 : f32
    %694 = vector.broadcast %cst_396 : f32 to vector<8x128xf32>
    %695 = arith.addf %694, %693 : vector<8x128xf32>
    %696 = arith.divf %694, %695 : vector<8x128xf32>
    %cst_397 = arith.constant 2.000000e+00 : f32
    %697 = vector.broadcast %cst_397 : f32 to vector<8x128xf32>
    %698 = arith.mulf %697, %696 : vector<8x128xf32>
    %cst_398 = arith.constant 1.000000e+00 : f32
    %699 = vector.broadcast %cst_398 : f32 to vector<8x128xf32>
    %700 = arith.subf %698, %699 : vector<8x128xf32>
    %701 = arith.select %14, %700, %696 : vector<8x128xi1>, vector<8x128xf32>
    %702 = vector.extract_strided_slice %701 {offsets = [0, 0], sizes = [8, 32], strides = [1, 1]} : vector<8x128xf32> to vector<8x32xf32>
    %703 = vector.extract_strided_slice %701 {offsets = [0, 32], sizes = [8, 32], strides = [1, 1]} : vector<8x128xf32> to vector<8x32xf32>
    %704 = vector.extract_strided_slice %701 {offsets = [0, 64], sizes = [8, 32], strides = [1, 1]} : vector<8x128xf32> to vector<8x32xf32>
    %705 = vector.extract_strided_slice %701 {offsets = [0, 96], sizes = [8, 32], strides = [1, 1]} : vector<8x128xf32> to vector<8x32xf32>
    %706 = arith.mulf %703, %685 : vector<8x32xf32>
    %707 = arith.mulf %702, %704 : vector<8x32xf32>
    %708 = arith.addf %706, %707 : vector<8x32xf32>
    %709 = math.tanh %708 : vector<8x32xf32>
    %710 = arith.mulf %705, %709 : vector<8x32xf32>
    %c16_399 = arith.constant 16 : index
    %c0_400 = arith.constant 0 : index
    %711 = vector.load %arg26[%c16_399, %c0_400] : memref<128x128xf32, #tpu.memory_space<vmem>>, vector<8x128xf32>
    %cst_401 = arith.constant dense<0.000000e+00> : vector<8x128xf32>
    %712 = tpu.matmul %710, %663, %cst_401 {dimension_numbers = #tpu.dot_dimension_numbers<[1], [0], [0], [1], [0, 0, 1, 1], [], []>} : vector<8x32xf32>, vector<32x128xf32>, vector<8x128xf32> -> vector<8x128xf32>
    %713 = arith.addf %711, %712 : vector<8x128xf32>
    %714 = arith.negf %713 : vector<8x128xf32>
    %715 = math.exp %714 : vector<8x128xf32>
    %cst_402 = arith.constant 1.000000e+00 : f32
    %716 = vector.broadcast %cst_402 : f32 to vector<8x128xf32>
    %717 = arith.addf %716, %715 : vector<8x128xf32>
    %718 = arith.divf %716, %717 : vector<8x128xf32>
    %cst_403 = arith.constant 2.000000e+00 : f32
    %719 = vector.broadcast %cst_403 : f32 to vector<8x128xf32>
    %720 = arith.mulf %719, %718 : vector<8x128xf32>
    %cst_404 = arith.constant 1.000000e+00 : f32
    %721 = vector.broadcast %cst_404 : f32 to vector<8x128xf32>
    %722 = arith.subf %720, %721 : vector<8x128xf32>
    %723 = arith.select %14, %722, %718 : vector<8x128xi1>, vector<8x128xf32>
    %724 = vector.extract_strided_slice %723 {offsets = [0, 0], sizes = [8, 32], strides = [1, 1]} : vector<8x128xf32> to vector<8x32xf32>
    %725 = vector.extract_strided_slice %723 {offsets = [0, 32], sizes = [8, 32], strides = [1, 1]} : vector<8x128xf32> to vector<8x32xf32>
    %726 = vector.extract_strided_slice %723 {offsets = [0, 64], sizes = [8, 32], strides = [1, 1]} : vector<8x128xf32> to vector<8x32xf32>
    %727 = vector.extract_strided_slice %723 {offsets = [0, 96], sizes = [8, 32], strides = [1, 1]} : vector<8x128xf32> to vector<8x32xf32>
    %728 = arith.mulf %725, %708 : vector<8x32xf32>
    %729 = arith.mulf %724, %726 : vector<8x32xf32>
    %730 = arith.addf %728, %729 : vector<8x32xf32>
    %731 = math.tanh %730 : vector<8x32xf32>
    %732 = arith.mulf %727, %731 : vector<8x32xf32>
    %c24_405 = arith.constant 24 : index
    %c0_406 = arith.constant 0 : index
    %733 = vector.load %arg26[%c24_405, %c0_406] : memref<128x128xf32, #tpu.memory_space<vmem>>, vector<8x128xf32>
    %cst_407 = arith.constant dense<0.000000e+00> : vector<8x128xf32>
    %734 = tpu.matmul %732, %663, %cst_407 {dimension_numbers = #tpu.dot_dimension_numbers<[1], [0], [0], [1], [0, 0, 1, 1], [], []>} : vector<8x32xf32>, vector<32x128xf32>, vector<8x128xf32> -> vector<8x128xf32>
    %735 = arith.addf %733, %734 : vector<8x128xf32>
    %736 = arith.negf %735 : vector<8x128xf32>
    %737 = math.exp %736 : vector<8x128xf32>
    %cst_408 = arith.constant 1.000000e+00 : f32
    %738 = vector.broadcast %cst_408 : f32 to vector<8x128xf32>
    %739 = arith.addf %738, %737 : vector<8x128xf32>
    %740 = arith.divf %738, %739 : vector<8x128xf32>
    %cst_409 = arith.constant 2.000000e+00 : f32
    %741 = vector.broadcast %cst_409 : f32 to vector<8x128xf32>
    %742 = arith.mulf %741, %740 : vector<8x128xf32>
    %cst_410 = arith.constant 1.000000e+00 : f32
    %743 = vector.broadcast %cst_410 : f32 to vector<8x128xf32>
    %744 = arith.subf %742, %743 : vector<8x128xf32>
    %745 = arith.select %14, %744, %740 : vector<8x128xi1>, vector<8x128xf32>
    %746 = vector.extract_strided_slice %745 {offsets = [0, 0], sizes = [8, 32], strides = [1, 1]} : vector<8x128xf32> to vector<8x32xf32>
    %747 = vector.extract_strided_slice %745 {offsets = [0, 32], sizes = [8, 32], strides = [1, 1]} : vector<8x128xf32> to vector<8x32xf32>
    %748 = vector.extract_strided_slice %745 {offsets = [0, 64], sizes = [8, 32], strides = [1, 1]} : vector<8x128xf32> to vector<8x32xf32>
    %749 = vector.extract_strided_slice %745 {offsets = [0, 96], sizes = [8, 32], strides = [1, 1]} : vector<8x128xf32> to vector<8x32xf32>
    %750 = arith.mulf %747, %730 : vector<8x32xf32>
    %751 = arith.mulf %746, %748 : vector<8x32xf32>
    %752 = arith.addf %750, %751 : vector<8x32xf32>
    %753 = math.tanh %752 : vector<8x32xf32>
    %754 = arith.mulf %749, %753 : vector<8x32xf32>
    %c32_411 = arith.constant 32 : index
    %c0_412 = arith.constant 0 : index
    %755 = vector.load %arg26[%c32_411, %c0_412] : memref<128x128xf32, #tpu.memory_space<vmem>>, vector<8x128xf32>
    %cst_413 = arith.constant dense<0.000000e+00> : vector<8x128xf32>
    %756 = tpu.matmul %754, %663, %cst_413 {dimension_numbers = #tpu.dot_dimension_numbers<[1], [0], [0], [1], [0, 0, 1, 1], [], []>} : vector<8x32xf32>, vector<32x128xf32>, vector<8x128xf32> -> vector<8x128xf32>
    %757 = arith.addf %755, %756 : vector<8x128xf32>
    %758 = arith.negf %757 : vector<8x128xf32>
    %759 = math.exp %758 : vector<8x128xf32>
    %cst_414 = arith.constant 1.000000e+00 : f32
    %760 = vector.broadcast %cst_414 : f32 to vector<8x128xf32>
    %761 = arith.addf %760, %759 : vector<8x128xf32>
    %762 = arith.divf %760, %761 : vector<8x128xf32>
    %cst_415 = arith.constant 2.000000e+00 : f32
    %763 = vector.broadcast %cst_415 : f32 to vector<8x128xf32>
    %764 = arith.mulf %763, %762 : vector<8x128xf32>
    %cst_416 = arith.constant 1.000000e+00 : f32
    %765 = vector.broadcast %cst_416 : f32 to vector<8x128xf32>
    %766 = arith.subf %764, %765 : vector<8x128xf32>
    %767 = arith.select %14, %766, %762 : vector<8x128xi1>, vector<8x128xf32>
    %768 = vector.extract_strided_slice %767 {offsets = [0, 0], sizes = [8, 32], strides = [1, 1]} : vector<8x128xf32> to vector<8x32xf32>
    %769 = vector.extract_strided_slice %767 {offsets = [0, 32], sizes = [8, 32], strides = [1, 1]} : vector<8x128xf32> to vector<8x32xf32>
    %770 = vector.extract_strided_slice %767 {offsets = [0, 64], sizes = [8, 32], strides = [1, 1]} : vector<8x128xf32> to vector<8x32xf32>
    %771 = vector.extract_strided_slice %767 {offsets = [0, 96], sizes = [8, 32], strides = [1, 1]} : vector<8x128xf32> to vector<8x32xf32>
    %772 = arith.mulf %769, %752 : vector<8x32xf32>
    %773 = arith.mulf %768, %770 : vector<8x32xf32>
    %774 = arith.addf %772, %773 : vector<8x32xf32>
    %775 = math.tanh %774 : vector<8x32xf32>
    %776 = arith.mulf %771, %775 : vector<8x32xf32>
    %c40_417 = arith.constant 40 : index
    %c0_418 = arith.constant 0 : index
    %777 = vector.load %arg26[%c40_417, %c0_418] : memref<128x128xf32, #tpu.memory_space<vmem>>, vector<8x128xf32>
    %cst_419 = arith.constant dense<0.000000e+00> : vector<8x128xf32>
    %778 = tpu.matmul %776, %663, %cst_419 {dimension_numbers = #tpu.dot_dimension_numbers<[1], [0], [0], [1], [0, 0, 1, 1], [], []>} : vector<8x32xf32>, vector<32x128xf32>, vector<8x128xf32> -> vector<8x128xf32>
    %779 = arith.addf %777, %778 : vector<8x128xf32>
    %780 = arith.negf %779 : vector<8x128xf32>
    %781 = math.exp %780 : vector<8x128xf32>
    %cst_420 = arith.constant 1.000000e+00 : f32
    %782 = vector.broadcast %cst_420 : f32 to vector<8x128xf32>
    %783 = arith.addf %782, %781 : vector<8x128xf32>
    %784 = arith.divf %782, %783 : vector<8x128xf32>
    %cst_421 = arith.constant 2.000000e+00 : f32
    %785 = vector.broadcast %cst_421 : f32 to vector<8x128xf32>
    %786 = arith.mulf %785, %784 : vector<8x128xf32>
    %cst_422 = arith.constant 1.000000e+00 : f32
    %787 = vector.broadcast %cst_422 : f32 to vector<8x128xf32>
    %788 = arith.subf %786, %787 : vector<8x128xf32>
    %789 = arith.select %14, %788, %784 : vector<8x128xi1>, vector<8x128xf32>
    %790 = vector.extract_strided_slice %789 {offsets = [0, 0], sizes = [8, 32], strides = [1, 1]} : vector<8x128xf32> to vector<8x32xf32>
    %791 = vector.extract_strided_slice %789 {offsets = [0, 32], sizes = [8, 32], strides = [1, 1]} : vector<8x128xf32> to vector<8x32xf32>
    %792 = vector.extract_strided_slice %789 {offsets = [0, 64], sizes = [8, 32], strides = [1, 1]} : vector<8x128xf32> to vector<8x32xf32>
    %793 = vector.extract_strided_slice %789 {offsets = [0, 96], sizes = [8, 32], strides = [1, 1]} : vector<8x128xf32> to vector<8x32xf32>
    %794 = arith.mulf %791, %774 : vector<8x32xf32>
    %795 = arith.mulf %790, %792 : vector<8x32xf32>
    %796 = arith.addf %794, %795 : vector<8x32xf32>
    %797 = math.tanh %796 : vector<8x32xf32>
    %798 = arith.mulf %793, %797 : vector<8x32xf32>
    %c48_423 = arith.constant 48 : index
    %c0_424 = arith.constant 0 : index
    %799 = vector.load %arg26[%c48_423, %c0_424] : memref<128x128xf32, #tpu.memory_space<vmem>>, vector<8x128xf32>
    %cst_425 = arith.constant dense<0.000000e+00> : vector<8x128xf32>
    %800 = tpu.matmul %798, %663, %cst_425 {dimension_numbers = #tpu.dot_dimension_numbers<[1], [0], [0], [1], [0, 0, 1, 1], [], []>} : vector<8x32xf32>, vector<32x128xf32>, vector<8x128xf32> -> vector<8x128xf32>
    %801 = arith.addf %799, %800 : vector<8x128xf32>
    %802 = arith.negf %801 : vector<8x128xf32>
    %803 = math.exp %802 : vector<8x128xf32>
    %cst_426 = arith.constant 1.000000e+00 : f32
    %804 = vector.broadcast %cst_426 : f32 to vector<8x128xf32>
    %805 = arith.addf %804, %803 : vector<8x128xf32>
    %806 = arith.divf %804, %805 : vector<8x128xf32>
    %cst_427 = arith.constant 2.000000e+00 : f32
    %807 = vector.broadcast %cst_427 : f32 to vector<8x128xf32>
    %808 = arith.mulf %807, %806 : vector<8x128xf32>
    %cst_428 = arith.constant 1.000000e+00 : f32
    %809 = vector.broadcast %cst_428 : f32 to vector<8x128xf32>
    %810 = arith.subf %808, %809 : vector<8x128xf32>
    %811 = arith.select %14, %810, %806 : vector<8x128xi1>, vector<8x128xf32>
    %812 = vector.extract_strided_slice %811 {offsets = [0, 0], sizes = [8, 32], strides = [1, 1]} : vector<8x128xf32> to vector<8x32xf32>
    %813 = vector.extract_strided_slice %811 {offsets = [0, 32], sizes = [8, 32], strides = [1, 1]} : vector<8x128xf32> to vector<8x32xf32>
    %814 = vector.extract_strided_slice %811 {offsets = [0, 64], sizes = [8, 32], strides = [1, 1]} : vector<8x128xf32> to vector<8x32xf32>
    %815 = vector.extract_strided_slice %811 {offsets = [0, 96], sizes = [8, 32], strides = [1, 1]} : vector<8x128xf32> to vector<8x32xf32>
    %816 = arith.mulf %813, %796 : vector<8x32xf32>
    %817 = arith.mulf %812, %814 : vector<8x32xf32>
    %818 = arith.addf %816, %817 : vector<8x32xf32>
    %819 = math.tanh %818 : vector<8x32xf32>
    %820 = arith.mulf %815, %819 : vector<8x32xf32>
    %c56_429 = arith.constant 56 : index
    %c0_430 = arith.constant 0 : index
    %821 = vector.load %arg26[%c56_429, %c0_430] : memref<128x128xf32, #tpu.memory_space<vmem>>, vector<8x128xf32>
    %cst_431 = arith.constant dense<0.000000e+00> : vector<8x128xf32>
    %822 = tpu.matmul %820, %663, %cst_431 {dimension_numbers = #tpu.dot_dimension_numbers<[1], [0], [0], [1], [0, 0, 1, 1], [], []>} : vector<8x32xf32>, vector<32x128xf32>, vector<8x128xf32> -> vector<8x128xf32>
    %823 = arith.addf %821, %822 : vector<8x128xf32>
    %824 = arith.negf %823 : vector<8x128xf32>
    %825 = math.exp %824 : vector<8x128xf32>
    %cst_432 = arith.constant 1.000000e+00 : f32
    %826 = vector.broadcast %cst_432 : f32 to vector<8x128xf32>
    %827 = arith.addf %826, %825 : vector<8x128xf32>
    %828 = arith.divf %826, %827 : vector<8x128xf32>
    %cst_433 = arith.constant 2.000000e+00 : f32
    %829 = vector.broadcast %cst_433 : f32 to vector<8x128xf32>
    %830 = arith.mulf %829, %828 : vector<8x128xf32>
    %cst_434 = arith.constant 1.000000e+00 : f32
    %831 = vector.broadcast %cst_434 : f32 to vector<8x128xf32>
    %832 = arith.subf %830, %831 : vector<8x128xf32>
    %833 = arith.select %14, %832, %828 : vector<8x128xi1>, vector<8x128xf32>
    %834 = vector.extract_strided_slice %833 {offsets = [0, 0], sizes = [8, 32], strides = [1, 1]} : vector<8x128xf32> to vector<8x32xf32>
    %835 = vector.extract_strided_slice %833 {offsets = [0, 32], sizes = [8, 32], strides = [1, 1]} : vector<8x128xf32> to vector<8x32xf32>
    %836 = vector.extract_strided_slice %833 {offsets = [0, 64], sizes = [8, 32], strides = [1, 1]} : vector<8x128xf32> to vector<8x32xf32>
    %837 = vector.extract_strided_slice %833 {offsets = [0, 96], sizes = [8, 32], strides = [1, 1]} : vector<8x128xf32> to vector<8x32xf32>
    %838 = arith.mulf %835, %818 : vector<8x32xf32>
    %839 = arith.mulf %834, %836 : vector<8x32xf32>
    %840 = arith.addf %838, %839 : vector<8x32xf32>
    %841 = math.tanh %840 : vector<8x32xf32>
    %842 = arith.mulf %837, %841 : vector<8x32xf32>
    %c64_435 = arith.constant 64 : index
    %c0_436 = arith.constant 0 : index
    %843 = vector.load %arg26[%c64_435, %c0_436] : memref<128x128xf32, #tpu.memory_space<vmem>>, vector<8x128xf32>
    %cst_437 = arith.constant dense<0.000000e+00> : vector<8x128xf32>
    %844 = tpu.matmul %842, %663, %cst_437 {dimension_numbers = #tpu.dot_dimension_numbers<[1], [0], [0], [1], [0, 0, 1, 1], [], []>} : vector<8x32xf32>, vector<32x128xf32>, vector<8x128xf32> -> vector<8x128xf32>
    %845 = arith.addf %843, %844 : vector<8x128xf32>
    %846 = arith.negf %845 : vector<8x128xf32>
    %847 = math.exp %846 : vector<8x128xf32>
    %cst_438 = arith.constant 1.000000e+00 : f32
    %848 = vector.broadcast %cst_438 : f32 to vector<8x128xf32>
    %849 = arith.addf %848, %847 : vector<8x128xf32>
    %850 = arith.divf %848, %849 : vector<8x128xf32>
    %cst_439 = arith.constant 2.000000e+00 : f32
    %851 = vector.broadcast %cst_439 : f32 to vector<8x128xf32>
    %852 = arith.mulf %851, %850 : vector<8x128xf32>
    %cst_440 = arith.constant 1.000000e+00 : f32
    %853 = vector.broadcast %cst_440 : f32 to vector<8x128xf32>
    %854 = arith.subf %852, %853 : vector<8x128xf32>
    %855 = arith.select %14, %854, %850 : vector<8x128xi1>, vector<8x128xf32>
    %856 = vector.extract_strided_slice %855 {offsets = [0, 0], sizes = [8, 32], strides = [1, 1]} : vector<8x128xf32> to vector<8x32xf32>
    %857 = vector.extract_strided_slice %855 {offsets = [0, 32], sizes = [8, 32], strides = [1, 1]} : vector<8x128xf32> to vector<8x32xf32>
    %858 = vector.extract_strided_slice %855 {offsets = [0, 64], sizes = [8, 32], strides = [1, 1]} : vector<8x128xf32> to vector<8x32xf32>
    %859 = vector.extract_strided_slice %855 {offsets = [0, 96], sizes = [8, 32], strides = [1, 1]} : vector<8x128xf32> to vector<8x32xf32>
    %860 = arith.mulf %857, %840 : vector<8x32xf32>
    %861 = arith.mulf %856, %858 : vector<8x32xf32>
    %862 = arith.addf %860, %861 : vector<8x32xf32>
    %863 = math.tanh %862 : vector<8x32xf32>
    %864 = arith.mulf %859, %863 : vector<8x32xf32>
    %c72_441 = arith.constant 72 : index
    %c0_442 = arith.constant 0 : index
    %865 = vector.load %arg26[%c72_441, %c0_442] : memref<128x128xf32, #tpu.memory_space<vmem>>, vector<8x128xf32>
    %cst_443 = arith.constant dense<0.000000e+00> : vector<8x128xf32>
    %866 = tpu.matmul %864, %663, %cst_443 {dimension_numbers = #tpu.dot_dimension_numbers<[1], [0], [0], [1], [0, 0, 1, 1], [], []>} : vector<8x32xf32>, vector<32x128xf32>, vector<8x128xf32> -> vector<8x128xf32>
    %867 = arith.addf %865, %866 : vector<8x128xf32>
    %868 = arith.negf %867 : vector<8x128xf32>
    %869 = math.exp %868 : vector<8x128xf32>
    %cst_444 = arith.constant 1.000000e+00 : f32
    %870 = vector.broadcast %cst_444 : f32 to vector<8x128xf32>
    %871 = arith.addf %870, %869 : vector<8x128xf32>
    %872 = arith.divf %870, %871 : vector<8x128xf32>
    %cst_445 = arith.constant 2.000000e+00 : f32
    %873 = vector.broadcast %cst_445 : f32 to vector<8x128xf32>
    %874 = arith.mulf %873, %872 : vector<8x128xf32>
    %cst_446 = arith.constant 1.000000e+00 : f32
    %875 = vector.broadcast %cst_446 : f32 to vector<8x128xf32>
    %876 = arith.subf %874, %875 : vector<8x128xf32>
    %877 = arith.select %14, %876, %872 : vector<8x128xi1>, vector<8x128xf32>
    %878 = vector.extract_strided_slice %877 {offsets = [0, 0], sizes = [8, 32], strides = [1, 1]} : vector<8x128xf32> to vector<8x32xf32>
    %879 = vector.extract_strided_slice %877 {offsets = [0, 32], sizes = [8, 32], strides = [1, 1]} : vector<8x128xf32> to vector<8x32xf32>
    %880 = vector.extract_strided_slice %877 {offsets = [0, 64], sizes = [8, 32], strides = [1, 1]} : vector<8x128xf32> to vector<8x32xf32>
    %881 = vector.extract_strided_slice %877 {offsets = [0, 96], sizes = [8, 32], strides = [1, 1]} : vector<8x128xf32> to vector<8x32xf32>
    %882 = arith.mulf %879, %862 : vector<8x32xf32>
    %883 = arith.mulf %878, %880 : vector<8x32xf32>
    %884 = arith.addf %882, %883 : vector<8x32xf32>
    %885 = math.tanh %884 : vector<8x32xf32>
    %886 = arith.mulf %881, %885 : vector<8x32xf32>
    %c80_447 = arith.constant 80 : index
    %c0_448 = arith.constant 0 : index
    %887 = vector.load %arg26[%c80_447, %c0_448] : memref<128x128xf32, #tpu.memory_space<vmem>>, vector<8x128xf32>
    %cst_449 = arith.constant dense<0.000000e+00> : vector<8x128xf32>
    %888 = tpu.matmul %886, %663, %cst_449 {dimension_numbers = #tpu.dot_dimension_numbers<[1], [0], [0], [1], [0, 0, 1, 1], [], []>} : vector<8x32xf32>, vector<32x128xf32>, vector<8x128xf32> -> vector<8x128xf32>
    %889 = arith.addf %887, %888 : vector<8x128xf32>
    %890 = arith.negf %889 : vector<8x128xf32>
    %891 = math.exp %890 : vector<8x128xf32>
    %cst_450 = arith.constant 1.000000e+00 : f32
    %892 = vector.broadcast %cst_450 : f32 to vector<8x128xf32>
    %893 = arith.addf %892, %891 : vector<8x128xf32>
    %894 = arith.divf %892, %893 : vector<8x128xf32>
    %cst_451 = arith.constant 2.000000e+00 : f32
    %895 = vector.broadcast %cst_451 : f32 to vector<8x128xf32>
    %896 = arith.mulf %895, %894 : vector<8x128xf32>
    %cst_452 = arith.constant 1.000000e+00 : f32
    %897 = vector.broadcast %cst_452 : f32 to vector<8x128xf32>
    %898 = arith.subf %896, %897 : vector<8x128xf32>
    %899 = arith.select %14, %898, %894 : vector<8x128xi1>, vector<8x128xf32>
    %900 = vector.extract_strided_slice %899 {offsets = [0, 0], sizes = [8, 32], strides = [1, 1]} : vector<8x128xf32> to vector<8x32xf32>
    %901 = vector.extract_strided_slice %899 {offsets = [0, 32], sizes = [8, 32], strides = [1, 1]} : vector<8x128xf32> to vector<8x32xf32>
    %902 = vector.extract_strided_slice %899 {offsets = [0, 64], sizes = [8, 32], strides = [1, 1]} : vector<8x128xf32> to vector<8x32xf32>
    %903 = vector.extract_strided_slice %899 {offsets = [0, 96], sizes = [8, 32], strides = [1, 1]} : vector<8x128xf32> to vector<8x32xf32>
    %904 = arith.mulf %901, %884 : vector<8x32xf32>
    %905 = arith.mulf %900, %902 : vector<8x32xf32>
    %906 = arith.addf %904, %905 : vector<8x32xf32>
    %907 = math.tanh %906 : vector<8x32xf32>
    %908 = arith.mulf %903, %907 : vector<8x32xf32>
    %c88_453 = arith.constant 88 : index
    %c0_454 = arith.constant 0 : index
    %909 = vector.load %arg26[%c88_453, %c0_454] : memref<128x128xf32, #tpu.memory_space<vmem>>, vector<8x128xf32>
    %cst_455 = arith.constant dense<0.000000e+00> : vector<8x128xf32>
    %910 = tpu.matmul %908, %663, %cst_455 {dimension_numbers = #tpu.dot_dimension_numbers<[1], [0], [0], [1], [0, 0, 1, 1], [], []>} : vector<8x32xf32>, vector<32x128xf32>, vector<8x128xf32> -> vector<8x128xf32>
    %911 = arith.addf %909, %910 : vector<8x128xf32>
    %912 = arith.negf %911 : vector<8x128xf32>
    %913 = math.exp %912 : vector<8x128xf32>
    %cst_456 = arith.constant 1.000000e+00 : f32
    %914 = vector.broadcast %cst_456 : f32 to vector<8x128xf32>
    %915 = arith.addf %914, %913 : vector<8x128xf32>
    %916 = arith.divf %914, %915 : vector<8x128xf32>
    %cst_457 = arith.constant 2.000000e+00 : f32
    %917 = vector.broadcast %cst_457 : f32 to vector<8x128xf32>
    %918 = arith.mulf %917, %916 : vector<8x128xf32>
    %cst_458 = arith.constant 1.000000e+00 : f32
    %919 = vector.broadcast %cst_458 : f32 to vector<8x128xf32>
    %920 = arith.subf %918, %919 : vector<8x128xf32>
    %921 = arith.select %14, %920, %916 : vector<8x128xi1>, vector<8x128xf32>
    %922 = vector.extract_strided_slice %921 {offsets = [0, 0], sizes = [8, 32], strides = [1, 1]} : vector<8x128xf32> to vector<8x32xf32>
    %923 = vector.extract_strided_slice %921 {offsets = [0, 32], sizes = [8, 32], strides = [1, 1]} : vector<8x128xf32> to vector<8x32xf32>
    %924 = vector.extract_strided_slice %921 {offsets = [0, 64], sizes = [8, 32], strides = [1, 1]} : vector<8x128xf32> to vector<8x32xf32>
    %925 = vector.extract_strided_slice %921 {offsets = [0, 96], sizes = [8, 32], strides = [1, 1]} : vector<8x128xf32> to vector<8x32xf32>
    %926 = arith.mulf %923, %906 : vector<8x32xf32>
    %927 = arith.mulf %922, %924 : vector<8x32xf32>
    %928 = arith.addf %926, %927 : vector<8x32xf32>
    %929 = math.tanh %928 : vector<8x32xf32>
    %930 = arith.mulf %925, %929 : vector<8x32xf32>
    %c96_459 = arith.constant 96 : index
    %c0_460 = arith.constant 0 : index
    %931 = vector.load %arg26[%c96_459, %c0_460] : memref<128x128xf32, #tpu.memory_space<vmem>>, vector<8x128xf32>
    %cst_461 = arith.constant dense<0.000000e+00> : vector<8x128xf32>
    %932 = tpu.matmul %930, %663, %cst_461 {dimension_numbers = #tpu.dot_dimension_numbers<[1], [0], [0], [1], [0, 0, 1, 1], [], []>} : vector<8x32xf32>, vector<32x128xf32>, vector<8x128xf32> -> vector<8x128xf32>
    %933 = arith.addf %931, %932 : vector<8x128xf32>
    %934 = arith.negf %933 : vector<8x128xf32>
    %935 = math.exp %934 : vector<8x128xf32>
    %cst_462 = arith.constant 1.000000e+00 : f32
    %936 = vector.broadcast %cst_462 : f32 to vector<8x128xf32>
    %937 = arith.addf %936, %935 : vector<8x128xf32>
    %938 = arith.divf %936, %937 : vector<8x128xf32>
    %cst_463 = arith.constant 2.000000e+00 : f32
    %939 = vector.broadcast %cst_463 : f32 to vector<8x128xf32>
    %940 = arith.mulf %939, %938 : vector<8x128xf32>
    %cst_464 = arith.constant 1.000000e+00 : f32
    %941 = vector.broadcast %cst_464 : f32 to vector<8x128xf32>
    %942 = arith.subf %940, %941 : vector<8x128xf32>
    %943 = arith.select %14, %942, %938 : vector<8x128xi1>, vector<8x128xf32>
    %944 = vector.extract_strided_slice %943 {offsets = [0, 0], sizes = [8, 32], strides = [1, 1]} : vector<8x128xf32> to vector<8x32xf32>
    %945 = vector.extract_strided_slice %943 {offsets = [0, 32], sizes = [8, 32], strides = [1, 1]} : vector<8x128xf32> to vector<8x32xf32>
    %946 = vector.extract_strided_slice %943 {offsets = [0, 64], sizes = [8, 32], strides = [1, 1]} : vector<8x128xf32> to vector<8x32xf32>
    %947 = vector.extract_strided_slice %943 {offsets = [0, 96], sizes = [8, 32], strides = [1, 1]} : vector<8x128xf32> to vector<8x32xf32>
    %948 = arith.mulf %945, %928 : vector<8x32xf32>
    %949 = arith.mulf %944, %946 : vector<8x32xf32>
    %950 = arith.addf %948, %949 : vector<8x32xf32>
    %951 = math.tanh %950 : vector<8x32xf32>
    %952 = arith.mulf %947, %951 : vector<8x32xf32>
    %c104_465 = arith.constant 104 : index
    %c0_466 = arith.constant 0 : index
    %953 = vector.load %arg26[%c104_465, %c0_466] : memref<128x128xf32, #tpu.memory_space<vmem>>, vector<8x128xf32>
    %cst_467 = arith.constant dense<0.000000e+00> : vector<8x128xf32>
    %954 = tpu.matmul %952, %663, %cst_467 {dimension_numbers = #tpu.dot_dimension_numbers<[1], [0], [0], [1], [0, 0, 1, 1], [], []>} : vector<8x32xf32>, vector<32x128xf32>, vector<8x128xf32> -> vector<8x128xf32>
    %955 = arith.addf %953, %954 : vector<8x128xf32>
    %956 = arith.negf %955 : vector<8x128xf32>
    %957 = math.exp %956 : vector<8x128xf32>
    %cst_468 = arith.constant 1.000000e+00 : f32
    %958 = vector.broadcast %cst_468 : f32 to vector<8x128xf32>
    %959 = arith.addf %958, %957 : vector<8x128xf32>
    %960 = arith.divf %958, %959 : vector<8x128xf32>
    %cst_469 = arith.constant 2.000000e+00 : f32
    %961 = vector.broadcast %cst_469 : f32 to vector<8x128xf32>
    %962 = arith.mulf %961, %960 : vector<8x128xf32>
    %cst_470 = arith.constant 1.000000e+00 : f32
    %963 = vector.broadcast %cst_470 : f32 to vector<8x128xf32>
    %964 = arith.subf %962, %963 : vector<8x128xf32>
    %965 = arith.select %14, %964, %960 : vector<8x128xi1>, vector<8x128xf32>
    %966 = vector.extract_strided_slice %965 {offsets = [0, 0], sizes = [8, 32], strides = [1, 1]} : vector<8x128xf32> to vector<8x32xf32>
    %967 = vector.extract_strided_slice %965 {offsets = [0, 32], sizes = [8, 32], strides = [1, 1]} : vector<8x128xf32> to vector<8x32xf32>
    %968 = vector.extract_strided_slice %965 {offsets = [0, 64], sizes = [8, 32], strides = [1, 1]} : vector<8x128xf32> to vector<8x32xf32>
    %969 = vector.extract_strided_slice %965 {offsets = [0, 96], sizes = [8, 32], strides = [1, 1]} : vector<8x128xf32> to vector<8x32xf32>
    %970 = arith.mulf %967, %950 : vector<8x32xf32>
    %971 = arith.mulf %966, %968 : vector<8x32xf32>
    %972 = arith.addf %970, %971 : vector<8x32xf32>
    %973 = math.tanh %972 : vector<8x32xf32>
    %974 = arith.mulf %969, %973 : vector<8x32xf32>
    %c112_471 = arith.constant 112 : index
    %c0_472 = arith.constant 0 : index
    %975 = vector.load %arg26[%c112_471, %c0_472] : memref<128x128xf32, #tpu.memory_space<vmem>>, vector<8x128xf32>
    %cst_473 = arith.constant dense<0.000000e+00> : vector<8x128xf32>
    %976 = tpu.matmul %974, %663, %cst_473 {dimension_numbers = #tpu.dot_dimension_numbers<[1], [0], [0], [1], [0, 0, 1, 1], [], []>} : vector<8x32xf32>, vector<32x128xf32>, vector<8x128xf32> -> vector<8x128xf32>
    %977 = arith.addf %975, %976 : vector<8x128xf32>
    %978 = arith.negf %977 : vector<8x128xf32>
    %979 = math.exp %978 : vector<8x128xf32>
    %cst_474 = arith.constant 1.000000e+00 : f32
    %980 = vector.broadcast %cst_474 : f32 to vector<8x128xf32>
    %981 = arith.addf %980, %979 : vector<8x128xf32>
    %982 = arith.divf %980, %981 : vector<8x128xf32>
    %cst_475 = arith.constant 2.000000e+00 : f32
    %983 = vector.broadcast %cst_475 : f32 to vector<8x128xf32>
    %984 = arith.mulf %983, %982 : vector<8x128xf32>
    %cst_476 = arith.constant 1.000000e+00 : f32
    %985 = vector.broadcast %cst_476 : f32 to vector<8x128xf32>
    %986 = arith.subf %984, %985 : vector<8x128xf32>
    %987 = arith.select %14, %986, %982 : vector<8x128xi1>, vector<8x128xf32>
    %988 = vector.extract_strided_slice %987 {offsets = [0, 0], sizes = [8, 32], strides = [1, 1]} : vector<8x128xf32> to vector<8x32xf32>
    %989 = vector.extract_strided_slice %987 {offsets = [0, 32], sizes = [8, 32], strides = [1, 1]} : vector<8x128xf32> to vector<8x32xf32>
    %990 = vector.extract_strided_slice %987 {offsets = [0, 64], sizes = [8, 32], strides = [1, 1]} : vector<8x128xf32> to vector<8x32xf32>
    %991 = vector.extract_strided_slice %987 {offsets = [0, 96], sizes = [8, 32], strides = [1, 1]} : vector<8x128xf32> to vector<8x32xf32>
    %992 = arith.mulf %989, %972 : vector<8x32xf32>
    %993 = arith.mulf %988, %990 : vector<8x32xf32>
    %994 = arith.addf %992, %993 : vector<8x32xf32>
    %995 = math.tanh %994 : vector<8x32xf32>
    %996 = arith.mulf %991, %995 : vector<8x32xf32>
    %c120_477 = arith.constant 120 : index
    %c0_478 = arith.constant 0 : index
    %997 = vector.load %arg26[%c120_477, %c0_478] : memref<128x128xf32, #tpu.memory_space<vmem>>, vector<8x128xf32>
    %cst_479 = arith.constant dense<0.000000e+00> : vector<8x128xf32>
    %998 = tpu.matmul %996, %663, %cst_479 {dimension_numbers = #tpu.dot_dimension_numbers<[1], [0], [0], [1], [0, 0, 1, 1], [], []>} : vector<8x32xf32>, vector<32x128xf32>, vector<8x128xf32> -> vector<8x128xf32>
    %999 = arith.addf %997, %998 : vector<8x128xf32>
    %1000 = arith.negf %999 : vector<8x128xf32>
    %1001 = math.exp %1000 : vector<8x128xf32>
    %cst_480 = arith.constant 1.000000e+00 : f32
    %1002 = vector.broadcast %cst_480 : f32 to vector<8x128xf32>
    %1003 = arith.addf %1002, %1001 : vector<8x128xf32>
    %1004 = arith.divf %1002, %1003 : vector<8x128xf32>
    %cst_481 = arith.constant 2.000000e+00 : f32
    %1005 = vector.broadcast %cst_481 : f32 to vector<8x128xf32>
    %1006 = arith.mulf %1005, %1004 : vector<8x128xf32>
    %cst_482 = arith.constant 1.000000e+00 : f32
    %1007 = vector.broadcast %cst_482 : f32 to vector<8x128xf32>
    %1008 = arith.subf %1006, %1007 : vector<8x128xf32>
    %1009 = arith.select %14, %1008, %1004 : vector<8x128xi1>, vector<8x128xf32>
    %1010 = vector.extract_strided_slice %1009 {offsets = [0, 0], sizes = [8, 32], strides = [1, 1]} : vector<8x128xf32> to vector<8x32xf32>
    %1011 = vector.extract_strided_slice %1009 {offsets = [0, 32], sizes = [8, 32], strides = [1, 1]} : vector<8x128xf32> to vector<8x32xf32>
    %1012 = vector.extract_strided_slice %1009 {offsets = [0, 64], sizes = [8, 32], strides = [1, 1]} : vector<8x128xf32> to vector<8x32xf32>
    %1013 = vector.extract_strided_slice %1009 {offsets = [0, 96], sizes = [8, 32], strides = [1, 1]} : vector<8x128xf32> to vector<8x32xf32>
    %1014 = arith.mulf %1011, %994 : vector<8x32xf32>
    %1015 = arith.mulf %1010, %1012 : vector<8x32xf32>
    %1016 = arith.addf %1014, %1015 : vector<8x32xf32>
    %1017 = math.tanh %1016 : vector<8x32xf32>
    %1018 = arith.mulf %1013, %1017 : vector<8x32xf32>
    %1019 = vector.extract_strided_slice %1018 {offsets = [0, 0], sizes = [8, 16], strides = [1, 1]} : vector<8x32xf32> to vector<8x16xf32>
    %1020 = tpu.concatenate %1019, %688 in 1 : vector<8x16xf32>, vector<8x16xf32> -> vector<8x32xf32>
    %c0_483 = arith.constant 0 : index
    %c0_484 = arith.constant 0 : index
    %1021 = vector.load %arg19[%c0_483, %c0_484] : memref<32x64xf32, #tpu.memory_space<vmem>>, vector<32x64xf32>
    %cst_485 = arith.constant dense<0.000000e+00> : vector<8x64xf32>
    %1022 = tpu.matmul %1020, %1021, %cst_485 {dimension_numbers = #tpu.dot_dimension_numbers<[1], [0], [0], [1], [0, 0, 1, 1], [], []>} : vector<8x32xf32>, vector<32x64xf32>, vector<8x64xf32> -> vector<8x64xf32>
    %c0_486 = arith.constant 0 : index
    %c0_487 = arith.constant 0 : index
    %1023 = vector.load %arg20[%c0_486, %c0_487] : memref<1x64xf32, #tpu.memory_space<vmem>>, vector<1x64xf32>
    %1024 = vector.broadcast %1023 : vector<1x64xf32> to vector<8x64xf32>
    %1025 = arith.addf %1022, %1024 : vector<8x64xf32>
    %cst_488 = arith.constant 0.000000e+00 : f32
    %1026 = vector.broadcast %cst_488 : f32 to vector<8x64xf32>
    %1027 = arith.maximumf %1025, %1026 : vector<8x64xf32>
    %c0_489 = arith.constant 0 : index
    %c0_490 = arith.constant 0 : index
    %1028 = vector.load %arg21[%c0_489, %c0_490] : memref<64x16xf32, #tpu.memory_space<vmem>>, vector<64x16xf32>
    %cst_491 = arith.constant dense<0.000000e+00> : vector<8x16xf32>
    %1029 = tpu.matmul %1027, %1028, %cst_491 {dimension_numbers = #tpu.dot_dimension_numbers<[1], [0], [0], [1], [0, 0, 1, 1], [], []>} : vector<8x64xf32>, vector<64x16xf32>, vector<8x16xf32> -> vector<8x16xf32>
    %c0_492 = arith.constant 0 : index
    %c0_493 = arith.constant 0 : index
    %1030 = vector.load %arg22[%c0_492, %c0_493] : memref<1x16xf32, #tpu.memory_space<vmem>>, vector<1x16xf32>
    %1031 = vector.broadcast %1030 : vector<1x16xf32> to vector<8x16xf32>
    %1032 = arith.addf %1029, %1031 : vector<8x16xf32>
    %cst_494 = arith.constant 0.000000e+00 : f32
    %1033 = vector.broadcast %cst_494 : f32 to vector<8x16xf32>
    %1034 = arith.maximumf %1032, %1033 : vector<8x16xf32>
    %c0_495 = arith.constant 0 : index
    %c0_496 = arith.constant 0 : index
    %1035 = vector.load %arg23[%c0_495, %c0_496] : memref<16x2xf32, #tpu.memory_space<vmem>>, vector<16x2xf32>
    %cst_497 = arith.constant dense<0.000000e+00> : vector<8x2xf32>
    %1036 = tpu.matmul %1034, %1035, %cst_497 {dimension_numbers = #tpu.dot_dimension_numbers<[1], [0], [0], [1], [0, 0, 1, 1], [], []>} : vector<8x16xf32>, vector<16x2xf32>, vector<8x2xf32> -> vector<8x2xf32>
    %c0_498 = arith.constant 0 : index
    %c0_499 = arith.constant 0 : index
    %1037 = vector.load %arg24[%c0_498, %c0_499] : memref<1x2xf32, #tpu.memory_space<vmem>>, vector<1x2xf32>
    %1038 = vector.broadcast %1037 : vector<1x2xf32> to vector<8x2xf32>
    %1039 = arith.addf %1036, %1038 : vector<8x2xf32>
    %c0_500 = arith.constant 0 : index
    %c0_501 = arith.constant 0 : index
    %1040 = vector.load %arg25[%c0_500, %c0_501] : memref<8x2xf32, #tpu.memory_space<vmem>>, vector<8x2xf32>
    tpu.vector_store %arg25[%c0_500, %c0_501], %1039 {strides = array<i32>} : memref<8x2xf32, #tpu.memory_space<vmem>>, vector<8x2xf32>,
    return
  }
}

</mosaic_0001>

<bundles_post_ra>
// kernel: attention_lstm_cnn2_forward.1
= control target key start
LH: loop header
LB: loop body
LE: loop exit
PB: predicated region body
PF: predicated region fallthrough
CT: control target
= control target key end

     0   :  { %s3609_s30 = smov 120   ;;  %v3611_v2 = vmov 0   ;;  %v80_v3 = vlaneseq  ;;  %v3612_v5 = vmov 0.0   ;;  %vm118_vm2 = vcmask 195584   ;;  %s4831_s0 = inlined_call_operand.vmem [shape: f32[8,128], index: 0, kind: input, shape index: {}]   ;;  %s4832_s2 = inlined_call_operand.vmem [shape: f32[8,1], index: 2, kind: input, shape index: {}]   ;;  %s4833_s1 = inlined_call_operand.vmem [shape: f32[8,24], index: 1, kind: input, shape index: {}]   ;;  %s4834_s4 = inlined_call_operand.vmem [shape: f32[8,1], index: 4, kind: input, shape index: {}]   ;;  %s4835_s8 = inlined_call_operand.vmem [shape: f32[32,1], index: 8, kind: input, shape index: {}]   ;;  %s4836_s3 = inlined_call_operand.vmem [shape: f32[8,1], index: 3, kind: input, shape index: {}]   ;;  %s4837_s6 = inlined_call_operand.vmem [shape: f32[32,1], index: 6, kind: input, shape index: {}]   ;;  %s4838_s7 = inlined_call_operand.vmem [shape: f32[32,1], index: 7, kind: input, shape index: {}]   ;;  %s4839_s5 = inlined_call_operand.vmem [shape: f32[32,24], index: 5, kind: input, shape index: {}]   ;;  %s4840_s10 = inlined_call_operand.vmem [shape: f32[8,1], index: 10, kind: input, shape index: {}]   ;;  %s4841_s11 = inlined_call_operand.vmem [shape: f32[8,1], index: 11, kind: input, shape index: {}]   ;;  %s4842_s12 = inlined_call_operand.vmem [shape: f32[8,1], index: 12, kind: input, shape index: {}]   ;;  %s4843_s9 = inlined_call_operand.vmem [shape: f32[8,96], index: 9, kind: input, shape index: {}]   ;;  %s4844_s13 = inlined_call_operand.vmem [shape: f32[8,128], index: 13, kind: input, shape index: {}]   ;;  %s4845_s15 = inlined_call_operand.vmem [shape: f32[1,128], index: 15, kind: input, shape index: {}]   ;;  %s4846_s14 = inlined_call_operand.vmem [shape: f32[32,128], index: 14, kind: input, shape index: {}]   ;;  %s4847_s16 = inlined_call_operand.vmem [shape: f32[32,128], index: 16, kind: input, shape index: {}]   ;;  %s4848_s18 = inlined_call_operand.vmem [shape: f32[1,128], index: 18, kind: input, shape index: {}]   ;;  %s4849_s17 = inlined_call_operand.vmem [shape: f32[32,128], index: 17, kind: input, shape index: {}]   ;;  %s4850_s19 = inlined_call_operand.vmem [shape: f32[32,64], index: 19, kind: input, shape index: {}]   ;;  %s4851_s20 = inlined_call_operand.vmem [shape: f32[1,64], index: 20, kind: input, shape index: {}]   ;;  %s4852_s21 = inlined_call_operand.vmem [shape: f32[64,16], index: 21, kind: input, shape index: {}]   ;;  %s4853_s22 = inlined_call_operand.vmem [shape: f32[1,16], index: 22, kind: input, shape index: {}]   ;;  %s4854_s23 = inlined_call_operand.vmem [shape: f32[16,2], index: 23, kind: input, shape index: {}]   ;;  %s4855_s24 = inlined_call_operand.vmem [shape: f32[1,2], index: 24, kind: input, shape index: {}]   ;;  %s4856_s25 = inlined_call_operand.vmem [shape: f32[8,2], index: 25, kind: output, shape index: {}]  }
   0x1   :  { %4861 = sst [smem:[#allocation5_spill]] %s4831_s0  ;;  %3391 = vset.pattern.permute.xlu1 %v3611_v2  ;;  %3393 = vset.pattern.permute.xlu0 %v3611_v2  ;;  %v3613_v20 = vmov 128.0  }
   0x2   :  { %4862 = sst [smem:[#allocation6_spill]] %s4832_s2  ;;  %3392 = vset.pattern.permute.xlu2 %v3611_v2  ;;  %v3754_v4 = vand.u32 127, %v80_v3  ;;  %3399 = vrcp.f32 %v3613_v20 }
   0x3   :  { %4863 = sst [smem:[#allocation7_spill]] %s4833_s1 }
   0x4   :  { %4864 = sst [smem:[#allocation8_spill]] %s4834_s4  ;;  %vm85_vm0 = vcmp.lt.s32.totalorder %v3754_v4, 120  ;;  %vm82_vm1 = vcmp.ge.s32.totalorder %v3754_v4, 8 }
   0x5   :  { %4865 = sst [smem:[#allocation9_spill]] %s4835_s8  ;;  %v3758_v6 = vsel %vm85_vm0, 1.0, %v3612_v5  ;;  %v3763_v9 = vsel %vm82_vm1, 1.0, %v3612_v5 }
   0x6   :  { %4866 = sst [smem:[#allocation10_spill]] %s4836_s3 }
   0x7   :  { %4867 = sst [smem:[#allocation11_spill]] %s4837_s6 }
   0x8   :  { %4868 = sst [smem:[#allocation12_spill]] %s4838_s7  ;;  %s3610_s7 = smov 8   ;;  %v3400_v21 = vpop.eup %3399 }
   0x9   :  { %4869 = sst [smem:[#allocation13_spill]] %s4839_s5  ;;  %v145_v22 = vmul.f32 128.0, %v3400_v21  ;;  %vm149_vm3 = vweird.f32 %v3400_v21 }
   0xa   :  { %4870 = sst [smem:[#allocation14_spill]] %s4840_s10 }
   0xb   :  { %s4871_s6 = sld [smem:[#allocation5_spill]]  ;;  %v146_v23 = vsub.f32 1.0, %v145_v22 }
   0xc   :  { %s4872_s2 = sld [smem:[#allocation6_spill]] }
   0xd   :  { %s4873_s8 = sld [smem:[#allocation7_spill]]  ;;  %v147_v24 = vmul.f32 %v3400_v21, %v146_v23 }
   0xe   :  { %s4874_s3 = sld [smem:[#allocation8_spill]] }
   0xf   :  { %s4875_s1 = sld [smem:[#allocation9_spill]]  ;;  %v148_v25 = vadd.f32 %v3400_v21, %v147_v24 }
  0x10   :  { %s4876_s26 = sld [smem:[#allocation10_spill]] }
  0x11   :  { %v104_v0 = vld [vmem:[%s4871_s6] sm:$0xff]  ;;  %v3779_v26 = vsel %vm149_vm3, %v3400_v21, %v148_v25  ;;  %s4877_s27 = sld [smem:[#allocation11_spill]]  ;;  %vm440_vm3 = vcmask 785408  }
  0x12   :  { %108 = vrot.lane.b32.xlu0 %v104_v0, %s3609_s30  ;;  %v112_v1 = vld [vmem:[%s4872_s2] sm:$0xff]  ;;  %s4879_s29 = sld [smem:[#allocation13_spill]] }
  0x13   :  { %115 = vperm.xlu1 %3391, %v112_v1   ;;  %v111_v12 = vld [vmem:[%s4873_s8] sm:$0xff]  ;;  %s4880_s4 = sld [smem:[#allocation14_spill]] }
  0x14   :  { %v178_v13 = vld [vmem:[%s4874_s3] sm:$0xff] }
  0x15   :  { %v380_v18 = vld [vmem:[%s4875_s1 + $0x18] sm:$0xff]  ;;  %v379_v54 = vld [vmem:[%s4875_s1 + $0x10] sm:$0xff]  ;;  %v378_v20 = vld [vmem:[%s4875_s1 + $0x8] sm:$0xff] }
  0x16   :  { %v171_v19 = vld [vmem:[%s4876_s26] sm:$0xff]  ;;  %s4878_s26 = sld [smem:[#allocation12_spill]] }
  0x17   :  { %v198_v48 = vld [vmem:[%s4877_s27 + $0x10] sm:$0xff]  ;;  %v199_v49 = vld [vmem:[%s4877_s27 + $0x18] sm:$0xff]  ;;  %v196_v50 = vld [vmem:[%s4877_s27] sm:$0xff] }
  0x18   :  { %v197_v51 = vld [vmem:[%s4877_s27 + $0x8] sm:$0xff]  ;;  %v192_v60 = vld [vmem:[%s4879_s29] sm:$0xff]  ;;  %v194_v62 = vld [vmem:[%s4879_s29 + $0x10] sm:$0xff] }
  0x19   :  { %v193_v61 = vld [vmem:[%s4879_s29 + $0x8] sm:$0xff]  ;;  %v195_v63 = vld [vmem:[%s4879_s29 + $0x18] sm:$0xff]  ;;  %v377_v21 = vld [vmem:[%s4875_s1] sm:$0xff] }
  0x1a   :  { %105 = vrot.lane.b32.xlu0 %v104_v0, %s3610_s7 }
  0x1c   :  { %v352_v52 = vld [vmem:[%s4878_s26 + $0x18] sm:$0xff]  ;;  %v351_v53 = vld [vmem:[%s4878_s26 + $0x10] sm:$0xff]  ;;  %v350_v55 = vld [vmem:[%s4878_s26 + $0x8] sm:$0xff] }
  0x1d   :  { %v349_v22 = vld [vmem:[%s4878_s26] sm:$0xff]  ;;  %s3615_s26 = smov 32  }
  0x22   :  { %181 = vperm.xlu0 %3393, %v178_v13  }
  0x84   :  { %v109_v7 = vpop.permute.xlu0 %108 }
  0x85   :  { %v110_v8 = vmul.f32 %v3758_v6, %v109_v7  ;;  %v116_v14 = vpop.permute.xlu1 %115 }
  0x87   :  { %135 = vmatpush.msra.mxu0 %v110_v8 }
  0x89   :  { %136 = vmatpush.msra.mxu0 %v104_v0 }
  0x8c   :  { %v106_v10 = vpop.permute.xlu0 %105 }
  0x8d   :  { %v107_v11 = vmul.f32 %v3763_v9, %v106_v10 }
  0x8f   :  { %137 = vmatpush.msra.mxu0 %v107_v11 }
  0x90   :  { %3244 = vmatmul.msk.f32.vlgmr.msra.gmra.mxu0 %vm118_vm2, %v111_v12 }
  0x94   :  { %v182_v44 = vpop.permute.xlu0 %181 }
 0x10d   :  { %v139_v15 = vpop.f32.mrf.mxu0 }
 0x10e   :  { %v140_v16 = vadd.f32 %v139_v15, %v116_v14 }
 0x110   :  { %142 = vadd.xlane.f32.xlu1 %v140_v16  ;;  %v152_v17 = vmul.f32 %v140_v16, %v140_v16 }
 0x112   :  { %153 = vadd.xlane.f32.xlu2 %v152_v17 }
 0x129   :  { %398 = vperm.xlu1 %3391, %v380_v18  }
 0x12a   :  { %174 = vperm.xlu2 %3392, %v171_v19  }
 0x183   :  { %v143_v27 = vpop.xlane.xlu1 %142 }
 0x184   :  { %v151_v28 = vmul.f32 %v3779_v26, %v143_v27 }
 0x185   :  { %v154_v29 = vpop.xlane.xlu2 %153 }
 0x186   :  { %v156_v30 = vmul.f32 %v151_v28, %v151_v28  ;;  %v155_v31 = vmul.f32 %v154_v29, %v3779_v26  ;;  %v158_v40 = vsub.f32 %v140_v16, %v151_v28 }
 0x188   :  { %v157_v32 = vsub.f32 %v155_v31, %v156_v30 }
 0x18a   :  { %v159_v33 = vadd.f32 1e-05, %v157_v32 }
 0x18c   :  { %3401 = vrsqrt.f32 %v159_v33  ;;  %vm166_vm5 = vweird.f32 %v159_v33 }
 0x18d   :  { %v175_v42 = vpop.permute.xlu2 %174 }
 0x192   :  { %v3402_v34 = vpop.eup %3401 }
 0x193   :  { %v161_v35 = vmul.f32 %v3402_v34, %v159_v33  ;;  %vm167_vm4 = vweird.f32 %v3402_v34 }
 0x194   :  { %vm168_vm6 = vmor %vm166_vm5, %vm167_vm4 }
 0x195   :  { %v162_v36 = vmul.f32 %v3402_v34, %v161_v35 }
 0x197   :  { %v163_v37 = vmul.f32 0.5, %v162_v36 }
 0x199   :  { %v164_v38 = vsub.f32 1.5, %v163_v37 }
 0x19b   :  { %v165_v39 = vmul.f32 %v3402_v34, %v164_v38  ;;  %v3856_v23 = vpop.permute.xlu1 %398 }
 0x19d   :  { %v169_v41 = vsel %vm168_vm6, %v3402_v34, %v165_v39 }
 0x19e   :  { %v170_v43 = vmul.f32 %v169_v41, %v158_v40 }
 0x1a0   :  { %v177_v45 = vmul.f32 %v175_v42, %v170_v43 }
 0x1a2   :  { %v184_v46 = vadd.f32 %v182_v44, %v177_v45 }
 0x1a4   :  { %v185_v47 = vmax.f32 %v184_v46, 0.0 }
 0x1a6   :  { %186 = vrot.lane.b32.xlu2 %v185_v47, %s3610_s7  ;;  %189 = vrot.lane.b32.xlu0 %v185_v47, %s3609_s30 }
 0x1ae   :  { %212 = vperm.xlu2 %3392, %v198_v48   ;;  %217 = vperm.xlu0 %3393, %v199_v49  }
 0x1b6   :  { %202 = vperm.xlu2 %3392, %v196_v50   ;;  %207 = vperm.xlu0 %3393, %v197_v51  }
 0x1be   :  { %370 = vperm.xlu2 %3392, %v352_v52   ;;  %365 = vperm.xlu0 %3393, %v351_v53  }
 0x1c6   :  { %393 = vperm.xlu2 %3392, %v379_v54   ;;  %360 = vperm.xlu0 %3393, %v350_v55  }
 0x200   :  { %v187_v58 = vpop.permute.xlu2 %186 }
 0x201   :  { %v188_v59 = vmul.f32 %v3763_v9, %v187_v58 }
 0x208   :  { %v213_v0 = vpop.permute.xlu2 %212 }
 0x210   :  { %v203_v1 = vpop.permute.xlu2 %202 }
 0x218   :  { %v190_v56 = vpop.permute.xlu0 %189  ;;  %v3861_v31 = vpop.permute.xlu2 %370 }
 0x219   :  { %v191_v57 = vmul.f32 %v3758_v6, %v190_v56 }
 0x21b   :  { %245 = vmatpush.msra.mxu1 %v191_v57 }
 0x21d   :  { %246 = vmatpush.msra.mxu1 %v185_v47 }
 0x21f   :  { %247 = vmatpush.msra.mxu1 %v188_v59 }
 0x220   :  { %3245 = vmatmul.msk.f32.vlgmr.msra.gmra.mxu1 %vm118_vm2, %v192_v60  ;;  %v218_v7 = vpop.permute.xlu0 %217  ;;  %v394_v43 = vpop.permute.xlu2 %393 }
 0x228   :  { %3246 = vmatmul.msk.f32.gmra.mxu1 %vm118_vm2, %v193_v61  ;;  %v208_v11 = vpop.permute.xlu0 %207 }
 0x230   :  { %3247 = vmatmul.msk.f32.gmra.mxu1 %vm118_vm2, %v194_v62  ;;  %v3858_v25 = vpop.permute.xlu0 %365 }
 0x238   :  { %3248 = vmatmul.msk.f32.gmra.mxu1 %vm118_vm2, %v195_v63  ;;  %v361_v29 = vpop.permute.xlu0 %360 }
 0x29d   :  { %v249_v2 = vpop.f32.mrf.mxu1 }
 0x29e   :  { %v3827_v3 = vadd.f32 %v249_v2, %v203_v1 }
 0x2a0   :  { %261 = vadd.xlane.f32.xlu1 %v3827_v3  ;;  %v273_v10 = vmul.f32 %v3827_v3, %v3827_v3 }
 0x2a5   :  { %v252_v8 = vpop.f32.mrf.mxu1 }
 0x2a6   :  { %v3832_v13 = vadd.f32 %v252_v8, %v208_v11 }
 0x2a8   :  { %277 = vadd.xlane.f32.xlu1 %v273_v10  ;;  %v274_v17 = vmul.f32 %v3832_v13, %v3832_v13 }
 0x2ad   :  { %v255_v12 = vpop.f32.mrf.mxu1 }
 0x2ae   :  { %v3834_v14 = vadd.f32 %v255_v12, %v213_v0 }
 0x2b0   :  { %265 = vadd.xlane.f32.xlu0 %v3834_v14  ;;  %263 = vadd.xlane.f32.xlu1 %v3832_v13  ;;  %v275_v19 = vmul.f32 %v3834_v14, %v3834_v14 }
 0x2b5   :  { %v258_v15 = vpop.f32.mrf.mxu1 }
 0x2b6   :  { %v3838_v16 = vadd.f32 %v258_v15, %v218_v7 }
 0x2b8   :  { %279 = vadd.xlane.f32.xlu1 %v274_v17  ;;  %v276_v18 = vmul.f32 %v3838_v16, %v3838_v16 }
 0x2ba   :  { %283 = vadd.xlane.f32.xlu2 %v276_v18 }
 0x2c0   :  { %281 = vadd.xlane.f32.xlu1 %v275_v19 }
 0x2c4   :  { %388 = vperm.xlu0 %3393, %v378_v20  }
 0x2c8   :  { %267 = vadd.xlane.f32.xlu1 %v3838_v16 }
 0x2d2   :  { %383 = vperm.xlu2 %3392, %v377_v21  }
 0x2e1   :  { %355 = vperm.xlu1 %3391, %v349_v22  }
 0x313   :  { %v262_v24 = vpop.xlane.xlu1 %261 }
 0x314   :  { %v3864_v32 = vmul.f32 %v262_v24, %v3779_v26 }
 0x316   :  { %v289_v39 = vmul.f32 %v3864_v32, %v3864_v32 }
 0x31b   :  { %v278_v27 = vpop.xlane.xlu1 %277 }
 0x31c   :  { %v285_v36 = vmul.f32 %v278_v27, %v3779_v26 }
 0x31e   :  { %v293_v42 = vsub.f32 %v285_v36, %v289_v39 }
 0x320   :  { %v3872_v47 = vadd.f32 1e-05, %v293_v42 }
 0x322   :  { %vm311_vm1 = vweird.f32 %v3872_v47 }
 0x323   :  { %v264_v28 = vpop.xlane.xlu1 %263  ;;  %v266_v37 = vpop.xlane.xlu0 %265 }
 0x324   :  { %v270_v30 = vmul.f32 %v264_v28, %v3779_v26  ;;  %v271_v40 = vmul.f32 %v266_v37, %v3779_v26 }
 0x326   :  { %v290_v34 = vmul.f32 %v270_v30, %v270_v30  ;;  %v291_v45 = vmul.f32 %v271_v40, %v271_v40  ;;  %v298_v1 = vsub.f32 %v3832_v13, %v270_v30  ;;  %v299_v13 = vsub.f32 %v3834_v14, %v271_v40 }
 0x32b   :  { %v280_v33 = vpop.xlane.xlu1 %279 }
 0x32c   :  { %v286_v35 = vmul.f32 %v280_v33, %v3779_v26 }
 0x32d   :  { %v284_v53 = vpop.xlane.xlu2 %283 }
 0x32e   :  { %v294_v38 = vsub.f32 %v286_v35, %v290_v34  ;;  %v288_v57 = vmul.f32 %v284_v53, %v3779_v26 }
 0x330   :  { %v302_v41 = vadd.f32 1e-05, %v294_v38 }
 0x332   :  { %3403 = vrsqrt.f32 %v302_v41  ;;  %vm321_vm8 = vweird.f32 %v302_v41 }
 0x333   :  { %v282_v44 = vpop.xlane.xlu1 %281  ;;  %3405 = vrsqrt.f32 %v3872_v47 }
 0x334   :  { %v287_v46 = vmul.f32 %v282_v44, %v3779_v26  ;;  %v297_v44 = vsub.f32 %v3827_v3, %v3864_v32  ;;  %v486_v3 = vld [vmem:[%s4841_s11] sm:$0xff] }
 0x336   :  { %v295_v48 = vsub.f32 %v287_v46, %v291_v45  ;;  %v389_v19 = vpop.permute.xlu0 %388 }
 0x338   :  { %v3404_v49 = vpop.eup %3403  ;;  %v303_v50 = vadd.f32 1e-05, %v295_v48 }
 0x339   :  { %v316_v51 = vmul.f32 %v3404_v49, %v302_v41  ;;  %v3406_v59 = vpop.eup %3405  ;;  %vm322_vm7 = vweird.f32 %v3404_v49 }
 0x33a   :  { %3407 = vrsqrt.f32 %v303_v50  ;;  %vm323_vm9 = vmor %vm321_vm8, %vm322_vm7  ;;  %v306_v7 = vmul.f32 %v3406_v59, %v3872_v47  ;;  %vm331_vm11 = vweird.f32 %v303_v50  ;;  %vm312_vm15 = vweird.f32 %v3406_v59  ;;  %v384_v47 = vpop.permute.xlu2 %383 }
 0x33b   :  { %v317_v52 = vmul.f32 %v3404_v49, %v316_v51  ;;  %v268_v54 = vpop.xlane.xlu1 %267  ;;  %vm313_vm2 = vmor %vm311_vm1, %vm312_vm15  ;;  %vm538_vm7 = vcmask 64512   ;;  %vm1826_vm1 = vcmask 130048  }
 0x33c   :  { %v272_v55 = vmul.f32 %v268_v54, %v3779_v26  ;;  %v307_v17 = vmul.f32 %v3406_v59, %v306_v7  ;;  %v433_v7 = vld [vmem:[%s4843_s9] sm:$0xff] }
 0x33d   :  { %v318_v56 = vmul.f32 0.5, %v317_v52 }
 0x33e   :  { %v292_v58 = vmul.f32 %v272_v55, %v272_v55  ;;  %v308_v27 = vmul.f32 0.5, %v307_v17  ;;  %v300_v41 = vsub.f32 %v3838_v16, %v272_v55  ;;  %v434_v16 = vld [vmem:[%s4880_s4] sm:$0xff] }
 0x33f   :  { %v319_v60 = vsub.f32 1.5, %v318_v56 }
 0x340   :  { %v3408_v61 = vpop.eup %3407  ;;  %v296_v62 = vsub.f32 %v288_v57, %v292_v58  ;;  %v309_v36 = vsub.f32 1.5, %v308_v27 }
 0x341   :  { %v326_v63 = vmul.f32 %v3408_v61, %v303_v50  ;;  %v320_v0 = vmul.f32 %v3404_v49, %v319_v60  ;;  %vm332_vm10 = vweird.f32 %v3408_v61 }
 0x342   :  { %v304_v2 = vadd.f32 1e-05, %v296_v62  ;;  %vm333_vm12 = vmor %vm331_vm11, %vm332_vm10  ;;  %v310_v40 = vmul.f32 %v3406_v59, %v309_v36 }
 0x343   :  { %v327_v8 = vmul.f32 %v3408_v61, %v326_v63  ;;  %v324_v10 = vsel %vm323_vm9, %v3404_v49, %v320_v0 }
 0x344   :  { %v346_v11 = vmul.f32 %v324_v10, %v298_v1  ;;  %3409 = vrsqrt.f32 %v304_v2  ;;  %vm341_vm14 = vweird.f32 %v304_v2 }
 0x345   :  { %v328_v12 = vmul.f32 0.5, %v327_v8 }
 0x346   :  { %v374_v15 = vmul.f32 %v361_v29, %v346_v11 }
 0x347   :  { %v329_v18 = vsub.f32 1.5, %v328_v12 }
 0x348   :  { %v402_v20 = vadd.f32 %v389_v19, %v374_v15 }
 0x349   :  { %v330_v21 = vmul.f32 %v3408_v61, %v329_v18 }
 0x34a   :  { %v3410_v22 = vpop.eup %3409  ;;  %v3880_v24 = vmax.f32 %v402_v20, 0.0  ;;  %v533_v20 = vld [vmem:[%s4844_s13] sm:$0xff] }
 0x34b   :  { %v336_v28 = vmul.f32 %v3410_v22, %v304_v2  ;;  %v334_v30 = vsel %vm333_vm12, %v3408_v61, %v330_v21  ;;  %vm342_vm13 = vweird.f32 %v3410_v22  ;;  %3379 = vmatpush.msra.mxu3 %v533_v20  ;;  %vm88_vm12 = vcmp.ge.s32.totalorder %v3754_v4, 64 }
 0x34c   :  { %423 = vrot.lane.b32.xlu2 %v3880_v24, %s3609_s30  ;;  %v347_v29 = vmul.f32 %v334_v30, %v299_v13  ;;  %vm343_vm0 = vmor %vm341_vm14, %vm342_vm13  ;;  %vm89_vm13 = vcmp.lt.s32.totalorder %v3754_v4, 96 }
 0x34d   :  { %v337_v33 = vmul.f32 %v3410_v22, %v336_v28  ;;  %vm4092_vm15 = vmand %vm88_vm12, %vm89_vm13 }
 0x34e   :  { %v375_v34 = vmul.f32 %v3858_v25, %v347_v29 }
 0x34f   :  { %v338_v35 = vmul.f32 0.5, %v337_v33 }
 0x350   :  { %v403_v37 = vadd.f32 %v394_v43, %v375_v34  ;;  %v314_v43 = vsel %vm313_vm2, %v3406_v59, %v310_v40 }
 0x351   :  { %v339_v38 = vsub.f32 1.5, %v338_v35  ;;  %v345_v48 = vmul.f32 %v314_v43, %v297_v44 }
 0x352   :  { %v407_v39 = vmax.f32 %v403_v37, 0.0 }
 0x353   :  { %v340_v14 = vmul.f32 %v3410_v22, %v339_v38  ;;  %v356_v46 = vpop.permute.xlu1 %355 }
 0x354   :  { %425 = vrot.lane.b32.xlu0 %v407_v39, %s3609_s30  ;;  %413 = vrot.lane.b32.xlu2 %v407_v39, %s3610_s7  ;;  %v373_v50 = vmul.f32 %v356_v46, %v345_v48 }
 0x355   :  { %v344_v42 = vsel %vm343_vm0, %v3410_v22, %v340_v14  ;;  %vm721_vm0 = vcmask 261120  }
 0x356   :  { %v348_v25 = vmul.f32 %v344_v42, %v300_v41  ;;  %v401_v52 = vadd.f32 %v384_v47, %v373_v50  ;;  %v3940_v50 = vld [vmem:[%s4846_s14 + $0x18] sm:$0xff]  ;;  %v3952_v47 = vld [vmem:[%s4846_s14 + $0x8] sm:$0xff] }
 0x357   :  { %737 = vmatpush.msrb.mxu0 %v3940_v50  ;;  %1077 = vmatpush.msrb.mxu1 %v3940_v50 }
 0x358   :  { %v376_v45 = vmul.f32 %v3861_v31, %v348_v25  ;;  %v405_v31 = vmax.f32 %v401_v52, 0.0  ;;  %v3960_v52 = vld [vmem:[%s4846_s14] sm:$0xff] }
 0x35a   :  { %v404_v49 = vadd.f32 %v3856_v23, %v376_v45  ;;  %v493_v23 = vld [vmem:[%s4842_s12] sm:$0xff] }
 0x35c   :  { %437 = vperm.xlu2 %3392, %v434_v16   ;;  %v408_v51 = vmax.f32 %v404_v49, 0.0 }
 0x35e   :  { %427 = vrot.lane.b32.xlu1 %v408_v51, %s3609_s30  ;;  %415 = vrot.lane.b32.xlu0 %v408_v51, %s3610_s7 }
 0x364   :  { %489 = vperm.xlu2 %3392, %v486_v3  }
 0x366   :  { %421 = vrot.lane.b32.xlu1 %v405_v31, %s3609_s30  ;;  %409 = vrot.lane.b32.xlu0 %v405_v31, %s3610_s7 }
 0x36c   :  { %496 = vperm.xlu2 %3392, %v493_v23  }
 0x36e   :  { %411 = vrot.lane.b32.xlu1 %v3880_v24, %s3610_s7 }
 0x3a6   :  { %v424_v55 = vpop.permute.xlu2 %423 }
 0x3a7   :  { %v430_v57 = vmul.f32 %v3758_v6, %v424_v55 }
 0x3ae   :  { %v414_v61 = vpop.permute.xlu2 %413 }
 0x3af   :  { %v419_v0 = vmul.f32 %v3763_v9, %v414_v61 }
 0x3b6   :  { %v438_v8 = vpop.permute.xlu2 %437 }
 0x3be   :  { %v490_v28 = vpop.permute.xlu2 %489 }
 0x3c6   :  { %v426_v32 = vpop.permute.xlu0 %425  ;;  %v497_v37 = vpop.permute.xlu2 %496 }
 0x3c7   :  { %v431_v56 = vmul.f32 %v3758_v6, %v426_v32 }
 0x3d0   :  { %v428_v53 = vpop.permute.xlu1 %427  ;;  %v416_v60 = vpop.permute.xlu0 %415 }
 0x3d1   :  { %v432_v54 = vmul.f32 %v3758_v6, %v428_v53  ;;  %v420_v62 = vmul.f32 %v3763_v9, %v416_v60  ;;  %v3394_v60 = vld [vmem:[%s4845_s15] ss:$0 sm:$0xff]  ;;  %s3614_s15 = smov 64  }
 0x3d3   :  { %448 = vmatpush.msra.mxu2 %v432_v54 }
 0x3d5   :  { %449 = vmatpush.msra.mxu2 %v431_v56 }
 0x3d7   :  { %450 = vmatpush.msra.mxu2 %v430_v57 }
 0x3d8   :  { %v422_v58 = vpop.permute.xlu1 %421  ;;  %v410_v1 = vpop.permute.xlu0 %409 }
 0x3d9   :  { %v429_v59 = vmul.f32 %v3758_v6, %v422_v58  ;;  %v417_v6 = vmul.f32 %v3763_v9, %v410_v1 }
 0x3db   :  { %451 = vmatpush.msra.mxu2 %v429_v59  ;;  %v95_v59 = vand.u32 31, %v3754_v4 }
 0x3dd   :  { %452 = vmatpush.msra.mxu2 %v408_v51  ;;  %v3945_v51 = vld [vmem:[%s4846_s14 + $0x10] sm:$0xff]  ;;  %vm3994_vm8 = vcmp.lt.s32.totalorder %v95_v59, 16 }
 0x3de   :  { %738 = vmatpush.msrb.mxu0 %v3945_v51  ;;  %1078 = vmatpush.msrb.mxu1 %v3945_v51 }
 0x3df   :  { %453 = vmatpush.msra.mxu2 %v407_v39 }
 0x3e0   :  { %v412_v63 = vpop.permute.xlu1 %411  ;;  %739 = vmatpush.msrb.mxu0 %v3952_v47  ;;  %1079 = vmatpush.msrb.mxu1 %v3952_v47 }
 0x3e1   :  { %454 = vmatpush.msra.mxu2 %v3880_v24  ;;  %v418_v2 = vmul.f32 %v3763_v9, %v412_v63 }
 0x3e2   :  { %740 = vmatpush.msrb.mxu0 %v3960_v52  ;;  %1080 = vmatpush.msrb.mxu1 %v3960_v52 }
 0x3e3   :  { %455 = vmatpush.msra.mxu2 %v405_v31  ;;  %741 = vmatmul.f32.vlgmr.msrb.gmra.mxu0 %v3612_v5 }
 0x3e4   :  { %805 = vmatpush.msra.mxu0 %v3940_v50  ;;  %1281 = vmatpush.msra.mxu1 %v3940_v50 }
 0x3e5   :  { %456 = vmatpush.msra.mxu2 %v420_v62 }
 0x3e6   :  { %806 = vmatpush.msra.mxu0 %v3945_v51  ;;  %1282 = vmatpush.msra.mxu1 %v3945_v51 }
 0x3e7   :  { %457 = vmatpush.msra.mxu2 %v419_v0 }
 0x3e8   :  { %807 = vmatpush.msra.mxu0 %v3952_v47  ;;  %1283 = vmatpush.msra.mxu1 %v3952_v47 }
 0x3e9   :  { %458 = vmatpush.msra.mxu2 %v418_v2 }
 0x3ea   :  { %808 = vmatpush.msra.mxu0 %v3960_v52  ;;  %1284 = vmatpush.msra.mxu1 %v3960_v52 }
 0x3eb   :  { %459 = vmatpush.msra.mxu2 %v417_v6 }
 0x3ec   :  { %3249 = vmatmul.msk.f32.vlgmr.msra.gmra.mxu2 %vm440_vm3, %v433_v7  ;;  %873 = vmatpush.msrb.mxu0 %v3940_v50 }
 0x3ed   :  { %602 = vmatpush.msrb.mxu2 %v533_v20 }
 0x3ee   :  { %874 = vmatpush.msrb.mxu0 %v3945_v51 }
 0x3ef   :  { %941 = vmatpush.msra.mxu2 %v3940_v50 }
 0x3f0   :  { %875 = vmatpush.msrb.mxu0 %v3952_v47 }
 0x3f1   :  { %942 = vmatpush.msra.mxu2 %v3945_v51 }
 0x3f2   :  { %876 = vmatpush.msrb.mxu0 %v3960_v52 }
 0x3f3   :  { %943 = vmatpush.msra.mxu2 %v3952_v47 }
 0x3f5   :  { %944 = vmatpush.msra.mxu2 %v3960_v52 }
 0x46f   :  { %v461_v10 = vpop.f32.mrf.mxu2 }
 0x470   :  { %v462_v11 = vadd.f32 %v461_v10, %v438_v8 }
 0x472   :  { %464 = vadd.xlane.f32.xlu1 %v462_v11  ;;  %v467_v12 = vmul.f32 %v462_v11, %v462_v11 }
 0x474   :  { %468 = vadd.xlane.f32.xlu0 %v467_v12 }
 0x4e5   :  { %v465_v15 = vpop.xlane.xlu1 %464 }
 0x4e6   :  { %v466_v17 = vmul.f32 %v465_v15, %v3779_v26 }
 0x4e7   :  { %v469_v18 = vpop.xlane.xlu0 %468 }
 0x4e8   :  { %v471_v19 = vmul.f32 %v466_v17, %v466_v17  ;;  %v470_v9 = vmul.f32 %v469_v18, %v3779_v26  ;;  %v473_v34 = vsub.f32 %v462_v11, %v466_v17 }
 0x4ea   :  { %v472_v21 = vsub.f32 %v470_v9, %v471_v19 }
 0x4ec   :  { %v474_v22 = vadd.f32 1e-05, %v472_v21 }
 0x4ee   :  { %3411 = vrsqrt.f32 %v474_v22  ;;  %vm481_vm5 = vweird.f32 %v474_v22 }
 0x4f4   :  { %v3412_v13 = vpop.eup %3411 }
 0x4f5   :  { %v476_v24 = vmul.f32 %v3412_v13, %v474_v22  ;;  %vm482_vm4 = vweird.f32 %v3412_v13 }
 0x4f6   :  { %vm483_vm6 = vmor %vm481_vm5, %vm482_vm4 }
 0x4f7   :  { %v477_v27 = vmul.f32 %v3412_v13, %v476_v24 }
 0x4f9   :  { %v478_v30 = vmul.f32 0.5, %v477_v27 }
 0x4fb   :  { %v479_v29 = vsub.f32 1.5, %v478_v30 }
 0x4fd   :  { %v480_v33 = vmul.f32 %v3412_v13, %v479_v29 }
 0x4ff   :  { %v484_v26 = vsel %vm483_vm6, %v3412_v13, %v480_v33 }
 0x500   :  { %v485_v35 = vmul.f32 %v484_v26, %v473_v34 }
 0x502   :  { %v492_v36 = vmul.f32 %v490_v28, %v485_v35 }
 0x504   :  { %v499_v38 = vadd.f32 %v497_v37, %v492_v36 }
 0x506   :  { %v500_v39 = vmax.f32 %v499_v38, 0.0 }
 0x508   :  { %501 = vxpose.xlu2.b32.start.end [1/1] (short) %v500_v39, 128 }
 0x5a1   :  { %v517_v14 = vpop.trf.xlu2 }
 0x5a2   :  { %3250 = vmatmul.msk.f32.vlgmr.msrb.gmra.mxu2 %vm538_vm7, %v517_v14 }
 0x5a3   :  { %1145 = vmatpush.msrb.mxu2 %v3940_v50 }
 0x5a5   :  { %1146 = vmatpush.msrb.mxu2 %v3945_v51 }
 0x5a7   :  { %1147 = vmatpush.msrb.mxu2 %v3952_v47 }
 0x5a9   :  { %v518_v40 = vpop.trf.xlu2  ;;  %1148 = vmatpush.msrb.mxu2 %v3960_v52 }
 0x5aa   :  { %3251 = vmatmul.msk.f32.gmra.mxu2 %vm538_vm7, %v518_v40 }
 0x5b1   :  { %v519_v41 = vpop.trf.xlu2 }
 0x5b2   :  { %3252 = vmatmul.msk.f32.vlgmr.msra.gmra.mxu3 %vm538_vm7, %v519_v41 }
 0x5b9   :  { %v520_v42 = vpop.trf.xlu2 }
 0x5ba   :  { %3253 = vmatmul.msk.f32.gmra.mxu3 %vm538_vm7, %v520_v42 }
 0x5c1   :  { %v521_v25 = vpop.trf.xlu2 }
 0x5c2   :  { %3254 = vmatmul.msk.f32.gmra.mxu3 %vm538_vm7, %v521_v25 }
 0x5c9   :  { %v522_v43 = vpop.trf.xlu2 }
 0x5ca   :  { %3255 = vmatmul.msk.f32.gmra.mxu3 %vm538_vm7, %v522_v43 }
 0x5d1   :  { %v523_v44 = vpop.trf.xlu2 }
 0x5d2   :  { %3256 = vmatmul.msk.f32.gmra.mxu3 %vm538_vm7, %v523_v44  ;;  %v742_v44 = vpop.f32.mrf.mxu0 }
 0x5d9   :  { %v524_v45 = vpop.trf.xlu2 }
 0x5da   :  { %3257 = vmatmul.msk.f32.gmra.mxu3 %vm538_vm7, %v524_v45 }
 0x5e1   :  { %v525_v46 = vpop.trf.xlu2 }
 0x5e2   :  { %3258 = vmatmul.msk.f32.gmra.mxu3 %vm538_vm7, %v525_v46 }
 0x5e9   :  { %v526_v16 = vpop.trf.xlu2 }
 0x5ea   :  { %3259 = vmatmul.msk.f32.gmra.mxu3 %vm538_vm7, %v526_v16 }
 0x5f1   :  { %v527_v48 = vpop.trf.xlu2 }
 0x5f2   :  { %3260 = vmatmul.msk.f32.gmra.mxu3 %vm538_vm7, %v527_v48 }
 0x5f9   :  { %v528_v49 = vpop.trf.xlu2 }
 0x5fa   :  { %3261 = vmatmul.msk.f32.gmra.mxu3 %vm538_vm7, %v528_v49 }
 0x601   :  { %v529_v3 = vpop.trf.xlu2 }
 0x602   :  { %3262 = vmatmul.msk.f32.gmra.mxu3 %vm538_vm7, %v529_v3 }
 0x609   :  { %v530_v31 = vpop.trf.xlu2 }
 0x60a   :  { %3263 = vmatmul.msk.f32.gmra.mxu3 %vm538_vm7, %v530_v31 }
 0x611   :  { %v531_v23 = vpop.trf.xlu2 }
 0x612   :  { %3264 = vmatmul.msk.f32.gmra.mxu3 %vm538_vm7, %v531_v23 }
 0x619   :  { %v532_v32 = vpop.trf.xlu2 }
 0x61a   :  { %3265 = vmatmul.msk.f32.gmra.mxu3 %vm538_vm7, %v532_v32 }
 0x625   :  { %v604_v33 = vpop.f32.mrf.mxu2 }
 0x626   :  { %v4078_v25 = vadd.f32 %v3394_v60, %v604_v33 }
 0x62d   :  { %v607_v38 = vpop.f32.mrf.mxu2 }
 0x62e   :  { %v4070_v14 = vadd.f32 %v3394_v60, %v607_v38 }
 0x635   :  { %v610_v53 = vpop.f32.mrf.mxu3 }
 0x636   :  { %v4058_v26 = vadd.f32 %v3394_v60, %v610_v53 }
 0x63d   :  { %v613_v54 = vpop.f32.mrf.mxu3 }
 0x63e   :  { %v4046_v27 = vadd.f32 %v3394_v60, %v613_v54 }
 0x645   :  { %v616_v55 = vpop.f32.mrf.mxu3 }
 0x646   :  { %v4034_v20 = vadd.f32 %v3394_v60, %v616_v55 }
 0x64d   :  { %v619_v56 = vpop.f32.mrf.mxu3 }
 0x64e   :  { %v4022_v15 = vadd.f32 %v3394_v60, %v619_v56 }
 0x655   :  { %v622_v57 = vpop.f32.mrf.mxu3 }
 0x656   :  { %v4010_v7 = vadd.f32 %v3394_v60, %v622_v57 }
 0x65d   :  { %v625_v58 = vpop.f32.mrf.mxu3 }
 0x65e   :  { %v3998_v63 = vadd.f32 %v3394_v60, %v625_v58 }
 0x665   :  { %v628_v62 = vpop.f32.mrf.mxu3 }
 0x666   :  { %v4000_v0 = vadd.f32 %v3394_v60, %v628_v62  ;;  %v3140_v62 = vld [vmem:[%s4850_s19 + $0x10] sm:$0xff] }
 0x668   :  { %v712_v1 = vsel %vm3994_vm8, %v3998_v63, %v4000_v0  ;;  %v714_v2 = vsel %vm3994_vm8, %v4000_v0, %v3998_v63 }
 0x66d   :  { %v631_v6 = vpop.f32.mrf.mxu3 }
 0x66e   :  { %v4012_v8 = vadd.f32 %v3394_v60, %v631_v6 }
 0x670   :  { %v706_v10 = vsel %vm3994_vm8, %v4010_v7, %v4012_v8  ;;  %v708_v11 = vsel %vm3994_vm8, %v4012_v8, %v4010_v7 }
 0x675   :  { %v634_v12 = vpop.f32.mrf.mxu3 }
 0x676   :  { %v4024_v17 = vadd.f32 %v3394_v60, %v634_v12 }
 0x678   :  { %v700_v18 = vsel %vm3994_vm8, %v4022_v15, %v4024_v17  ;;  %v702_v19 = vsel %vm3994_vm8, %v4024_v17, %v4022_v15 }
 0x67d   :  { %v637_v9 = vpop.f32.mrf.mxu3 }
 0x67e   :  { %v4036_v21 = vadd.f32 %v3394_v60, %v637_v9 }
 0x680   :  { %v694_v22 = vsel %vm3994_vm8, %v4034_v20, %v4036_v21  ;;  %v696_v13 = vsel %vm3994_vm8, %v4036_v21, %v4034_v20 }
 0x685   :  { %v640_v24 = vpop.f32.mrf.mxu3 }
 0x686   :  { %v4048_v28 = vadd.f32 %v3394_v60, %v640_v24 }
 0x688   :  { %v688_v30 = vsel %vm3994_vm8, %v4046_v27, %v4048_v28  ;;  %v690_v29 = vsel %vm3994_vm8, %v4048_v28, %v4046_v27 }
 0x68d   :  { %v643_v34 = vpop.f32.mrf.mxu3 }
 0x68e   :  { %v4060_v35 = vadd.f32 %v3394_v60, %v643_v34 }
 0x690   :  { %v682_v36 = vsel %vm3994_vm8, %v4058_v26, %v4060_v35  ;;  %v684_v37 = vsel %vm3994_vm8, %v4060_v35, %v4058_v26 }
 0x695   :  { %v646_v39 = vpop.f32.mrf.mxu3 }
 0x696   :  { %v4072_v40 = vadd.f32 %v3394_v60, %v646_v39 }
 0x698   :  { %v678_v41 = vsel %vm3994_vm8, %v4072_v40, %v4070_v14 }
 0x69d   :  { %v649_v42 = vpop.f32.mrf.mxu3 }
 0x69e   :  { %v4080_v43 = vadd.f32 %v3394_v60, %v649_v42 }
 0x6a0   :  { %v670_v45 = vsel %vm3994_vm8, %v4078_v25, %v4080_v43  ;;  %v672_v46 = vsel %vm3994_vm8, %v4080_v43, %v4078_v25 }
 0x6a1   :  { %v745_v16 = vadd.f32 %v742_v44, %v670_v45 }
 0x6a3   :  { %v3266_v48 = vmul.f32 -1.442695, %v745_v16  ;;  %v676_v16 = vsel %vm3994_vm8, %v4070_v14, %v4072_v40 }
 0x6a5   :  { %3413 = vpow2.f32 %v3266_v48 }
 0x6ab   :  { %v3414_v49 = vpop.eup %3413 }
 0x6ac   :  { %v749_v3 = vadd.f32 1.0, %v3414_v49 }
 0x6ae   :  { %3415 = vrcp.f32 %v749_v3  ;;  %v761_v53 = vand.u32 2147483648, %v749_v3  ;;  %v759_v55 = vand.u32 2147483647, %v749_v3  ;;  %vm755_vm10 = vweird.f32 %v749_v3 }
 0x6b0   :  { %v762_v57 = vor.u32 1.1754944e-38, %v761_v53  ;;  %vm760_vm14 = vcmp.eq.f32.partialorder %v759_v55, 8.507059e+37 }
 0x6b4   :  { %v3416_v31 = vpop.eup %3415 }
 0x6b5   :  { %v751_v23 = vmul.f32 %v3416_v31, %v749_v3  ;;  %vm756_vm9 = vweird.f32 %v3416_v31 }
 0x6b6   :  { %vm757_vm11 = vmor %vm755_vm10, %vm756_vm9 }
 0x6b7   :  { %v752_v32 = vsub.f32 1.0, %v751_v23 }
 0x6b9   :  { %v753_v54 = vmul.f32 %v3416_v31, %v752_v32 }
 0x6bb   :  { %v754_v56 = vadd.f32 %v3416_v31, %v753_v54 }
 0x6bd   :  { %v758_v58 = vsel %vm757_vm11, %v3416_v31, %v754_v56 }
 0x6be   :  { %v763_v59 = vsel %vm760_vm14, %v762_v57, %v758_v58 }
 0x6bf   :  { %v765_v60 = vmul.f32 2.0, %v763_v59 }
 0x6c1   :  { %v3267_v6 = vadd.f32 -1.0, %v765_v60 }
 0x6c3   :  { %v767_v12 = vsel %vm4092_vm15, %v3267_v6, %v763_v59 }
 0x6c4   :  { %770 = vrot.lane.b32.xlu1 %v767_v12, %s3614_s15  ;;  %v768_v4 = vmul.f32 0.0, %v767_v12 }
 0x736   :  { %v771_v9 = vpop.permute.xlu1 %770 }
 0x737   :  { %v773_v24 = vmul.f32 %v771_v9, %v767_v12 }
 0x739   :  { %775 = vrot.lane.b32.xlu0 %v773_v24, %s3615_s26 }
 0x7ab   :  { %v776_v33 = vpop.permute.xlu0 %775 }
 0x7ac   :  { %v778_v34 = vadd.f32 %v776_v33, %v768_v4 }
 0x7ae   :  { %3417 = vtanh.f32 %v778_v34 }
 0x7b4   :  { %v3418_v38 = vpop.eup %3417 }
 0x7b5   :  { %781 = vrot.lane.b32.xlu2 %v3418_v38, %s3614_s15 }
 0x80f   :  { %v782_v39 = vpop.permute.xlu2 %781 }
 0x810   :  { %v784_v42 = vmul.f32 %v782_v39, %v767_v12 }
 0x812   :  { %786 = vrot.lane.b32.xlu0 %v784_v42, %s3615_s26 }
 0x884   :  { %v787_v44 = vpop.permute.xlu0 %786 }
 0x885   :  { %789 = vst.msk [vmem:[#allocation3] sm:$0xff] %vm721_vm0, %v787_v44  ;;  %3268 = vmatmul.msk.f32.vlgmr.msra.gmra.mxu0 %vm721_vm0, %v787_v44 }
 0x886   :  { %1009 = vmatpush.msra.mxu0 %v3940_v50 }
 0x888   :  { %1010 = vmatpush.msra.mxu0 %v3945_v51 }
 0x88a   :  { %1011 = vmatpush.msra.mxu0 %v3952_v47 }
 0x88c   :  { %v4107_v45 = vld [vmem:[#allocation3] sm:$0xff]  ;;  %1012 = vmatpush.msra.mxu0 %v3960_v52 }
 0x88d   :  { %1827 = vst.msk [vmem:[#allocation4] sm:$0xff] %vm1826_vm1, %v4107_v45 }
 0x902   :  { %v810_v48 = vpop.f32.mrf.mxu0 }
 0x903   :  { %v813_v49 = vadd.f32 %v810_v48, %v676_v16 }
 0x905   :  { %v3269_v3 = vmul.f32 -1.442695, %v813_v49 }
 0x907   :  { %3419 = vpow2.f32 %v3269_v3 }
 0x90d   :  { %v3420_v31 = vpop.eup %3419 }
 0x90e   :  { %v817_v23 = vadd.f32 1.0, %v3420_v31 }
 0x910   :  { %3421 = vrcp.f32 %v817_v23  ;;  %v829_v55 = vand.u32 2147483648, %v817_v23  ;;  %v827_v57 = vand.u32 2147483647, %v817_v23  ;;  %vm823_vm3 = vweird.f32 %v817_v23 }
 0x912   :  { %v830_v59 = vor.u32 1.1754944e-38, %v829_v55  ;;  %vm828_vm5 = vcmp.eq.f32.partialorder %v827_v57, 8.507059e+37 }
 0x916   :  { %v3422_v32 = vpop.eup %3421 }
 0x917   :  { %v819_v53 = vmul.f32 %v3422_v32, %v817_v23  ;;  %vm824_vm2 = vweird.f32 %v3422_v32 }
 0x918   :  { %vm825_vm4 = vmor %vm823_vm3, %vm824_vm2 }
 0x919   :  { %v820_v54 = vsub.f32 1.0, %v819_v53 }
 0x91b   :  { %v821_v56 = vmul.f32 %v3422_v32, %v820_v54 }
 0x91d   :  { %v822_v58 = vadd.f32 %v3422_v32, %v821_v56 }
 0x91f   :  { %v826_v60 = vsel %vm825_vm4, %v3422_v32, %v822_v58 }
 0x920   :  { %v831_v6 = vsel %vm828_vm5, %v830_v59, %v826_v60 }
 0x921   :  { %v833_v12 = vmul.f32 2.0, %v831_v6 }
 0x923   :  { %v3270_v9 = vadd.f32 -1.0, %v833_v12 }
 0x925   :  { %v835_v24 = vsel %vm4092_vm15, %v3270_v9, %v831_v6 }
 0x926   :  { %838 = vrot.lane.b32.xlu1 %v835_v24, %s3614_s15  ;;  %v836_v38 = vmul.f32 %v835_v24, %v778_v34 }
 0x998   :  { %v839_v4 = vpop.permute.xlu1 %838 }
 0x999   :  { %v841_v33 = vmul.f32 %v839_v4, %v835_v24 }
 0x99b   :  { %843 = vrot.lane.b32.xlu0 %v841_v33, %s3615_s26 }
 0xa0d   :  { %v844_v39 = vpop.permute.xlu0 %843 }
 0xa0e   :  { %v846_v42 = vadd.f32 %v844_v39, %v836_v38 }
 0xa10   :  { %3423 = vtanh.f32 %v846_v42 }
 0xa16   :  { %v3424_v44 = vpop.eup %3423 }
 0xa17   :  { %849 = vrot.lane.b32.xlu1 %v3424_v44, %s3614_s15 }
 0xa89   :  { %v850_v16 = vpop.permute.xlu1 %849 }
 0xa8a   :  { %v852_v48 = vmul.f32 %v850_v16, %v835_v24 }
 0xa8c   :  { %854 = vrot.lane.b32.xlu0 %v852_v48, %s3615_s26 }
 0xafe   :  { %v855_v49 = vpop.permute.xlu0 %854 }
 0xaff   :  { %857 = vst.msk [vmem:[#allocation3 + $0x8] sm:$0xff] %vm721_vm0, %v855_v49  ;;  %3271 = vmatmul.msk.f32.vlgmr.msrb.gmra.mxu0 %vm721_vm0, %v855_v49 }
 0xb00   :  { %1213 = vmatpush.msrb.mxu0 %v3940_v50 }
 0xb02   :  { %1214 = vmatpush.msrb.mxu0 %v3945_v51 }
 0xb04   :  { %1215 = vmatpush.msrb.mxu0 %v3952_v47 }
 0xb06   :  { %v4127_v34 = vld [vmem:[#allocation3 + $0x8] sm:$0xff]  ;;  %1216 = vmatpush.msrb.mxu0 %v3960_v52 }
 0xb07   :  { %1828 = vst.msk [vmem:[#allocation4 + $0x8] sm:$0xff] %vm1826_vm1, %v4127_v34 }
 0xb7c   :  { %v878_v3 = vpop.f32.mrf.mxu0 }
 0xb7d   :  { %v881_v31 = vadd.f32 %v878_v3, %v682_v36 }
 0xb7f   :  { %v3272_v23 = vmul.f32 -1.442695, %v881_v31 }
 0xb81   :  { %3425 = vpow2.f32 %v3272_v23 }
 0xb87   :  { %v3426_v32 = vpop.eup %3425 }
 0xb88   :  { %v885_v53 = vadd.f32 1.0, %v3426_v32 }
 0xb8a   :  { %3427 = vrcp.f32 %v885_v53  ;;  %v897_v57 = vand.u32 2147483648, %v885_v53  ;;  %v895_v59 = vand.u32 2147483647, %v885_v53  ;;  %vm891_vm7 = vweird.f32 %v885_v53 }
 0xb8c   :  { %v898_v6 = vor.u32 1.1754944e-38, %v897_v57  ;;  %vm896_vm10 = vcmp.eq.f32.partialorder %v895_v59, 8.507059e+37 }
 0xb90   :  { %v3428_v54 = vpop.eup %3427 }
 0xb91   :  { %v887_v55 = vmul.f32 %v3428_v54, %v885_v53  ;;  %vm892_vm6 = vweird.f32 %v3428_v54 }
 0xb92   :  { %vm893_vm9 = vmor %vm891_vm7, %vm892_vm6 }
 0xb93   :  { %v888_v56 = vsub.f32 1.0, %v887_v55 }
 0xb95   :  { %v889_v58 = vmul.f32 %v3428_v54, %v888_v56 }
 0xb97   :  { %v890_v60 = vadd.f32 %v3428_v54, %v889_v58 }
 0xb99   :  { %v894_v12 = vsel %vm893_vm9, %v3428_v54, %v890_v60 }
 0xb9a   :  { %v899_v9 = vsel %vm896_vm10, %v898_v6, %v894_v12 }
 0xb9b   :  { %v901_v36 = vmul.f32 2.0, %v899_v9 }
 0xb9d   :  { %v3273_v24 = vadd.f32 -1.0, %v901_v36 }
 0xb9f   :  { %v903_v4 = vsel %vm4092_vm15, %v3273_v24, %v899_v9 }
 0xba0   :  { %906 = vrot.lane.b32.xlu1 %v903_v4, %s3614_s15  ;;  %v904_v39 = vmul.f32 %v903_v4, %v846_v42 }
 0xc12   :  { %v907_v33 = vpop.permute.xlu1 %906 }
 0xc13   :  { %v909_v38 = vmul.f32 %v907_v33, %v903_v4 }
 0xc15   :  { %911 = vrot.lane.b32.xlu0 %v909_v38, %s3615_s26 }
 0xc87   :  { %v912_v44 = vpop.permute.xlu0 %911 }
 0xc88   :  { %v914_v16 = vadd.f32 %v912_v44, %v904_v39 }
 0xc8a   :  { %3429 = vtanh.f32 %v914_v16 }
 0xc90   :  { %v3430_v48 = vpop.eup %3429 }
 0xc91   :  { %917 = vrot.lane.b32.xlu1 %v3430_v48, %s3614_s15 }
 0xd03   :  { %v918_v49 = vpop.permute.xlu1 %917 }
 0xd04   :  { %v920_v3 = vmul.f32 %v918_v49, %v903_v4 }
 0xd06   :  { %922 = vrot.lane.b32.xlu0 %v920_v3, %s3615_s26 }
 0xd78   :  { %v923_v31 = vpop.permute.xlu0 %922 }
 0xd79   :  { %925 = vst.msk [vmem:[#allocation3 + $0x10] sm:$0xff] %vm721_vm0, %v923_v31  ;;  %3274 = vmatmul.msk.f32.vlgmr.msra.gmra.mxu2 %vm721_vm0, %v923_v31 }
 0xd7a   :  { %1349 = vmatpush.msra.mxu2 %v3940_v50 }
 0xd7c   :  { %1350 = vmatpush.msra.mxu2 %v3945_v51 }
 0xd7e   :  { %1351 = vmatpush.msra.mxu2 %v3952_v47 }
 0xd80   :  { %v4148_v42 = vld [vmem:[#allocation3 + $0x10] sm:$0xff]  ;;  %1352 = vmatpush.msra.mxu2 %v3960_v52 }
 0xd81   :  { %1829 = vst.msk [vmem:[#allocation4 + $0x10] sm:$0xff] %vm1826_vm1, %v4148_v42 }
 0xdfc   :  { %v946_v23 = vpop.f32.mrf.mxu2 }
 0xdfd   :  { %v949_v32 = vadd.f32 %v946_v23, %v688_v30 }
 0xdff   :  { %v3275_v53 = vmul.f32 -1.442695, %v949_v32 }
 0xe01   :  { %3431 = vpow2.f32 %v3275_v53 }
 0xe07   :  { %v3432_v54 = vpop.eup %3431 }
 0xe08   :  { %v953_v55 = vadd.f32 1.0, %v3432_v54 }
 0xe0a   :  { %3433 = vrcp.f32 %v953_v55  ;;  %v965_v59 = vand.u32 2147483648, %v953_v55  ;;  %v963_v6 = vand.u32 2147483647, %v953_v55  ;;  %vm959_vm12 = vweird.f32 %v953_v55 }
 0xe0c   :  { %v966_v9 = vor.u32 1.1754944e-38, %v965_v59  ;;  %vm964_vm14 = vcmp.eq.f32.partialorder %v963_v6, 8.507059e+37 }
 0xe10   :  { %v3434_v56 = vpop.eup %3433 }
 0xe11   :  { %v955_v57 = vmul.f32 %v3434_v56, %v953_v55  ;;  %vm960_vm11 = vweird.f32 %v3434_v56 }
 0xe12   :  { %vm961_vm13 = vmor %vm959_vm12, %vm960_vm11 }
 0xe13   :  { %v956_v58 = vsub.f32 1.0, %v955_v57 }
 0xe15   :  { %v957_v60 = vmul.f32 %v3434_v56, %v956_v58 }
 0xe17   :  { %v958_v12 = vadd.f32 %v3434_v56, %v957_v60 }
 0xe19   :  { %v962_v36 = vsel %vm961_vm13, %v3434_v56, %v958_v12 }
 0xe1a   :  { %v967_v24 = vsel %vm964_vm14, %v966_v9, %v962_v36 }
 0xe1b   :  { %v969_v30 = vmul.f32 2.0, %v967_v24 }
 0xe1d   :  { %v3276_v4 = vadd.f32 -1.0, %v969_v30 }
 0xe1f   :  { %v971_v33 = vsel %vm4092_vm15, %v3276_v4, %v967_v24 }
 0xe20   :  { %974 = vrot.lane.b32.xlu1 %v971_v33, %s3614_s15  ;;  %v972_v44 = vmul.f32 %v971_v33, %v914_v16 }
 0xe92   :  { %v975_v38 = vpop.permute.xlu1 %974 }
 0xe93   :  { %v977_v39 = vmul.f32 %v975_v38, %v971_v33 }
 0xe95   :  { %979 = vrot.lane.b32.xlu0 %v977_v39, %s3615_s26 }
 0xf07   :  { %v980_v48 = vpop.permute.xlu0 %979 }
 0xf08   :  { %v982_v49 = vadd.f32 %v980_v48, %v972_v44 }
 0xf0a   :  { %3435 = vtanh.f32 %v982_v49 }
 0xf10   :  { %v3436_v3 = vpop.eup %3435 }
 0xf11   :  { %985 = vrot.lane.b32.xlu1 %v3436_v3, %s3614_s15 }
 0xf83   :  { %v986_v31 = vpop.permute.xlu1 %985 }
 0xf84   :  { %v988_v23 = vmul.f32 %v986_v31, %v971_v33 }
 0xf86   :  { %990 = vrot.lane.b32.xlu0 %v988_v23, %s3615_s26 }
 0xff8   :  { %v991_v32 = vpop.permute.xlu0 %990 }
 0xff9   :  { %993 = vst.msk [vmem:[#allocation3 + $0x18] sm:$0xff] %vm721_vm0, %v991_v32  ;;  %3277 = vmatmul.msk.f32.vlgmr.msra.gmra.mxu0 %vm721_vm0, %v991_v32 }
 0xffa   :  { %1417 = vmatpush.msra.mxu0 %v3940_v50 }
 0xffc   :  { %1418 = vmatpush.msra.mxu0 %v3945_v51 }
 0xffe   :  { %1419 = vmatpush.msra.mxu0 %v3952_v47 }
0x1000   :  { %v4169_v16 = vld [vmem:[#allocation3 + $0x18] sm:$0xff]  ;;  %1420 = vmatpush.msra.mxu0 %v3960_v52 }
0x1001   :  { %1830 = vst.msk [vmem:[#allocation4 + $0x18] sm:$0xff] %vm1826_vm1, %v4169_v16 }
0x1076   :  { %v1014_v53 = vpop.f32.mrf.mxu0 }
0x1077   :  { %v1017_v54 = vadd.f32 %v1014_v53, %v694_v22 }
0x1079   :  { %v3278_v55 = vmul.f32 -1.442695, %v1017_v54 }
0x107b   :  { %3437 = vpow2.f32 %v3278_v55 }
0x1081   :  { %v3438_v56 = vpop.eup %3437 }
0x1082   :  { %v1021_v57 = vadd.f32 1.0, %v3438_v56 }
0x1084   :  { %3439 = vrcp.f32 %v1021_v57  ;;  %v1033_v6 = vand.u32 2147483648, %v1021_v57  ;;  %v1031_v9 = vand.u32 2147483647, %v1021_v57  ;;  %vm1027_vm3 = vweird.f32 %v1021_v57 }
0x1086   :  { %v1034_v24 = vor.u32 1.1754944e-38, %v1033_v6  ;;  %vm1032_vm5 = vcmp.eq.f32.partialorder %v1031_v9, 8.507059e+37 }
0x108a   :  { %v3440_v58 = vpop.eup %3439 }
0x108b   :  { %v1023_v59 = vmul.f32 %v3440_v58, %v1021_v57  ;;  %vm1028_vm2 = vweird.f32 %v3440_v58 }
0x108c   :  { %vm1029_vm4 = vmor %vm1027_vm3, %vm1028_vm2 }
0x108d   :  { %v1024_v60 = vsub.f32 1.0, %v1023_v59 }
0x108f   :  { %v1025_v12 = vmul.f32 %v3440_v58, %v1024_v60 }
0x1091   :  { %v1026_v36 = vadd.f32 %v3440_v58, %v1025_v12 }
0x1093   :  { %v1030_v30 = vsel %vm1029_vm4, %v3440_v58, %v1026_v36 }
0x1094   :  { %v1035_v4 = vsel %vm1032_vm5, %v1034_v24, %v1030_v30 }
0x1095   :  { %v1037_v22 = vmul.f32 2.0, %v1035_v4 }
0x1097   :  { %v3279_v33 = vadd.f32 -1.0, %v1037_v22 }
0x1099   :  { %v1039_v38 = vsel %vm4092_vm15, %v3279_v33, %v1035_v4 }
0x109a   :  { %1042 = vrot.lane.b32.xlu1 %v1039_v38, %s3614_s15  ;;  %v1040_v48 = vmul.f32 %v1039_v38, %v982_v49 }
0x110c   :  { %v1043_v39 = vpop.permute.xlu1 %1042 }
0x110d   :  { %v1045_v44 = vmul.f32 %v1043_v39, %v1039_v38 }
0x110f   :  { %1047 = vrot.lane.b32.xlu0 %v1045_v44, %s3615_s26 }
0x1181   :  { %v1048_v3 = vpop.permute.xlu0 %1047 }
0x1182   :  { %v1050_v31 = vadd.f32 %v1048_v3, %v1040_v48 }
0x1184   :  { %3441 = vtanh.f32 %v1050_v31 }
0x118a   :  { %v3442_v23 = vpop.eup %3441 }
0x118b   :  { %1053 = vrot.lane.b32.xlu1 %v3442_v23, %s3614_s15 }
0x11fd   :  { %v1054_v32 = vpop.permute.xlu1 %1053 }
0x11fe   :  { %v1056_v53 = vmul.f32 %v1054_v32, %v1039_v38 }
0x1200   :  { %1058 = vrot.lane.b32.xlu0 %v1056_v53, %s3615_s26 }
0x1272   :  { %v1059_v54 = vpop.permute.xlu0 %1058 }
0x1273   :  { %1061 = vst.msk [vmem:[#allocation3 + $0x20] sm:$0xff] %vm721_vm0, %v1059_v54  ;;  %3280 = vmatmul.msk.f32.vlgmr.msrb.gmra.mxu1 %vm721_vm0, %v1059_v54 }
0x1274   :  { %1485 = vmatpush.msrb.mxu1 %v3940_v50 }
0x1276   :  { %1486 = vmatpush.msrb.mxu1 %v3945_v51 }
0x1278   :  { %1487 = vmatpush.msrb.mxu1 %v3952_v47 }
0x127a   :  { %v4190_v49 = vld [vmem:[#allocation3 + $0x20] sm:$0xff]  ;;  %1488 = vmatpush.msrb.mxu1 %v3960_v52 }
0x127b   :  { %1831 = vst.msk [vmem:[#allocation4 + $0x20] sm:$0xff] %vm1826_vm1, %v4190_v49 }
0x12f0   :  { %v1082_v55 = vpop.f32.mrf.mxu1 }
0x12f1   :  { %v1085_v56 = vadd.f32 %v1082_v55, %v700_v18 }
0x12f3   :  { %v3281_v57 = vmul.f32 -1.442695, %v1085_v56 }
0x12f5   :  { %3443 = vpow2.f32 %v3281_v57 }
0x12fb   :  { %v3444_v58 = vpop.eup %3443 }
0x12fc   :  { %v1089_v59 = vadd.f32 1.0, %v3444_v58 }
0x12fe   :  { %3445 = vrcp.f32 %v1089_v59  ;;  %v1101_v9 = vand.u32 2147483648, %v1089_v59  ;;  %v1099_v24 = vand.u32 2147483647, %v1089_v59  ;;  %vm1095_vm7 = vweird.f32 %v1089_v59 }
0x1300   :  { %v1102_v4 = vor.u32 1.1754944e-38, %v1101_v9  ;;  %vm1100_vm10 = vcmp.eq.f32.partialorder %v1099_v24, 8.507059e+37 }
0x1304   :  { %v3446_v60 = vpop.eup %3445 }
0x1305   :  { %v1091_v6 = vmul.f32 %v3446_v60, %v1089_v59  ;;  %vm1096_vm6 = vweird.f32 %v3446_v60 }
0x1306   :  { %vm1097_vm9 = vmor %vm1095_vm7, %vm1096_vm6 }
0x1307   :  { %v1092_v12 = vsub.f32 1.0, %v1091_v6 }
0x1309   :  { %v1093_v36 = vmul.f32 %v3446_v60, %v1092_v12 }
0x130b   :  { %v1094_v30 = vadd.f32 %v3446_v60, %v1093_v36 }
0x130d   :  { %v1098_v22 = vsel %vm1097_vm9, %v3446_v60, %v1094_v30 }
0x130e   :  { %v1103_v33 = vsel %vm1100_vm10, %v1102_v4, %v1098_v22 }
0x130f   :  { %v1105_v18 = vmul.f32 2.0, %v1103_v33 }
0x1311   :  { %v3282_v38 = vadd.f32 -1.0, %v1105_v18 }
0x1313   :  { %v1107_v39 = vsel %vm4092_vm15, %v3282_v38, %v1103_v33 }
0x1314   :  { %1110 = vrot.lane.b32.xlu1 %v1107_v39, %s3614_s15  ;;  %v1108_v3 = vmul.f32 %v1107_v39, %v1050_v31 }
0x1386   :  { %v1111_v44 = vpop.permute.xlu1 %1110 }
0x1387   :  { %v1113_v48 = vmul.f32 %v1111_v44, %v1107_v39 }
0x1389   :  { %1115 = vrot.lane.b32.xlu0 %v1113_v48, %s3615_s26 }
0x13fb   :  { %v1116_v23 = vpop.permute.xlu0 %1115 }
0x13fc   :  { %v1118_v32 = vadd.f32 %v1116_v23, %v1108_v3 }
0x13fe   :  { %3447 = vtanh.f32 %v1118_v32 }
0x1404   :  { %v3448_v53 = vpop.eup %3447 }
0x1405   :  { %1121 = vrot.lane.b32.xlu1 %v3448_v53, %s3614_s15 }
0x1477   :  { %v1122_v54 = vpop.permute.xlu1 %1121 }
0x1478   :  { %v1124_v55 = vmul.f32 %v1122_v54, %v1107_v39 }
0x147a   :  { %1126 = vrot.lane.b32.xlu0 %v1124_v55, %s3615_s26 }
0x14ec   :  { %v1127_v56 = vpop.permute.xlu0 %1126 }
0x14ed   :  { %1129 = vst.msk [vmem:[#allocation3 + $0x28] sm:$0xff] %vm721_vm0, %v1127_v56  ;;  %3283 = vmatmul.msk.f32.vlgmr.msrb.gmra.mxu2 %vm721_vm0, %v1127_v56 }
0x14ee   :  { %1553 = vmatpush.msrb.mxu2 %v3940_v50 }
0x14f0   :  { %1554 = vmatpush.msrb.mxu2 %v3945_v51 }
0x14f2   :  { %1555 = vmatpush.msrb.mxu2 %v3952_v47 }
0x14f4   :  { %v4211_v31 = vld [vmem:[#allocation3 + $0x28] sm:$0xff]  ;;  %1556 = vmatpush.msrb.mxu2 %v3960_v52 }
0x14f5   :  { %1832 = vst.msk [vmem:[#allocation4 + $0x28] sm:$0xff] %vm1826_vm1, %v4211_v31 }
0x1570   :  { %v1150_v57 = vpop.f32.mrf.mxu2 }
0x1571   :  { %v1153_v58 = vadd.f32 %v1150_v57, %v706_v10 }
0x1573   :  { %v3284_v59 = vmul.f32 -1.442695, %v1153_v58 }
0x1575   :  { %3449 = vpow2.f32 %v3284_v59 }
0x157b   :  { %v3450_v60 = vpop.eup %3449 }
0x157c   :  { %v1157_v6 = vadd.f32 1.0, %v3450_v60 }
0x157e   :  { %3451 = vrcp.f32 %v1157_v6  ;;  %v1169_v24 = vand.u32 2147483648, %v1157_v6  ;;  %v1167_v4 = vand.u32 2147483647, %v1157_v6  ;;  %vm1163_vm12 = vweird.f32 %v1157_v6 }
0x1580   :  { %v1170_v33 = vor.u32 1.1754944e-38, %v1169_v24  ;;  %vm1168_vm14 = vcmp.eq.f32.partialorder %v1167_v4, 8.507059e+37 }
0x1584   :  { %v3452_v12 = vpop.eup %3451 }
0x1585   :  { %v1159_v9 = vmul.f32 %v3452_v12, %v1157_v6  ;;  %vm1164_vm11 = vweird.f32 %v3452_v12 }
0x1586   :  { %vm1165_vm13 = vmor %vm1163_vm12, %vm1164_vm11  ;;  %vm1844_vm11 = vcmask 261248  }
0x1587   :  { %v1160_v36 = vsub.f32 1.0, %v1159_v9 }
0x1589   :  { %v1161_v30 = vmul.f32 %v3452_v12, %v1160_v36 }
0x158b   :  { %v1162_v22 = vadd.f32 %v3452_v12, %v1161_v30 }
0x158d   :  { %v1166_v18 = vsel %vm1165_vm13, %v3452_v12, %v1162_v22 }
0x158e   :  { %v1171_v38 = vsel %vm1168_vm14, %v1170_v33, %v1166_v18 }
0x158f   :  { %v1173_v10 = vmul.f32 2.0, %v1171_v38 }
0x1591   :  { %v3285_v39 = vadd.f32 -1.0, %v1173_v10 }
0x1593   :  { %v1175_v44 = vsel %vm4092_vm15, %v3285_v39, %v1171_v38 }
0x1594   :  { %1178 = vrot.lane.b32.xlu1 %v1175_v44, %s3614_s15  ;;  %v1176_v23 = vmul.f32 %v1175_v44, %v1118_v32 }
0x1606   :  { %v1179_v48 = vpop.permute.xlu1 %1178 }
0x1607   :  { %v1181_v3 = vmul.f32 %v1179_v48, %v1175_v44 }
0x1609   :  { %1183 = vrot.lane.b32.xlu0 %v1181_v3, %s3615_s26 }
0x167b   :  { %v1184_v53 = vpop.permute.xlu0 %1183 }
0x167c   :  { %v1186_v54 = vadd.f32 %v1184_v53, %v1176_v23 }
0x167e   :  { %3453 = vtanh.f32 %v1186_v54 }
0x1684   :  { %v3454_v55 = vpop.eup %3453 }
0x1685   :  { %1189 = vrot.lane.b32.xlu1 %v3454_v55, %s3614_s15 }
0x16f7   :  { %v1190_v56 = vpop.permute.xlu1 %1189 }
0x16f8   :  { %v1192_v57 = vmul.f32 %v1190_v56, %v1175_v44 }
0x16fa   :  { %1194 = vrot.lane.b32.xlu0 %v1192_v57, %s3615_s26 }
0x176c   :  { %v1195_v58 = vpop.permute.xlu0 %1194 }
0x176d   :  { %1197 = vst.msk [vmem:[#allocation3 + $0x30] sm:$0xff] %vm721_vm0, %v1195_v58  ;;  %3286 = vmatmul.msk.f32.vlgmr.msrb.gmra.mxu0 %vm721_vm0, %v1195_v58 }
0x176e   :  { %1621 = vmatpush.msrb.mxu0 %v3940_v50 }
0x1770   :  { %1622 = vmatpush.msrb.mxu0 %v3945_v51 }
0x1772   :  { %1623 = vmatpush.msrb.mxu0 %v3952_v47 }
0x1774   :  { %v4232_v32 = vld [vmem:[#allocation3 + $0x30] sm:$0xff]  ;;  %1624 = vmatpush.msrb.mxu0 %v3960_v52 }
0x1775   :  { %1833 = vst.msk [vmem:[#allocation4 + $0x30] sm:$0xff] %vm1826_vm1, %v4232_v32 }
0x17ea   :  { %v1218_v59 = vpop.f32.mrf.mxu0 }
0x17eb   :  { %v1221_v60 = vadd.f32 %v1218_v59, %v712_v1 }
0x17ed   :  { %v3287_v6 = vmul.f32 -1.442695, %v1221_v60 }
0x17ef   :  { %3455 = vpow2.f32 %v3287_v6 }
0x17f5   :  { %v3456_v12 = vpop.eup %3455 }
0x17f6   :  { %v1225_v9 = vadd.f32 1.0, %v3456_v12 }
0x17f8   :  { %3457 = vrcp.f32 %v1225_v9  ;;  %v1237_v4 = vand.u32 2147483648, %v1225_v9  ;;  %v1235_v33 = vand.u32 2147483647, %v1225_v9  ;;  %vm1231_vm3 = vweird.f32 %v1225_v9 }
0x17fa   :  { %v1238_v38 = vor.u32 1.1754944e-38, %v1237_v4  ;;  %vm1236_vm5 = vcmp.eq.f32.partialorder %v1235_v33, 8.507059e+37 }
0x17fe   :  { %v3458_v36 = vpop.eup %3457 }
0x17ff   :  { %v1227_v24 = vmul.f32 %v3458_v36, %v1225_v9  ;;  %vm1232_vm2 = vweird.f32 %v3458_v36 }
0x1800   :  { %vm1233_vm4 = vmor %vm1231_vm3, %vm1232_vm2 }
0x1801   :  { %v1228_v30 = vsub.f32 1.0, %v1227_v24 }
0x1803   :  { %v1229_v22 = vmul.f32 %v3458_v36, %v1228_v30 }
0x1805   :  { %v1230_v18 = vadd.f32 %v3458_v36, %v1229_v22 }
0x1807   :  { %v1234_v10 = vsel %vm1233_vm4, %v3458_v36, %v1230_v18 }
0x1808   :  { %v1239_v39 = vsel %vm1236_vm5, %v1238_v38, %v1234_v10 }
0x1809   :  { %v1241_v1 = vmul.f32 2.0, %v1239_v39 }
0x180b   :  { %v3288_v44 = vadd.f32 -1.0, %v1241_v1 }
0x180d   :  { %v1243_v48 = vsel %vm4092_vm15, %v3288_v44, %v1239_v39 }
0x180e   :  { %1246 = vrot.lane.b32.xlu1 %v1243_v48, %s3614_s15  ;;  %v1244_v53 = vmul.f32 %v1243_v48, %v1186_v54 }
0x1880   :  { %v1247_v3 = vpop.permute.xlu1 %1246 }
0x1881   :  { %v1249_v23 = vmul.f32 %v1247_v3, %v1243_v48 }
0x1883   :  { %1251 = vrot.lane.b32.xlu0 %v1249_v23, %s3615_s26 }
0x18f5   :  { %v1252_v55 = vpop.permute.xlu0 %1251 }
0x18f6   :  { %v1254_v56 = vadd.f32 %v1252_v55, %v1244_v53 }
0x18f8   :  { %3459 = vtanh.f32 %v1254_v56 }
0x18fe   :  { %v3460_v57 = vpop.eup %3459 }
0x18ff   :  { %1257 = vrot.lane.b32.xlu1 %v3460_v57, %s3614_s15 }
0x1971   :  { %v1258_v58 = vpop.permute.xlu1 %1257 }
0x1972   :  { %v1260_v59 = vmul.f32 %v1258_v58, %v1243_v48 }
0x1974   :  { %1262 = vrot.lane.b32.xlu0 %v1260_v59, %s3615_s26 }
0x19e6   :  { %v1263_v60 = vpop.permute.xlu0 %1262 }
0x19e7   :  { %1265 = vst.msk [vmem:[#allocation3 + $0x38] sm:$0xff] %vm721_vm0, %v1263_v60  ;;  %3289 = vmatmul.msk.f32.vlgmr.msra.gmra.mxu1 %vm721_vm0, %v1263_v60 }
0x19e8   :  { %1689 = vmatpush.msra.mxu1 %v3940_v50 }
0x19ea   :  { %1690 = vmatpush.msra.mxu1 %v3945_v51 }
0x19ec   :  { %1691 = vmatpush.msra.mxu1 %v3952_v47 }
0x19ee   :  { %v1817_v54 = vld [vmem:[#allocation3 + $0x38] sm:$0xff]  ;;  %1692 = vmatpush.msra.mxu1 %v3960_v52 }
0x19ef   :  { %1834 = vst.msk [vmem:[#allocation4 + $0x38] sm:$0xff] %vm1826_vm1, %v1817_v54 }
0x1a64   :  { %v1286_v6 = vpop.f32.mrf.mxu1 }
0x1a65   :  { %v1289_v12 = vadd.f32 %v1286_v6, %v714_v2 }
0x1a67   :  { %v3290_v9 = vmul.f32 -1.442695, %v1289_v12 }
0x1a69   :  { %3461 = vpow2.f32 %v3290_v9 }
0x1a6f   :  { %v3462_v36 = vpop.eup %3461 }
0x1a70   :  { %v1293_v24 = vadd.f32 1.0, %v3462_v36 }
0x1a72   :  { %3463 = vrcp.f32 %v1293_v24  ;;  %v1305_v33 = vand.u32 2147483648, %v1293_v24  ;;  %v1303_v38 = vand.u32 2147483647, %v1293_v24  ;;  %vm1299_vm7 = vweird.f32 %v1293_v24 }
0x1a74   :  { %v1306_v39 = vor.u32 1.1754944e-38, %v1305_v33  ;;  %vm1304_vm10 = vcmp.eq.f32.partialorder %v1303_v38, 8.507059e+37 }
0x1a78   :  { %v3464_v30 = vpop.eup %3463 }
0x1a79   :  { %v1295_v4 = vmul.f32 %v3464_v30, %v1293_v24  ;;  %vm1300_vm6 = vweird.f32 %v3464_v30 }
0x1a7a   :  { %vm1301_vm9 = vmor %vm1299_vm7, %vm1300_vm6 }
0x1a7b   :  { %v1296_v22 = vsub.f32 1.0, %v1295_v4 }
0x1a7d   :  { %v1297_v18 = vmul.f32 %v3464_v30, %v1296_v22 }
0x1a7f   :  { %v1298_v10 = vadd.f32 %v3464_v30, %v1297_v18 }
0x1a81   :  { %v1302_v1 = vsel %vm1301_vm9, %v3464_v30, %v1298_v10 }
0x1a82   :  { %v1307_v63 = vsel %vm1304_vm10, %v1306_v39, %v1302_v1 }
0x1a83   :  { %v1309_v0 = vmul.f32 2.0, %v1307_v63 }
0x1a85   :  { %v3291_v2 = vadd.f32 -1.0, %v1309_v0 }
0x1a87   :  { %v1311_v44 = vsel %vm4092_vm15, %v3291_v2, %v1307_v63 }
0x1a88   :  { %1314 = vrot.lane.b32.xlu1 %v1311_v44, %s3614_s15  ;;  %v1312_v23 = vmul.f32 %v1311_v44, %v1254_v56 }
0x1afa   :  { %v1315_v48 = vpop.permute.xlu1 %1314 }
0x1afb   :  { %v1317_v3 = vmul.f32 %v1315_v48, %v1311_v44 }
0x1afd   :  { %1319 = vrot.lane.b32.xlu0 %v1317_v3, %s3615_s26 }
0x1b6f   :  { %v1320_v53 = vpop.permute.xlu0 %1319 }
0x1b70   :  { %v1322_v55 = vadd.f32 %v1320_v53, %v1312_v23 }
0x1b72   :  { %3465 = vtanh.f32 %v1322_v55 }
0x1b78   :  { %v3466_v57 = vpop.eup %3465 }
0x1b79   :  { %1325 = vrot.lane.b32.xlu1 %v3466_v57, %s3614_s15 }
0x1beb   :  { %v1326_v58 = vpop.permute.xlu1 %1325 }
0x1bec   :  { %v1328_v59 = vmul.f32 %v1326_v58, %v1311_v44 }
0x1bee   :  { %1330 = vrot.lane.b32.xlu0 %v1328_v59, %s3615_s26 }
0x1c60   :  { %v1331_v60 = vpop.permute.xlu0 %1330 }
0x1c61   :  { %1333 = vst.msk [vmem:[#allocation3 + $0x40] sm:$0xff] %vm721_vm0, %v1331_v60  ;;  %3292 = vmatmul.msk.f32.vlgmr.msra.gmra.mxu2 %vm721_vm0, %v1331_v60 }
0x1c62   :  { %1757 = vmatpush.msra.mxu2 %v3940_v50 }
0x1c64   :  { %1758 = vmatpush.msra.mxu2 %v3945_v51 }
0x1c66   :  { %1759 = vmatpush.msra.mxu2 %v3952_v47 }
0x1c68   :  { %v1818_v56 = vld [vmem:[#allocation3 + $0x40] sm:$0xff]  ;;  %1760 = vmatpush.msra.mxu2 %v3960_v52 }
0x1c69   :  { %1835 = vst.msk [vmem:[#allocation4 + $0x40] sm:$0xff] %vm1826_vm1, %v1818_v56 }
0x1c6a   :  { %1859 = vst.msk [vmem:[#allocation4 + $0x38] sm:$0xff] %vm1844_vm11, %v1818_v56 }
0x1c6b   :  { %1861 = vst.msk [vmem:[#allocation4 + $0x40] sm:$0xff] %vm1844_vm11, %v1817_v54 }
0x1ce4   :  { %v1354_v6 = vpop.f32.mrf.mxu2 }
0x1ce5   :  { %v1357_v50 = vadd.f32 %v1354_v6, %v708_v11 }
0x1ce7   :  { %v3293_v51 = vmul.f32 -1.442695, %v1357_v50 }
0x1ce9   :  { %3467 = vpow2.f32 %v3293_v51 }
0x1cef   :  { %v3468_v47 = vpop.eup %3467 }
0x1cf0   :  { %v1361_v12 = vadd.f32 1.0, %v3468_v47 }
0x1cf2   :  { %3469 = vrcp.f32 %v1361_v12  ;;  %v1373_v24 = vand.u32 2147483648, %v1361_v12  ;;  %v1371_v4 = vand.u32 2147483647, %v1361_v12  ;;  %vm1367_vm13 = vweird.f32 %v1361_v12 }
0x1cf4   :  { %v1374_v22 = vor.u32 1.1754944e-38, %v1373_v24  ;;  %vm1372_vm2 = vcmp.eq.f32.partialorder %v1371_v4, 8.507059e+37 }
0x1cf8   :  { %v3470_v9 = vpop.eup %3469 }
0x1cf9   :  { %v1363_v52 = vmul.f32 %v3470_v9, %v1361_v12  ;;  %vm1368_vm12 = vweird.f32 %v3470_v9 }
0x1cfa   :  { %vm1369_vm14 = vmor %vm1367_vm13, %vm1368_vm12 }
0x1cfb   :  { %v1364_v36 = vsub.f32 1.0, %v1363_v52 }
0x1cfd   :  { %v1365_v30 = vmul.f32 %v3470_v9, %v1364_v36 }
0x1cff   :  { %v1366_v54 = vadd.f32 %v3470_v9, %v1365_v30 }
0x1d01   :  { %v1370_v33 = vsel %vm1369_vm14, %v3470_v9, %v1366_v54 }
0x1d02   :  { %v1375_v7 = vsel %vm1372_vm2, %v1374_v22, %v1370_v33 }
0x1d03   :  { %v1377_v8 = vmul.f32 2.0, %v1375_v7 }
0x1d05   :  { %v3294_v11 = vadd.f32 -1.0, %v1377_v8 }
0x1d07   :  { %v1379_v18 = vsel %vm4092_vm15, %v3294_v11, %v1375_v7 }
0x1d08   :  { %1382 = vrot.lane.b32.xlu1 %v1379_v18, %s3614_s15  ;;  %v1380_v39 = vmul.f32 %v1379_v18, %v1322_v55 }
0x1d7a   :  { %v1383_v38 = vpop.permute.xlu1 %1382 }
0x1d7b   :  { %v1385_v10 = vmul.f32 %v1383_v38, %v1379_v18 }
0x1d7d   :  { %1387 = vrot.lane.b32.xlu0 %v1385_v10, %s3615_s26 }
0x1def   :  { %v1388_v1 = vpop.permute.xlu0 %1387 }
0x1df0   :  { %v1390_v63 = vadd.f32 %v1388_v1, %v1380_v39 }
0x1df2   :  { %3471 = vtanh.f32 %v1390_v63 }
0x1df8   :  { %v3472_v0 = vpop.eup %3471 }
0x1df9   :  { %1393 = vrot.lane.b32.xlu1 %v3472_v0, %s3614_s15 }
0x1e6b   :  { %v1394_v2 = vpop.permute.xlu1 %1393 }
0x1e6c   :  { %v1396_v44 = vmul.f32 %v1394_v2, %v1379_v18 }
0x1e6e   :  { %1398 = vrot.lane.b32.xlu0 %v1396_v44, %s3615_s26 }
0x1ee0   :  { %v1399_v48 = vpop.permute.xlu0 %1398 }
0x1ee1   :  { %1401 = vst.msk [vmem:[#allocation3 + $0x48] sm:$0xff] %vm721_vm0, %v1399_v48  ;;  %3295 = vmatmul.msk.f32.vlgmr.msra.gmra.mxu0 %vm721_vm0, %v1399_v48 }
0x1ee8   :  { %v1819_v3 = vld [vmem:[#allocation3 + $0x48] sm:$0xff] }
0x1ee9   :  { %1836 = vst.msk [vmem:[#allocation4 + $0x48] sm:$0xff] %vm1826_vm1, %v1819_v3 }
0x1eea   :  { %1857 = vst.msk [vmem:[#allocation4 + $0x30] sm:$0xff] %vm1844_vm11, %v1819_v3 }
0x1eeb   :  { %1863 = vst.msk [vmem:[#allocation4 + $0x48] sm:$0xff] %vm1844_vm11, %v4232_v32 }
0x1f5e   :  { %v1422_v23 = vpop.f32.mrf.mxu0 }
0x1f5f   :  { %v1425_v53 = vadd.f32 %v1422_v23, %v702_v19 }
0x1f61   :  { %v3296_v55 = vmul.f32 -1.442695, %v1425_v53 }
0x1f63   :  { %3473 = vpow2.f32 %v3296_v55 }
0x1f69   :  { %v3474_v57 = vpop.eup %3473 }
0x1f6a   :  { %v1429_v58 = vadd.f32 1.0, %v3474_v57 }
0x1f6c   :  { %3475 = vrcp.f32 %v1429_v58  ;;  %v1441_v6 = vand.u32 2147483648, %v1429_v58  ;;  %v1439_v51 = vand.u32 2147483647, %v1429_v58  ;;  %vm1435_vm4 = vweird.f32 %v1429_v58 }
0x1f6e   :  { %v1442_v47 = vor.u32 1.1754944e-38, %v1441_v6  ;;  %vm1440_vm6 = vcmp.eq.f32.partialorder %v1439_v51, 8.507059e+37  ;;  %v1895_v51 = vld [vmem:[%s4847_s16 + $0x18] sm:$0xff] }
0x1f6f   :  { %3380 = vmatpush.msrb.mxu3 %v1895_v51  ;;  %1960 = vmatpush.msra.mxu0 %v1895_v51 }
0x1f72   :  { %v3476_v59 = vpop.eup %3475 }
0x1f73   :  { %v1431_v60 = vmul.f32 %v3476_v59, %v1429_v58  ;;  %vm1436_vm3 = vweird.f32 %v3476_v59 }
0x1f74   :  { %vm1437_vm5 = vmor %vm1435_vm4, %vm1436_vm3 }
0x1f75   :  { %v1432_v56 = vsub.f32 1.0, %v1431_v60 }
0x1f77   :  { %v1433_v50 = vmul.f32 %v3476_v59, %v1432_v56 }
0x1f79   :  { %v1434_v32 = vadd.f32 %v3476_v59, %v1433_v50 }
0x1f7b   :  { %v1438_v12 = vsel %vm1437_vm5, %v3476_v59, %v1434_v32  ;;  %v1894_v32 = vld [vmem:[%s4847_s16 + $0x10] sm:$0xff] }
0x1f7c   :  { %v1443_v15 = vsel %vm1440_vm6, %v1442_v47, %v1438_v12  ;;  %v1893_v47 = vld [vmem:[%s4847_s16 + $0x8] sm:$0xff]  ;;  %3381 = vmatpush.msrb.mxu3 %v1894_v32  ;;  %1961 = vmatpush.msra.mxu0 %v1894_v32  ;;  %v1892_v12 = vld [vmem:[%s4847_s16] sm:$0xff] }
0x1f7d   :  { %v1445_v17 = vmul.f32 2.0, %v1443_v15 }
0x1f7e   :  { %3382 = vmatpush.msrb.mxu3 %v1893_v47  ;;  %1962 = vmatpush.msra.mxu0 %v1893_v47 }
0x1f7f   :  { %v3297_v19 = vadd.f32 -1.0, %v1445_v17 }
0x1f80   :  { %3383 = vmatpush.msrb.mxu3 %v1892_v12  ;;  %1963 = vmatpush.msra.mxu0 %v1892_v12 }
0x1f81   :  { %v1447_v9 = vsel %vm4092_vm15, %v3297_v19, %v1443_v15 }
0x1f82   :  { %1450 = vrot.lane.b32.xlu1 %v1447_v9, %s3614_s15  ;;  %v1448_v24 = vmul.f32 %v1447_v9, %v1390_v63 }
0x1ff4   :  { %v1451_v52 = vpop.permute.xlu1 %1450 }
0x1ff5   :  { %v1453_v36 = vmul.f32 %v1451_v52, %v1447_v9 }
0x1ff7   :  { %1455 = vrot.lane.b32.xlu0 %v1453_v36, %s3615_s26 }
0x2069   :  { %v1456_v30 = vpop.permute.xlu0 %1455 }
0x206a   :  { %v1458_v4 = vadd.f32 %v1456_v30, %v1448_v24 }
0x206c   :  { %3477 = vtanh.f32 %v1458_v4 }
0x2072   :  { %v3478_v54 = vpop.eup %3477 }
0x2073   :  { %1461 = vrot.lane.b32.xlu1 %v3478_v54, %s3614_s15 }
0x20e5   :  { %v1462_v22 = vpop.permute.xlu1 %1461 }
0x20e6   :  { %v1464_v33 = vmul.f32 %v1462_v22, %v1447_v9 }
0x20e8   :  { %1466 = vrot.lane.b32.xlu0 %v1464_v33, %s3615_s26 }
0x215a   :  { %v1467_v7 = vpop.permute.xlu0 %1466 }
0x215b   :  { %1469 = vst.msk [vmem:[#allocation3 + $0x50] sm:$0xff] %vm721_vm0, %v1467_v7  ;;  %3298 = vmatmul.msk.f32.vlgmr.msrb.gmra.mxu1 %vm721_vm0, %v1467_v7 }
0x2162   :  { %v1820_v8 = vld [vmem:[#allocation3 + $0x50] sm:$0xff] }
0x2163   :  { %1837 = vst.msk [vmem:[#allocation4 + $0x50] sm:$0xff] %vm1826_vm1, %v1820_v8 }
0x2164   :  { %1855 = vst.msk [vmem:[#allocation4 + $0x28] sm:$0xff] %vm1844_vm11, %v1820_v8 }
0x2165   :  { %1865 = vst.msk [vmem:[#allocation4 + $0x50] sm:$0xff] %vm1844_vm11, %v4211_v31 }
0x21d8   :  { %v1490_v11 = vpop.f32.mrf.mxu1 }
0x21d9   :  { %v1493_v18 = vadd.f32 %v1490_v11, %v696_v13 }
0x21db   :  { %v3299_v38 = vmul.f32 -1.442695, %v1493_v18 }
0x21dd   :  { %3479 = vpow2.f32 %v3299_v38 }
0x21e3   :  { %v3480_v10 = vpop.eup %3479 }
0x21e4   :  { %v1497_v39 = vadd.f32 1.0, %v3480_v10 }
0x21e6   :  { %3481 = vrcp.f32 %v1497_v39  ;;  %v1509_v2 = vand.u32 2147483648, %v1497_v39  ;;  %v1507_v48 = vand.u32 2147483647, %v1497_v39  ;;  %vm1503_vm9 = vweird.f32 %v1497_v39 }
0x21e8   :  { %v1510_v3 = vor.u32 1.1754944e-38, %v1509_v2  ;;  %vm1508_vm12 = vcmp.eq.f32.partialorder %v1507_v48, 8.507059e+37 }
0x21ec   :  { %v3482_v1 = vpop.eup %3481 }
0x21ed   :  { %v1499_v63 = vmul.f32 %v3482_v1, %v1497_v39  ;;  %vm1504_vm7 = vweird.f32 %v3482_v1 }
0x21ee   :  { %vm1505_vm10 = vmor %vm1503_vm9, %vm1504_vm7 }
0x21ef   :  { %v1500_v0 = vsub.f32 1.0, %v1499_v63 }
0x21f1   :  { %v1501_v44 = vmul.f32 %v3482_v1, %v1500_v0 }
0x21f3   :  { %v1502_v31 = vadd.f32 %v3482_v1, %v1501_v44 }
0x21f5   :  { %v1506_v23 = vsel %vm1505_vm10, %v3482_v1, %v1502_v31 }
0x21f6   :  { %v1511_v20 = vsel %vm1508_vm12, %v1510_v3, %v1506_v23 }
0x21f7   :  { %v1513_v21 = vmul.f32 2.0, %v1511_v20 }
0x21f9   :  { %v3300_v13 = vadd.f32 -1.0, %v1513_v21 }
0x21fb   :  { %v1515_v53 = vsel %vm4092_vm15, %v3300_v13, %v1511_v20 }
0x21fc   :  { %1518 = vrot.lane.b32.xlu1 %v1515_v53, %s3614_s15  ;;  %v1516_v58 = vmul.f32 %v1515_v53, %v1458_v4 }
0x226e   :  { %v1519_v55 = vpop.permute.xlu1 %1518 }
0x226f   :  { %v1521_v57 = vmul.f32 %v1519_v55, %v1515_v53 }
0x2271   :  { %1523 = vrot.lane.b32.xlu0 %v1521_v57, %s3615_s26 }
0x22e3   :  { %v1524_v59 = vpop.permute.xlu0 %1523 }
0x22e4   :  { %v1526_v60 = vadd.f32 %v1524_v59, %v1516_v58 }
0x22e6   :  { %3483 = vtanh.f32 %v1526_v60 }
0x22ec   :  { %v3484_v56 = vpop.eup %3483 }
0x22ed   :  { %1529 = vrot.lane.b32.xlu1 %v3484_v56, %s3614_s15 }
0x235f   :  { %v1530_v6 = vpop.permute.xlu1 %1529 }
0x2360   :  { %v1532_v50 = vmul.f32 %v1530_v6, %v1515_v53 }
0x2362   :  { %1534 = vrot.lane.b32.xlu0 %v1532_v50, %s3615_s26 }
0x23d4   :  { %v1535_v15 = vpop.permute.xlu0 %1534 }
0x23d5   :  { %1537 = vst.msk [vmem:[#allocation3 + $0x58] sm:$0xff] %vm721_vm0, %v1535_v15  ;;  %3301 = vmatmul.msk.f32.vlgmr.msrb.gmra.mxu2 %vm721_vm0, %v1535_v15 }
0x23dc   :  { %v1821_v17 = vld [vmem:[#allocation3 + $0x58] sm:$0xff] }
0x23dd   :  { %1838 = vst.msk [vmem:[#allocation4 + $0x58] sm:$0xff] %vm1826_vm1, %v1821_v17 }
0x23de   :  { %1867 = vst.msk [vmem:[#allocation4 + $0x58] sm:$0xff] %vm1844_vm11, %v4190_v49 }
0x23df   :  { %1853 = vst.msk [vmem:[#allocation4 + $0x20] sm:$0xff] %vm1844_vm11, %v1821_v17 }
0x23e5   :  { %v1887_v19 = vld [vmem:[#allocation4 + $0x58] sm:$0xff] }
0x23e6   :  { %3324 = vmatmul.msk.f32.vlgmr.msrb.gmra.mxu3 %vm721_vm0, %v1887_v19 }
0x2458   :  { %v1558_v9 = vpop.f32.mrf.mxu2 }
0x2459   :  { %v1561_v52 = vadd.f32 %v1558_v9, %v690_v29 }
0x245b   :  { %v3302_v36 = vmul.f32 -1.442695, %v1561_v52 }
0x245d   :  { %3485 = vpow2.f32 %v3302_v36 }
0x2463   :  { %v3486_v24 = vpop.eup %3485 }
0x2464   :  { %v1565_v30 = vadd.f32 1.0, %v3486_v24 }
0x2466   :  { %3487 = vrcp.f32 %v1565_v30  ;;  %v1577_v22 = vand.u32 2147483648, %v1565_v30  ;;  %v1575_v7 = vand.u32 2147483647, %v1565_v30  ;;  %vm1571_vm14 = vweird.f32 %v1565_v30 }
0x2468   :  { %v1578_v11 = vor.u32 1.1754944e-38, %v1577_v22  ;;  %vm1576_vm3 = vcmp.eq.f32.partialorder %v1575_v7, 8.507059e+37 }
0x246c   :  { %v3488_v4 = vpop.eup %3487 }
0x246d   :  { %v1567_v54 = vmul.f32 %v3488_v4, %v1565_v30  ;;  %vm1572_vm13 = vweird.f32 %v3488_v4 }
0x246e   :  { %vm1573_vm2 = vmor %vm1571_vm14, %vm1572_vm13 }
0x246f   :  { %v1568_v49 = vsub.f32 1.0, %v1567_v54 }
0x2471   :  { %v1569_v33 = vmul.f32 %v3488_v4, %v1568_v49 }
0x2473   :  { %v1570_v8 = vadd.f32 %v3488_v4, %v1569_v33 }
0x2475   :  { %v1574_v18 = vsel %vm1573_vm2, %v3488_v4, %v1570_v8 }
0x2476   :  { %v1579_v27 = vsel %vm1576_vm3, %v1578_v11, %v1574_v18 }
0x2477   :  { %v1581_v28 = vmul.f32 2.0, %v1579_v27 }
0x2479   :  { %v3303_v29 = vadd.f32 -1.0, %v1581_v28 }
0x247b   :  { %v1583_v38 = vsel %vm4092_vm15, %v3303_v29, %v1579_v27 }
0x247c   :  { %1586 = vrot.lane.b32.xlu1 %v1583_v38, %s3614_s15  ;;  %v1584_v1 = vmul.f32 %v1583_v38, %v1526_v60 }
0x24ee   :  { %v1587_v10 = vpop.permute.xlu1 %1586 }
0x24ef   :  { %v1589_v39 = vmul.f32 %v1587_v10, %v1583_v38 }
0x24f1   :  { %1591 = vrot.lane.b32.xlu0 %v1589_v39, %s3615_s26 }
0x2563   :  { %v1592_v63 = vpop.permute.xlu0 %1591 }
0x2564   :  { %v1594_v0 = vadd.f32 %v1592_v63, %v1584_v1 }
0x2566   :  { %3489 = vtanh.f32 %v1594_v0 }
0x256c   :  { %v3490_v2 = vpop.eup %3489 }
0x256d   :  { %1597 = vrot.lane.b32.xlu1 %v3490_v2, %s3614_s15 }
0x25df   :  { %v1598_v44 = vpop.permute.xlu1 %1597 }
0x25e0   :  { %v1600_v48 = vmul.f32 %v1598_v44, %v1583_v38 }
0x25e2   :  { %1602 = vrot.lane.b32.xlu0 %v1600_v48, %s3615_s26 }
0x2654   :  { %v1603_v31 = vpop.permute.xlu0 %1602 }
0x2655   :  { %1605 = vst.msk [vmem:[#allocation3 + $0x60] sm:$0xff] %vm721_vm0, %v1603_v31  ;;  %3304 = vmatmul.msk.f32.vlgmr.msrb.gmra.mxu0 %vm721_vm0, %v1603_v31 }
0x265c   :  { %v1822_v3 = vld [vmem:[#allocation3 + $0x60] sm:$0xff] }
0x265d   :  { %1839 = vst.msk [vmem:[#allocation4 + $0x60] sm:$0xff] %vm1826_vm1, %v1822_v3 }
0x265e   :  { %1851 = vst.msk [vmem:[#allocation4 + $0x18] sm:$0xff] %vm1844_vm11, %v1822_v3 }
0x265f   :  { %1869 = vst.msk [vmem:[#allocation4 + $0x60] sm:$0xff] %vm1844_vm11, %v4169_v16 }
0x2666   :  { %v1888_v23 = vld [vmem:[#allocation4 + $0x60] sm:$0xff] }
0x2667   :  { %3325 = vmatmul.msk.f32.gmra.mxu3 %vm721_vm0, %v1888_v23 }
0x26d2   :  { %v1626_v20 = vpop.f32.mrf.mxu0 }
0x26d3   :  { %v1629_v21 = vadd.f32 %v1626_v20, %v684_v37 }
0x26d5   :  { %v3305_v13 = vmul.f32 -1.442695, %v1629_v21 }
0x26d7   :  { %3491 = vpow2.f32 %v3305_v13 }
0x26dd   :  { %v3492_v53 = vpop.eup %3491 }
0x26de   :  { %v1633_v55 = vadd.f32 1.0, %v3492_v53 }
0x26e0   :  { %3493 = vrcp.f32 %v1633_v55  ;;  %v1645_v60 = vand.u32 2147483648, %v1633_v55  ;;  %v1643_v56 = vand.u32 2147483647, %v1633_v55  ;;  %vm1639_vm5 = vweird.f32 %v1633_v55 }
0x26e2   :  { %v1646_v50 = vor.u32 1.1754944e-38, %v1645_v60  ;;  %vm1644_vm7 = vcmp.eq.f32.partialorder %v1643_v56, 8.507059e+37 }
0x26e6   :  { %v3494_v57 = vpop.eup %3493 }
0x26e7   :  { %v1635_v58 = vmul.f32 %v3494_v57, %v1633_v55  ;;  %vm1640_vm4 = vweird.f32 %v3494_v57 }
0x26e8   :  { %vm1641_vm6 = vmor %vm1639_vm5, %vm1640_vm4 }
0x26e9   :  { %v1636_v59 = vsub.f32 1.0, %v1635_v58 }
0x26eb   :  { %v1637_v16 = vmul.f32 %v3494_v57, %v1636_v59 }
0x26ed   :  { %v1638_v6 = vadd.f32 %v3494_v57, %v1637_v16 }
0x26ef   :  { %v1642_v51 = vsel %vm1641_vm6, %v3494_v57, %v1638_v6 }
0x26f0   :  { %v1647_v26 = vsel %vm1644_vm7, %v1646_v50, %v1642_v51 }
0x26f1   :  { %v1649_v35 = vmul.f32 2.0, %v1647_v26 }
0x26f3   :  { %v3306_v37 = vadd.f32 -1.0, %v1649_v35 }
0x26f5   :  { %v1651_v32 = vsel %vm4092_vm15, %v3306_v37, %v1647_v26 }
0x26f6   :  { %1654 = vrot.lane.b32.xlu1 %v1651_v32, %s3614_s15  ;;  %v1652_v15 = vmul.f32 %v1651_v32, %v1594_v0 }
0x2768   :  { %v1655_v47 = vpop.permute.xlu1 %1654 }
0x2769   :  { %v1657_v12 = vmul.f32 %v1655_v47, %v1651_v32 }
0x276b   :  { %1659 = vrot.lane.b32.xlu0 %v1657_v12, %s3615_s26 }
0x27dd   :  { %v1660_v17 = vpop.permute.xlu0 %1659 }
0x27de   :  { %v1662_v19 = vadd.f32 %v1660_v17, %v1652_v15 }
0x27e0   :  { %3495 = vtanh.f32 %v1662_v19 }
0x27e6   :  { %v3496_v9 = vpop.eup %3495 }
0x27e7   :  { %1665 = vrot.lane.b32.xlu1 %v3496_v9, %s3614_s15 }
0x2859   :  { %v1666_v52 = vpop.permute.xlu1 %1665 }
0x285a   :  { %v1668_v36 = vmul.f32 %v1666_v52, %v1651_v32  ;;  %v4407_v52 = vld [vmem:[%s4849_s17 + $0x18] sm:$0xff] }
0x285b   :  { %2094 = vmatpush.msrb.mxu1 %v4407_v52  ;;  %2160 = vmatpush.msrb.mxu2 %v4407_v52 }
0x285c   :  { %1670 = vrot.lane.b32.xlu0 %v1668_v36, %s3615_s26  ;;  %v4412_v36 = vld [vmem:[%s4849_s17 + $0x10] sm:$0xff] }
0x285d   :  { %2095 = vmatpush.msrb.mxu1 %v4412_v36  ;;  %2161 = vmatpush.msrb.mxu2 %v4412_v36 }
0x28ce   :  { %v1671_v24 = vpop.permute.xlu0 %1670 }
0x28cf   :  { %1673 = vst.msk [vmem:[#allocation3 + $0x68] sm:$0xff] %vm721_vm0, %v1671_v24  ;;  %3307 = vmatmul.msk.f32.vlgmr.msra.gmra.mxu1 %vm721_vm0, %v1671_v24  ;;  %v4419_v24 = vld [vmem:[%s4849_s17 + $0x8] sm:$0xff] }
0x28d0   :  { %2096 = vmatpush.msrb.mxu1 %v4419_v24  ;;  %2162 = vmatpush.msrb.mxu2 %v4419_v24 }
0x28d6   :  { %v1823_v30 = vld [vmem:[#allocation3 + $0x68] sm:$0xff] }
0x28d7   :  { %1840 = vst.msk [vmem:[#allocation4 + $0x68] sm:$0xff] %vm1826_vm1, %v1823_v30 }
0x28d8   :  { %1849 = vst.msk [vmem:[#allocation4 + $0x10] sm:$0xff] %vm1844_vm11, %v1823_v30  ;;  %v4428_v30 = vld [vmem:[%s4849_s17] sm:$0xff] }
0x28d9   :  { %1871 = vst.msk [vmem:[#allocation4 + $0x68] sm:$0xff] %vm1844_vm11, %v4148_v42  ;;  %2097 = vmatpush.msrb.mxu1 %v4428_v30  ;;  %2163 = vmatpush.msrb.mxu2 %v4428_v30 }
0x28da   :  { %2098 = vmatmul.f32.vlgmr.msrb.gmra.mxu1 %v3612_v5 }
0x28db   :  { %2226 = vmatpush.msra.mxu1 %v4407_v52 }
0x28dd   :  { %2227 = vmatpush.msra.mxu1 %v4412_v36 }
0x28df   :  { %2228 = vmatpush.msra.mxu1 %v4419_v24 }
0x28e0   :  { %v1889_v4 = vld [vmem:[#allocation4 + $0x68] sm:$0xff] }
0x28e1   :  { %3326 = vmatmul.msk.f32.gmra.mxu3 %vm721_vm0, %v1889_v4  ;;  %2229 = vmatpush.msra.mxu1 %v4428_v30 }
0x28e3   :  { %2358 = vmatpush.msrb.mxu1 %v4407_v52 }
0x28e5   :  { %2359 = vmatpush.msrb.mxu1 %v4412_v36 }
0x28e7   :  { %2360 = vmatpush.msrb.mxu1 %v4419_v24 }
0x28e9   :  { %2361 = vmatpush.msrb.mxu1 %v4428_v30 }
0x294c   :  { %v1694_v54 = vpop.f32.mrf.mxu1 }
0x294d   :  { %v1697_v49 = vadd.f32 %v1694_v54, %v678_v41 }
0x294f   :  { %v3308_v22 = vmul.f32 -1.442695, %v1697_v49 }
0x2951   :  { %3497 = vpow2.f32 %v3308_v22 }
0x2957   :  { %v3498_v33 = vpop.eup %3497 }
0x2958   :  { %v1701_v7 = vadd.f32 1.0, %v3498_v33  ;;  %v1878_v33 = vld [vmem:[#allocation4 + $0x10] sm:$0xff] }
0x295a   :  { %3499 = vrcp.f32 %v1701_v7  ;;  %v1713_v27 = vand.u32 2147483648, %v1701_v7  ;;  %v1711_v28 = vand.u32 2147483647, %v1701_v7  ;;  %vm1707_vm10 = vweird.f32 %v1701_v7 }
0x295c   :  { %v1714_v38 = vor.u32 1.1754944e-38, %v1713_v27  ;;  %vm1712_vm13 = vcmp.eq.f32.partialorder %v1711_v28, 8.507059e+37  ;;  %v1884_v27 = vld [vmem:[#allocation4 + $0x40] sm:$0xff]  ;;  %v1886_v28 = vld [vmem:[#allocation4 + $0x50] sm:$0xff] }
0x2960   :  { %v3500_v8 = vpop.eup %3499 }
0x2961   :  { %v1703_v11 = vmul.f32 %v3500_v8, %v1701_v7  ;;  %vm1708_vm9 = vweird.f32 %v3500_v8  ;;  %v1879_v7 = vld [vmem:[#allocation4 + $0x18] sm:$0xff] }
0x2962   :  { %vm1709_vm12 = vmor %vm1707_vm10, %vm1708_vm9 }
0x2963   :  { %v1704_v18 = vsub.f32 1.0, %v1703_v11  ;;  %v1881_v11 = vld [vmem:[#allocation4 + $0x28] sm:$0xff] }
0x2965   :  { %v1705_v42 = vmul.f32 %v3500_v8, %v1704_v18  ;;  %v1883_v18 = vld [vmem:[#allocation4 + $0x38] sm:$0xff] }
0x2967   :  { %v1706_v29 = vadd.f32 %v3500_v8, %v1705_v42  ;;  %v1885_v42 = vld [vmem:[#allocation4 + $0x48] sm:$0xff] }
0x2969   :  { %v1710_v10 = vsel %vm1709_vm12, %v3500_v8, %v1706_v29  ;;  %v1880_v8 = vld [vmem:[#allocation4 + $0x20] sm:$0xff]  ;;  %v1998_v29 = vpop.f32.mrf.mxu3 }
0x296a   :  { %v1715_v14 = vsel %vm1712_vm13, %v1714_v38, %v1710_v10 }
0x296b   :  { %v1717_v40 = vmul.f32 2.0, %v1715_v14 }
0x296d   :  { %v3309_v41 = vadd.f32 -1.0, %v1717_v40 }
0x296f   :  { %v1719_v39 = vsel %vm4092_vm15, %v3309_v41, %v1715_v14  ;;  %v3395_v41 = vld [vmem:[%s4848_s18] ss:$0 sm:$0xff] }
0x2970   :  { %1722 = vrot.lane.b32.xlu1 %v1719_v39, %s3614_s15  ;;  %v1720_v0 = vmul.f32 %v1719_v39, %v1662_v19 }
0x2971   :  { %v2001_v38 = vpop.f32.mrf.mxu3 }
0x2979   :  { %v2004_v10 = vpop.f32.mrf.mxu3 }
0x29e2   :  { %v1723_v1 = vpop.permute.xlu1 %1722 }
0x29e3   :  { %v1725_v63 = vmul.f32 %v1723_v1, %v1719_v39 }
0x29e5   :  { %1727 = vrot.lane.b32.xlu0 %v1725_v63, %s3615_s26 }
0x2a57   :  { %v1728_v2 = vpop.permute.xlu0 %1727 }
0x2a58   :  { %v1730_v44 = vadd.f32 %v1728_v2, %v1720_v0  ;;  %v2099_v2 = vpop.f32.mrf.mxu1 }
0x2a5a   :  { %3501 = vtanh.f32 %v1730_v44 }
0x2a60   :  { %v3502_v48 = vpop.eup %3501 }
0x2a61   :  { %1733 = vrot.lane.b32.xlu1 %v3502_v48, %s3614_s15 }
0x2ad3   :  { %v1734_v31 = vpop.permute.xlu1 %1733 }
0x2ad4   :  { %v1736_v3 = vmul.f32 %v1734_v31, %v1719_v39 }
0x2ad6   :  { %1738 = vrot.lane.b32.xlu2 %v1736_v3, %s3615_s26 }
0x2b30   :  { %v1739_v23 = vpop.permute.xlu2 %1738 }
0x2b31   :  { %1741 = vst.msk [vmem:[#allocation3 + $0x70] sm:$0xff] %vm721_vm0, %v1739_v23  ;;  %3310 = vmatmul.msk.f32.vlgmr.msra.gmra.mxu2 %vm721_vm0, %v1739_v23 }
0x2b32   :  { %2292 = vmatpush.msra.mxu2 %v4407_v52 }
0x2b34   :  { %2293 = vmatpush.msra.mxu2 %v4412_v36 }
0x2b36   :  { %2294 = vmatpush.msra.mxu2 %v4419_v24 }
0x2b38   :  { %v1824_v20 = vld [vmem:[#allocation3 + $0x70] sm:$0xff]  ;;  %2295 = vmatpush.msra.mxu2 %v4428_v30 }
0x2b39   :  { %1841 = vst.msk [vmem:[#allocation4 + $0x70] sm:$0xff] %vm1826_vm1, %v1824_v20 }
0x2b3a   :  { %1847 = vst.msk [vmem:[#allocation4 + $0x8] sm:$0xff] %vm1844_vm11, %v1824_v20 }
0x2b3b   :  { %1873 = vst.msk [vmem:[#allocation4 + $0x70] sm:$0xff] %vm1844_vm11, %v4127_v34 }
0x2b41   :  { %v1877_v22 = vld [vmem:[#allocation4 + $0x8] sm:$0xff] }
0x2b42   :  { %v1890_v21 = vld [vmem:[#allocation4 + $0x70] sm:$0xff] }
0x2b43   :  { %3327 = vmatmul.msk.f32.gmra.mxu3 %vm721_vm0, %v1890_v21 }
0x2bb4   :  { %v1762_v13 = vpop.f32.mrf.mxu2 }
0x2bb5   :  { %v1765_v53 = vadd.f32 %v1762_v13, %v672_v46 }
0x2bb7   :  { %v3311_v55 = vmul.f32 -1.442695, %v1765_v53  ;;  %v4485_v53 = vadd.f32 %v3395_v41, %v2004_v10 }
0x2bb9   :  { %3503 = vpow2.f32 %v3311_v55 }
0x2bbf   :  { %v3504_v57 = vpop.eup %3503 }
0x2bc0   :  { %v1769_v58 = vadd.f32 1.0, %v3504_v57 }
0x2bc2   :  { %3505 = vrcp.f32 %v1769_v58  ;;  %v1781_v56 = vand.u32 2147483648, %v1769_v58  ;;  %v1779_v6 = vand.u32 2147483647, %v1769_v58  ;;  %vm1775_vm2 = vweird.f32 %v1769_v58 }
0x2bc4   :  { %v1782_v51 = vor.u32 1.1754944e-38, %v1781_v56  ;;  %vm1780_vm4 = vcmp.eq.f32.partialorder %v1779_v6, 8.507059e+37 }
0x2bc6   :  { %v2007_v14 = vpop.f32.mrf.mxu3 }
0x2bc8   :  { %v3506_v59 = vpop.eup %3505 }
0x2bc9   :  { %v1771_v60 = vmul.f32 %v3506_v59, %v1769_v58  ;;  %vm1776_vm14 = vweird.f32 %v3506_v59 }
0x2bca   :  { %vm1777_vm3 = vmor %vm1775_vm2, %vm1776_vm14 }
0x2bcb   :  { %v1772_v16 = vsub.f32 1.0, %v1771_v60 }
0x2bcd   :  { %v1773_v34 = vmul.f32 %v3506_v59, %v1772_v16  ;;  %v4493_v16 = vadd.f32 %v3395_v41, %v2001_v38 }
0x2bcf   :  { %v1774_v50 = vadd.f32 %v3506_v59, %v1773_v34 }
0x2bd1   :  { %v1778_v26 = vsel %vm1777_vm3, %v3506_v59, %v1774_v50 }
0x2bd2   :  { %v1783_v25 = vsel %vm1780_vm4, %v1782_v51, %v1778_v26  ;;  %v4501_v26 = vadd.f32 %v3395_v41, %v1998_v29 }
0x2bd3   :  { %v1785_v43 = vmul.f32 2.0, %v1783_v25 }
0x2bd5   :  { %v3312_v46 = vadd.f32 -1.0, %v1785_v43 }
0x2bd7   :  { %v1787_v35 = vsel %vm4092_vm15, %v3312_v46, %v1783_v25 }
0x2bd8   :  { %1790 = vrot.lane.b32.xlu0 %v1787_v35, %s3614_s15  ;;  %v1788_v47 = vmul.f32 %v1787_v35, %v1730_v44  ;;  %v4469_v44 = vadd.f32 %v3395_v41, %v2007_v14 }
0x2c4a   :  { %v1791_v37 = vpop.permute.xlu0 %1790 }
0x2c4b   :  { %v1793_v32 = vmul.f32 %v1791_v37, %v1787_v35 }
0x2c4d   :  { %1795 = vrot.lane.b32.xlu1 %v1793_v32, %s3615_s26 }
0x2cbf   :  { %v1796_v12 = vpop.permute.xlu1 %1795 }
0x2cc0   :  { %v1798_v15 = vadd.f32 %v1796_v12, %v1788_v47 }
0x2cc2   :  { %3507 = vtanh.f32 %v1798_v15 }
0x2cc8   :  { %v3508_v17 = vpop.eup %3507 }
0x2cc9   :  { %1801 = vrot.lane.b32.xlu2 %v3508_v17, %s3614_s15 }
0x2d23   :  { %v1802_v19 = vpop.permute.xlu2 %1801 }
0x2d24   :  { %v1804_v9 = vmul.f32 %v1802_v19, %v1787_v35 }
0x2d26   :  { %1806 = vrot.lane.b32.xlu0 %v1804_v9, %s3615_s26 }
0x2d98   :  { %v1807_v4 = vpop.permute.xlu0 %1806 }
0x2d99   :  { %1809 = vst.msk [vmem:[#allocation3 + $0x78] sm:$0xff] %vm721_vm0, %v1807_v4 }
0x2da0   :  { %v1825_v5 = vld [vmem:[#allocation3 + $0x78] sm:$0xff] }
0x2da1   :  { %1842 = vst.msk [vmem:[#allocation4 + $0x78] sm:$0xff] %vm1826_vm1, %v1825_v5 }
0x2da2   :  { %1845 = vst.msk [vmem:[#allocation4] sm:$0xff] %vm1844_vm11, %v1825_v5 }
0x2da3   :  { %1875 = vst.msk [vmem:[#allocation4 + $0x78] sm:$0xff] %vm1844_vm11, %v4107_v45  ;;  %v1882_v45 = vld [vmem:[#allocation4 + $0x30] sm:$0xff] }
0x2da9   :  { %v1876_v54 = vld [vmem:[#allocation4] sm:$0xff] }
0x2daa   :  { %3313 = vmatmul.msk.f32.vlgmr.msra.gmra.mxu0 %vm721_vm0, %v1876_v54  ;;  %v1891_v49 = vld [vmem:[#allocation4 + $0x78] sm:$0xff] }
0x2dab   :  { %3328 = vmatmul.msk.f32.gmra.mxu3 %vm721_vm0, %v1891_v49 }
0x2db2   :  { %3314 = vmatmul.msk.f32.gmra.mxu0 %vm721_vm0, %v1877_v22 }
0x2dba   :  { %3315 = vmatmul.msk.f32.gmra.mxu0 %vm721_vm0, %v1878_v33 }
0x2dc2   :  { %3316 = vmatmul.msk.f32.gmra.mxu0 %vm721_vm0, %v1879_v7 }
0x2dca   :  { %3317 = vmatmul.msk.f32.gmra.mxu0 %vm721_vm0, %v1880_v8 }
0x2dd2   :  { %3318 = vmatmul.msk.f32.gmra.mxu0 %vm721_vm0, %v1881_v11 }
0x2dda   :  { %3319 = vmatmul.msk.f32.gmra.mxu0 %vm721_vm0, %v1882_v45 }
0x2de2   :  { %3320 = vmatmul.msk.f32.gmra.mxu0 %vm721_vm0, %v1883_v18 }
0x2dea   :  { %3321 = vmatmul.msk.f32.gmra.mxu0 %vm721_vm0, %v1884_v27 }
0x2df2   :  { %3322 = vmatmul.msk.f32.gmra.mxu0 %vm721_vm0, %v1885_v42 }
0x2dfa   :  { %3323 = vmatmul.msk.f32.gmra.mxu0 %vm721_vm0, %v1886_v28 }
0x2e27   :  { %v1965_v40 = vpop.f32.mrf.mxu0 }
0x2e28   :  { %v4465_v1 = vadd.f32 %v3395_v41, %v1965_v40 }
0x2e2e   :  { %v2010_v39 = vpop.f32.mrf.mxu3 }
0x2e2f   :  { %v4467_v63 = vadd.f32 %v3395_v41, %v2010_v39  ;;  %v1968_v0 = vpop.f32.mrf.mxu0 }
0x2e30   :  { %v4471_v48 = vadd.f32 %v3395_v41, %v1968_v0 }
0x2e31   :  { %v2031_v31 = vsel %vm3994_vm8, %v4465_v1, %v4467_v63  ;;  %v2033_v3 = vsel %vm3994_vm8, %v4467_v63, %v4465_v1 }
0x2e32   :  { %v2102_v23 = vadd.f32 %v2099_v2, %v2031_v31  ;;  %v2039_v20 = vsel %vm3994_vm8, %v4469_v44, %v4471_v48 }
0x2e34   :  { %v3329_v21 = vmul.f32 -1.442695, %v2102_v23 }
0x2e36   :  { %3509 = vpow2.f32 %v3329_v21 }
0x2e37   :  { %v1971_v13 = vpop.f32.mrf.mxu0 }
0x2e38   :  { %v4487_v55 = vadd.f32 %v3395_v41, %v1971_v13 }
0x2e3a   :  { %v2045_v57 = vsel %vm3994_vm8, %v4485_v53, %v4487_v55 }
0x2e3c   :  { %v3510_v58 = vpop.eup %3509 }
0x2e3d   :  { %v2106_v59 = vadd.f32 1.0, %v3510_v58  ;;  %v2037_v58 = vsel %vm3994_vm8, %v4471_v48, %v4469_v44 }
0x2e3f   :  { %3511 = vrcp.f32 %v2106_v59  ;;  %v1974_v60 = vpop.f32.mrf.mxu0  ;;  %v2118_v46 = vand.u32 2147483648, %v2106_v59  ;;  %v2116_v37 = vand.u32 2147483647, %v2106_v59  ;;  %vm2112_vm5 = vweird.f32 %v2106_v59 }
0x2e40   :  { %v4495_v56 = vadd.f32 %v3395_v41, %v1974_v60 }
0x2e41   :  { %v2119_v12 = vor.u32 1.1754944e-38, %v2118_v46  ;;  %vm2117_vm7 = vcmp.eq.f32.partialorder %v2116_v37, 8.507059e+37 }
0x2e42   :  { %v2051_v34 = vsel %vm3994_vm8, %v4493_v16, %v4495_v56 }
0x2e45   :  { %v3512_v6 = vpop.eup %3511 }
0x2e46   :  { %v2108_v50 = vmul.f32 %v3512_v6, %v2106_v59  ;;  %vm2113_vm11 = vweird.f32 %v3512_v6 }
0x2e47   :  { %v1977_v51 = vpop.f32.mrf.mxu0  ;;  %vm2114_vm6 = vmor %vm2112_vm5, %vm2113_vm11 }
0x2e48   :  { %v2109_v25 = vsub.f32 1.0, %v2108_v50  ;;  %v4503_v43 = vadd.f32 %v3395_v41, %v1977_v51 }
0x2e4a   :  { %v2110_v35 = vmul.f32 %v3512_v6, %v2109_v25  ;;  %v2057_v32 = vsel %vm3994_vm8, %v4501_v26, %v4503_v43 }
0x2e4c   :  { %v2111_v47 = vadd.f32 %v3512_v6, %v2110_v35 }
0x2e4e   :  { %v2115_v15 = vsel %vm2114_vm6, %v3512_v6, %v2111_v47 }
0x2e4f   :  { %v1980_v17 = vpop.f32.mrf.mxu0  ;;  %v2120_v19 = vsel %vm2117_vm7, %v2119_v12, %v2115_v15 }
0x2e50   :  { %v2122_v9 = vmul.f32 2.0, %v2120_v19  ;;  %v4536_v38 = vadd.f32 %v3395_v41, %v1980_v17 }
0x2e52   :  { %v3330_v4 = vadd.f32 -1.0, %v2122_v9 }
0x2e54   :  { %v2124_v5 = vsel %vm4092_vm15, %v3330_v4, %v2120_v19 }
0x2e55   :  { %2127 = vrot.lane.b32.xlu1 %v2124_v5, %s3614_s15  ;;  %v2125_v0 = vmul.f32 0.0, %v2124_v5 }
0x2e57   :  { %v1983_v54 = vpop.f32.mrf.mxu0 }
0x2e58   :  { %v4524_v18 = vadd.f32 %v3395_v41, %v1983_v54 }
0x2e5f   :  { %v1986_v49 = vpop.f32.mrf.mxu0 }
0x2e60   :  { %v4512_v33 = vadd.f32 %v3395_v41, %v1986_v49 }
0x2e67   :  { %v1989_v22 = vpop.f32.mrf.mxu0 }
0x2e68   :  { %v4514_v7 = vadd.f32 %v3395_v41, %v1989_v22 }
0x2e6a   :  { %v2073_v8 = vsel %vm3994_vm8, %v4512_v33, %v4514_v7  ;;  %v2075_v11 = vsel %vm3994_vm8, %v4514_v7, %v4512_v33 }
0x2e6f   :  { %v1992_v45 = vpop.f32.mrf.mxu0 }
0x2e70   :  { %v4526_v27 = vadd.f32 %v3395_v41, %v1992_v45 }
0x2e72   :  { %v2067_v42 = vsel %vm3994_vm8, %v4524_v18, %v4526_v27  ;;  %v2069_v28 = vsel %vm3994_vm8, %v4526_v27, %v4524_v18 }
0x2e77   :  { %v1995_v29 = vpop.f32.mrf.mxu0 }
0x2e78   :  { %v4538_v10 = vadd.f32 %v3395_v41, %v1995_v29 }
0x2e7a   :  { %v2063_v14 = vsel %vm3994_vm8, %v4538_v10, %v4536_v38 }
0x2ec7   :  { %v2128_v40 = vpop.permute.xlu1 %2127 }
0x2ec8   :  { %v2130_v39 = vmul.f32 %v2128_v40, %v2124_v5 }
0x2eca   :  { %2132 = vrot.lane.b32.xlu2 %v2130_v39, %s3615_s26 }
0x2f24   :  { %v2133_v2 = vpop.permute.xlu2 %2132 }
0x2f25   :  { %v2135_v31 = vadd.f32 %v2133_v2, %v2125_v0 }
0x2f27   :  { %3513 = vtanh.f32 %v2135_v31 }
0x2f2d   :  { %v3514_v23 = vpop.eup %3513 }
0x2f2e   :  { %2138 = vrot.lane.b32.xlu0 %v3514_v23, %s3614_s15 }
0x2fa0   :  { %v2139_v21 = vpop.permute.xlu0 %2138 }
0x2fa1   :  { %v2141_v13 = vmul.f32 %v2139_v21, %v2124_v5 }
0x2fa3   :  { %2144 = vrot.lane.b32.xlu1 %v2141_v13, %s3615_s26 }
0x3015   :  { %v4547_v41 = vpop.permute.xlu1 %2144 }
0x3016   :  { %3331 = vmatmul.msk.f32.vlgmr.msrb.gmra.mxu2 %vm721_vm0, %v4547_v41 }
0x3017   :  { %2424 = vmatpush.msrb.mxu2 %v4407_v52 }
0x3019   :  { %2425 = vmatpush.msrb.mxu2 %v4412_v36 }
0x301b   :  { %2426 = vmatpush.msrb.mxu2 %v4419_v24 }
0x301d   :  { %2427 = vmatpush.msrb.mxu2 %v4428_v30 }
0x3099   :  { %v2165_v59 = vpop.f32.mrf.mxu2 }
0x309a   :  { %v2168_v60 = vadd.f32 %v2165_v59, %v2037_v58 }
0x309c   :  { %v3332_v6 = vmul.f32 -1.442695, %v2168_v60 }
0x309e   :  { %3515 = vpow2.f32 %v3332_v6 }
0x30a4   :  { %v3516_v50 = vpop.eup %3515 }
0x30a5   :  { %v2172_v51 = vadd.f32 1.0, %v3516_v50 }
0x30a7   :  { %3517 = vrcp.f32 %v2172_v51  ;;  %v2184_v37 = vand.u32 2147483648, %v2172_v51  ;;  %v2182_v12 = vand.u32 2147483647, %v2172_v51  ;;  %vm2178_vm10 = vweird.f32 %v2172_v51 }
0x30a9   :  { %v2185_v17 = vor.u32 1.1754944e-38, %v2184_v37  ;;  %vm2183_vm13 = vcmp.eq.f32.partialorder %v2182_v12, 8.507059e+37 }
0x30ad   :  { %v3518_v25 = vpop.eup %3517 }
0x30ae   :  { %v2174_v46 = vmul.f32 %v3518_v25, %v2172_v51  ;;  %vm2179_vm9 = vweird.f32 %v3518_v25 }
0x30af   :  { %vm2180_vm12 = vmor %vm2178_vm10, %vm2179_vm9 }
0x30b0   :  { %v2175_v35 = vsub.f32 1.0, %v2174_v46 }
0x30b2   :  { %v2176_v47 = vmul.f32 %v3518_v25, %v2175_v35 }
0x30b4   :  { %v2177_v15 = vadd.f32 %v3518_v25, %v2176_v47 }
0x30b6   :  { %v2181_v19 = vsel %vm2180_vm12, %v3518_v25, %v2177_v15 }
0x30b7   :  { %v2186_v9 = vsel %vm2183_vm13, %v2185_v17, %v2181_v19 }
0x30b8   :  { %v2188_v4 = vmul.f32 2.0, %v2186_v9 }
0x30ba   :  { %v3333_v5 = vadd.f32 -1.0, %v2188_v4 }
0x30bc   :  { %v2190_v54 = vsel %vm4092_vm15, %v3333_v5, %v2186_v9 }
0x30bd   :  { %2193 = vrot.lane.b32.xlu2 %v2190_v54, %s3614_s15  ;;  %v2191_v45 = vmul.f32 %v2190_v54, %v2135_v31  ;;  %v2043_v31 = vsel %vm3994_vm8, %v4487_v55, %v4485_v53 }
0x3117   :  { %v2194_v49 = vpop.permute.xlu2 %2193 }
0x3118   :  { %v2196_v22 = vmul.f32 %v2194_v49, %v2190_v54 }
0x311a   :  { %2198 = vrot.lane.b32.xlu0 %v2196_v22, %s3615_s26 }
0x318c   :  { %v2199_v29 = vpop.permute.xlu0 %2198 }
0x318d   :  { %v2201_v40 = vadd.f32 %v2199_v29, %v2191_v45 }
0x318f   :  { %3519 = vtanh.f32 %v2201_v40 }
0x3195   :  { %v3520_v39 = vpop.eup %3519 }
0x3196   :  { %2204 = vrot.lane.b32.xlu1 %v3520_v39, %s3614_s15 }
0x3208   :  { %v2205_v0 = vpop.permute.xlu1 %2204 }
0x3209   :  { %v2207_v2 = vmul.f32 %v2205_v0, %v2190_v54 }
0x320b   :  { %2210 = vrot.lane.b32.xlu2 %v2207_v2, %s3615_s26 }
0x3265   :  { %v2211_v23 = vpop.permute.xlu2 %2210 }
0x3266   :  { %3334 = vmatmul.msk.f32.vlgmr.msra.gmra.mxu1 %vm721_vm0, %v2211_v23 }
0x3267   :  { %2490 = vmatpush.msra.mxu1 %v4407_v52 }
0x3269   :  { %2491 = vmatpush.msra.mxu1 %v4412_v36 }
0x326b   :  { %2492 = vmatpush.msra.mxu1 %v4419_v24 }
0x326d   :  { %2493 = vmatpush.msra.mxu1 %v4428_v30 }
0x32e3   :  { %v2231_v21 = vpop.f32.mrf.mxu1 }
0x32e4   :  { %v2234_v13 = vadd.f32 %v2231_v21, %v2043_v31 }
0x32e6   :  { %v3335_v58 = vmul.f32 -1.442695, %v2234_v13 }
0x32e8   :  { %3521 = vpow2.f32 %v3335_v58 }
0x32ee   :  { %v3522_v59 = vpop.eup %3521 }
0x32ef   :  { %v2238_v60 = vadd.f32 1.0, %v3522_v59 }
0x32f1   :  { %3523 = vrcp.f32 %v2238_v60  ;;  %v2250_v25 = vand.u32 2147483648, %v2238_v60  ;;  %v2248_v35 = vand.u32 2147483647, %v2238_v60  ;;  %vm2244_vm2 = vweird.f32 %v2238_v60 }
0x32f3   :  { %v2251_v47 = vor.u32 1.1754944e-38, %v2250_v25  ;;  %vm2249_vm4 = vcmp.eq.f32.partialorder %v2248_v35, 8.507059e+37 }
0x32f7   :  { %v3524_v6 = vpop.eup %3523 }
0x32f8   :  { %v2240_v50 = vmul.f32 %v3524_v6, %v2238_v60  ;;  %vm2245_vm14 = vweird.f32 %v3524_v6 }
0x32f9   :  { %vm2246_vm3 = vmor %vm2244_vm2, %vm2245_vm14 }
0x32fa   :  { %v2241_v51 = vsub.f32 1.0, %v2240_v50 }
0x32fc   :  { %v2242_v46 = vmul.f32 %v3524_v6, %v2241_v51 }
0x32fe   :  { %v2243_v37 = vadd.f32 %v3524_v6, %v2242_v46 }
0x3300   :  { %v2247_v12 = vsel %vm2246_vm3, %v3524_v6, %v2243_v37 }
0x3301   :  { %v2252_v15 = vsel %vm2249_vm4, %v2251_v47, %v2247_v12 }
0x3302   :  { %v2254_v17 = vmul.f32 2.0, %v2252_v15 }
0x3304   :  { %v3336_v19 = vadd.f32 -1.0, %v2254_v17 }
0x3306   :  { %v2256_v9 = vsel %vm4092_vm15, %v3336_v19, %v2252_v15 }
0x3307   :  { %2259 = vrot.lane.b32.xlu0 %v2256_v9, %s3614_s15  ;;  %v2257_v54 = vmul.f32 %v2256_v9, %v2201_v40  ;;  %v2049_v40 = vsel %vm3994_vm8, %v4495_v56, %v4493_v16 }
0x3379   :  { %v2260_v4 = vpop.permute.xlu0 %2259 }
0x337a   :  { %v2262_v5 = vmul.f32 %v2260_v4, %v2256_v9 }
0x337c   :  { %2264 = vrot.lane.b32.xlu1 %v2262_v5, %s3615_s26 }
0x33ee   :  { %v2265_v49 = vpop.permute.xlu1 %2264 }
0x33ef   :  { %v2267_v22 = vadd.f32 %v2265_v49, %v2257_v54 }
0x33f1   :  { %3525 = vtanh.f32 %v2267_v22 }
0x33f7   :  { %v3526_v45 = vpop.eup %3525 }
0x33f8   :  { %2270 = vrot.lane.b32.xlu2 %v3526_v45, %s3614_s15 }
0x3452   :  { %v2271_v29 = vpop.permute.xlu2 %2270 }
0x3453   :  { %v2273_v39 = vmul.f32 %v2271_v29, %v2256_v9 }
0x3455   :  { %2276 = vrot.lane.b32.xlu0 %v2273_v39, %s3615_s26 }
0x34c7   :  { %v2277_v0 = vpop.permute.xlu0 %2276 }
0x34c8   :  { %3337 = vmatmul.msk.f32.vlgmr.msra.gmra.mxu2 %vm721_vm0, %v2277_v0 }
0x34c9   :  { %2556 = vmatpush.msra.mxu2 %v4407_v52 }
0x34cb   :  { %2557 = vmatpush.msra.mxu2 %v4412_v36 }
0x34cd   :  { %2558 = vmatpush.msra.mxu2 %v4419_v24 }
0x34cf   :  { %2559 = vmatpush.msra.mxu2 %v4428_v30 }
0x354b   :  { %v2297_v2 = vpop.f32.mrf.mxu2 }
0x354c   :  { %v2300_v23 = vadd.f32 %v2297_v2, %v2049_v40 }
0x354e   :  { %v3338_v31 = vmul.f32 -1.442695, %v2300_v23 }
0x3550   :  { %3527 = vpow2.f32 %v3338_v31 }
0x3556   :  { %v3528_v21 = vpop.eup %3527 }
0x3557   :  { %v2304_v13 = vadd.f32 1.0, %v3528_v21 }
0x3559   :  { %3529 = vrcp.f32 %v2304_v13  ;;  %v2316_v6 = vand.u32 2147483648, %v2304_v13  ;;  %v2314_v51 = vand.u32 2147483647, %v2304_v13  ;;  %vm2310_vm5 = vweird.f32 %v2304_v13 }
0x355b   :  { %v2317_v46 = vor.u32 1.1754944e-38, %v2316_v6  ;;  %vm2315_vm7 = vcmp.eq.f32.partialorder %v2314_v51, 8.507059e+37 }
0x355f   :  { %v3530_v58 = vpop.eup %3529 }
0x3560   :  { %v2306_v59 = vmul.f32 %v3530_v58, %v2304_v13  ;;  %vm2311_vm11 = vweird.f32 %v3530_v58 }
0x3561   :  { %vm2312_vm6 = vmor %vm2310_vm5, %vm2311_vm11 }
0x3562   :  { %v2307_v60 = vsub.f32 1.0, %v2306_v59 }
0x3564   :  { %v2308_v50 = vmul.f32 %v3530_v58, %v2307_v60 }
0x3566   :  { %v2309_v25 = vadd.f32 %v3530_v58, %v2308_v50 }
0x3568   :  { %v2313_v35 = vsel %vm2312_vm6, %v3530_v58, %v2309_v25 }
0x3569   :  { %v2318_v37 = vsel %vm2315_vm7, %v2317_v46, %v2313_v35 }
0x356a   :  { %v2320_v47 = vmul.f32 2.0, %v2318_v37 }
0x356c   :  { %v3339_v12 = vadd.f32 -1.0, %v2320_v47 }
0x356e   :  { %v2322_v15 = vsel %vm4092_vm15, %v3339_v12, %v2318_v37 }
0x356f   :  { %2325 = vrot.lane.b32.xlu1 %v2322_v15, %s3614_s15  ;;  %v2323_v9 = vmul.f32 %v2322_v15, %v2267_v22  ;;  %v2055_v22 = vsel %vm3994_vm8, %v4503_v43, %v4501_v26 }
0x35e1   :  { %v2326_v17 = vpop.permute.xlu1 %2325 }
0x35e2   :  { %v2328_v19 = vmul.f32 %v2326_v17, %v2322_v15 }
0x35e4   :  { %2330 = vrot.lane.b32.xlu2 %v2328_v19, %s3615_s26 }
0x363e   :  { %v2331_v4 = vpop.permute.xlu2 %2330 }
0x363f   :  { %v2333_v5 = vadd.f32 %v2331_v4, %v2323_v9 }
0x3641   :  { %3531 = vtanh.f32 %v2333_v5 }
0x3647   :  { %v3532_v54 = vpop.eup %3531 }
0x3648   :  { %2336 = vrot.lane.b32.xlu0 %v3532_v54, %s3614_s15 }
0x36ba   :  { %v2337_v49 = vpop.permute.xlu0 %2336 }
0x36bb   :  { %v2339_v45 = vmul.f32 %v2337_v49, %v2322_v15 }
0x36bd   :  { %2342 = vrot.lane.b32.xlu1 %v2339_v45, %s3615_s26 }
0x372f   :  { %v2343_v29 = vpop.permute.xlu1 %2342 }
0x3730   :  { %3340 = vmatmul.msk.f32.vlgmr.msrb.gmra.mxu1 %vm721_vm0, %v2343_v29 }
0x3731   :  { %2622 = vmatpush.msrb.mxu1 %v4407_v52 }
0x3733   :  { %2623 = vmatpush.msrb.mxu1 %v4412_v36 }
0x3735   :  { %2624 = vmatpush.msrb.mxu1 %v4419_v24 }
0x3737   :  { %2625 = vmatpush.msrb.mxu1 %v4428_v30 }
0x37ad   :  { %v2363_v39 = vpop.f32.mrf.mxu1 }
0x37ae   :  { %v2366_v0 = vadd.f32 %v2363_v39, %v2055_v22 }
0x37b0   :  { %v3341_v40 = vmul.f32 -1.442695, %v2366_v0 }
0x37b2   :  { %3533 = vpow2.f32 %v3341_v40 }
0x37b8   :  { %v3534_v2 = vpop.eup %3533 }
0x37b9   :  { %v2370_v23 = vadd.f32 1.0, %v3534_v2 }
0x37bb   :  { %3535 = vrcp.f32 %v2370_v23  ;;  %v2382_v58 = vand.u32 2147483648, %v2370_v23  ;;  %v2380_v60 = vand.u32 2147483647, %v2370_v23  ;;  %vm2376_vm10 = vweird.f32 %v2370_v23 }
0x37bd   :  { %v2383_v50 = vor.u32 1.1754944e-38, %v2382_v58  ;;  %vm2381_vm13 = vcmp.eq.f32.partialorder %v2380_v60, 8.507059e+37 }
0x37c1   :  { %v3536_v31 = vpop.eup %3535 }
0x37c2   :  { %v2372_v21 = vmul.f32 %v3536_v31, %v2370_v23  ;;  %vm2377_vm9 = vweird.f32 %v3536_v31 }
0x37c3   :  { %vm2378_vm12 = vmor %vm2376_vm10, %vm2377_vm9 }
0x37c4   :  { %v2373_v13 = vsub.f32 1.0, %v2372_v21 }
0x37c6   :  { %v2374_v59 = vmul.f32 %v3536_v31, %v2373_v13 }
0x37c8   :  { %v2375_v6 = vadd.f32 %v3536_v31, %v2374_v59 }
0x37ca   :  { %v2379_v51 = vsel %vm2378_vm12, %v3536_v31, %v2375_v6 }
0x37cb   :  { %v2384_v25 = vsel %vm2381_vm13, %v2383_v50, %v2379_v51 }
0x37cc   :  { %v2386_v46 = vmul.f32 2.0, %v2384_v25 }
0x37ce   :  { %v3342_v35 = vadd.f32 -1.0, %v2386_v46 }
0x37d0   :  { %v2388_v37 = vsel %vm4092_vm15, %v3342_v35, %v2384_v25 }
0x37d1   :  { %2391 = vrot.lane.b32.xlu2 %v2388_v37, %s3614_s15  ;;  %v2389_v15 = vmul.f32 %v2388_v37, %v2333_v5  ;;  %v2061_v5 = vsel %vm3994_vm8, %v4536_v38, %v4538_v10  ;;  %vm3182_vm8 = vcmask 523264  }
0x382b   :  { %v2392_v47 = vpop.permute.xlu2 %2391 }
0x382c   :  { %v2394_v12 = vmul.f32 %v2392_v47, %v2388_v37 }
0x382e   :  { %2396 = vrot.lane.b32.xlu0 %v2394_v12, %s3615_s26 }
0x38a0   :  { %v2397_v17 = vpop.permute.xlu0 %2396 }
0x38a1   :  { %v2399_v19 = vadd.f32 %v2397_v17, %v2389_v15 }
0x38a3   :  { %3537 = vtanh.f32 %v2399_v19 }
0x38a9   :  { %v3538_v9 = vpop.eup %3537 }
0x38aa   :  { %2402 = vrot.lane.b32.xlu1 %v3538_v9, %s3614_s15 }
0x391c   :  { %v2403_v4 = vpop.permute.xlu1 %2402 }
0x391d   :  { %v2405_v54 = vmul.f32 %v2403_v4, %v2388_v37 }
0x391f   :  { %2408 = vrot.lane.b32.xlu2 %v2405_v54, %s3615_s26 }
0x3979   :  { %v2409_v49 = vpop.permute.xlu2 %2408 }
0x397a   :  { %3343 = vmatmul.msk.f32.vlgmr.msrb.gmra.mxu2 %vm721_vm0, %v2409_v49 }
0x397b   :  { %2688 = vmatpush.msrb.mxu2 %v4407_v52 }
0x397d   :  { %2689 = vmatpush.msrb.mxu2 %v4412_v36 }
0x397f   :  { %2690 = vmatpush.msrb.mxu2 %v4419_v24 }
0x3981   :  { %2691 = vmatpush.msrb.mxu2 %v4428_v30 }
0x39fd   :  { %v2429_v45 = vpop.f32.mrf.mxu2 }
0x39fe   :  { %v2432_v29 = vadd.f32 %v2429_v45, %v2061_v5 }
0x3a00   :  { %v3344_v22 = vmul.f32 -1.442695, %v2432_v29 }
0x3a02   :  { %3539 = vpow2.f32 %v3344_v22 }
0x3a08   :  { %v3540_v39 = vpop.eup %3539 }
0x3a09   :  { %v2436_v0 = vadd.f32 1.0, %v3540_v39 }
0x3a0b   :  { %3541 = vrcp.f32 %v2436_v0  ;;  %v2448_v31 = vand.u32 2147483648, %v2436_v0  ;;  %v2446_v13 = vand.u32 2147483647, %v2436_v0  ;;  %vm2442_vm2 = vweird.f32 %v2436_v0 }
0x3a0d   :  { %v2449_v59 = vor.u32 1.1754944e-38, %v2448_v31  ;;  %vm2447_vm4 = vcmp.eq.f32.partialorder %v2446_v13, 8.507059e+37 }
0x3a11   :  { %v3542_v40 = vpop.eup %3541 }
0x3a12   :  { %v2438_v2 = vmul.f32 %v3542_v40, %v2436_v0  ;;  %vm2443_vm14 = vweird.f32 %v3542_v40 }
0x3a13   :  { %vm2444_vm3 = vmor %vm2442_vm2, %vm2443_vm14 }
0x3a14   :  { %v2439_v23 = vsub.f32 1.0, %v2438_v2 }
0x3a16   :  { %v2440_v21 = vmul.f32 %v3542_v40, %v2439_v23 }
0x3a18   :  { %v2441_v58 = vadd.f32 %v3542_v40, %v2440_v21 }
0x3a1a   :  { %v2445_v60 = vsel %vm2444_vm3, %v3542_v40, %v2441_v58 }
0x3a1b   :  { %v2450_v6 = vsel %vm2447_vm4, %v2449_v59, %v2445_v60 }
0x3a1c   :  { %v2452_v50 = vmul.f32 2.0, %v2450_v6 }
0x3a1e   :  { %v3345_v51 = vadd.f32 -1.0, %v2452_v50 }
0x3a20   :  { %v2454_v25 = vsel %vm4092_vm15, %v3345_v51, %v2450_v6 }
0x3a21   :  { %2457 = vrot.lane.b32.xlu0 %v2454_v25, %s3614_s15  ;;  %v2455_v37 = vmul.f32 %v2454_v25, %v2399_v19 }
0x3a93   :  { %v2458_v46 = vpop.permute.xlu0 %2457 }
0x3a94   :  { %v2460_v35 = vmul.f32 %v2458_v46, %v2454_v25 }
0x3a96   :  { %2462 = vrot.lane.b32.xlu1 %v2460_v35, %s3615_s26 }
0x3b08   :  { %v2463_v47 = vpop.permute.xlu1 %2462 }
0x3b09   :  { %v2465_v12 = vadd.f32 %v2463_v47, %v2455_v37 }
0x3b0b   :  { %3543 = vtanh.f32 %v2465_v12 }
0x3b11   :  { %v3544_v15 = vpop.eup %3543 }
0x3b12   :  { %2468 = vrot.lane.b32.xlu2 %v3544_v15, %s3614_s15 }
0x3b6c   :  { %v2469_v17 = vpop.permute.xlu2 %2468 }
0x3b6d   :  { %v2471_v9 = vmul.f32 %v2469_v17, %v2454_v25 }
0x3b6f   :  { %2474 = vrot.lane.b32.xlu0 %v2471_v9, %s3615_s26 }
0x3be1   :  { %v2475_v4 = vpop.permute.xlu0 %2474 }
0x3be2   :  { %3346 = vmatmul.msk.f32.vlgmr.msra.gmra.mxu1 %vm721_vm0, %v2475_v4 }
0x3be3   :  { %2754 = vmatpush.msra.mxu1 %v4407_v52 }
0x3be5   :  { %2755 = vmatpush.msra.mxu1 %v4412_v36 }
0x3be7   :  { %2756 = vmatpush.msra.mxu1 %v4419_v24 }
0x3be9   :  { %2757 = vmatpush.msra.mxu1 %v4428_v30 }
0x3c5f   :  { %v2495_v19 = vpop.f32.mrf.mxu1 }
0x3c60   :  { %v2498_v54 = vadd.f32 %v2495_v19, %v2067_v42 }
0x3c62   :  { %v3347_v49 = vmul.f32 -1.442695, %v2498_v54 }
0x3c64   :  { %3545 = vpow2.f32 %v3347_v49 }
0x3c6a   :  { %v3546_v5 = vpop.eup %3545 }
0x3c6b   :  { %v2502_v45 = vadd.f32 1.0, %v3546_v5 }
0x3c6d   :  { %3547 = vrcp.f32 %v2502_v45  ;;  %v2514_v0 = vand.u32 2147483648, %v2502_v45  ;;  %v2512_v2 = vand.u32 2147483647, %v2502_v45  ;;  %vm2508_vm5 = vweird.f32 %v2502_v45 }
0x3c6f   :  { %v2515_v31 = vor.u32 1.1754944e-38, %v2514_v0  ;;  %vm2513_vm7 = vcmp.eq.f32.partialorder %v2512_v2, 8.507059e+37 }
0x3c73   :  { %v3548_v29 = vpop.eup %3547 }
0x3c74   :  { %v2504_v22 = vmul.f32 %v3548_v29, %v2502_v45  ;;  %vm2509_vm11 = vweird.f32 %v3548_v29 }
0x3c75   :  { %vm2510_vm6 = vmor %vm2508_vm5, %vm2509_vm11 }
0x3c76   :  { %v2505_v39 = vsub.f32 1.0, %v2504_v22 }
0x3c78   :  { %v2506_v40 = vmul.f32 %v3548_v29, %v2505_v39 }
0x3c7a   :  { %v2507_v23 = vadd.f32 %v3548_v29, %v2506_v40 }
0x3c7c   :  { %v2511_v21 = vsel %vm2510_vm6, %v3548_v29, %v2507_v23 }
0x3c7d   :  { %v2516_v13 = vsel %vm2513_vm7, %v2515_v31, %v2511_v21 }
0x3c7e   :  { %v2518_v42 = vmul.f32 2.0, %v2516_v13 }
0x3c80   :  { %v3348_v58 = vadd.f32 -1.0, %v2518_v42 }
0x3c82   :  { %v2520_v59 = vsel %vm4092_vm15, %v3348_v58, %v2516_v13 }
0x3c83   :  { %2523 = vrot.lane.b32.xlu1 %v2520_v59, %s3614_s15  ;;  %v2521_v50 = vmul.f32 %v2520_v59, %v2465_v12 }
0x3cf5   :  { %v2524_v60 = vpop.permute.xlu1 %2523 }
0x3cf6   :  { %v2526_v6 = vmul.f32 %v2524_v60, %v2520_v59 }
0x3cf8   :  { %2528 = vrot.lane.b32.xlu2 %v2526_v6, %s3615_s26 }
0x3d52   :  { %v2529_v51 = vpop.permute.xlu2 %2528 }
0x3d53   :  { %v2531_v25 = vadd.f32 %v2529_v51, %v2521_v50 }
0x3d55   :  { %3549 = vtanh.f32 %v2531_v25 }
0x3d5b   :  { %v3550_v46 = vpop.eup %3549 }
0x3d5c   :  { %2534 = vrot.lane.b32.xlu0 %v3550_v46, %s3614_s15 }
0x3dce   :  { %v2535_v35 = vpop.permute.xlu0 %2534 }
0x3dcf   :  { %v2537_v37 = vmul.f32 %v2535_v35, %v2520_v59 }
0x3dd1   :  { %2540 = vrot.lane.b32.xlu1 %v2537_v37, %s3615_s26 }
0x3e43   :  { %v2541_v47 = vpop.permute.xlu1 %2540 }
0x3e44   :  { %3349 = vmatmul.msk.f32.vlgmr.msra.gmra.mxu2 %vm721_vm0, %v2541_v47 }
0x3e45   :  { %2820 = vmatpush.msra.mxu2 %v4407_v52 }
0x3e47   :  { %2821 = vmatpush.msra.mxu2 %v4412_v36 }
0x3e49   :  { %2822 = vmatpush.msra.mxu2 %v4419_v24 }
0x3e4b   :  { %2823 = vmatpush.msra.mxu2 %v4428_v30 }
0x3ec7   :  { %v2561_v12 = vpop.f32.mrf.mxu2 }
0x3ec8   :  { %v2564_v15 = vadd.f32 %v2561_v12, %v2073_v8 }
0x3eca   :  { %v3350_v17 = vmul.f32 -1.442695, %v2564_v15 }
0x3ecc   :  { %3551 = vpow2.f32 %v3350_v17 }
0x3ed2   :  { %v3552_v9 = vpop.eup %3551 }
0x3ed3   :  { %v2568_v4 = vadd.f32 1.0, %v3552_v9 }
0x3ed5   :  { %3553 = vrcp.f32 %v2568_v4  ;;  %v2580_v5 = vand.u32 2147483648, %v2568_v4  ;;  %v2578_v29 = vand.u32 2147483647, %v2568_v4  ;;  %vm2574_vm10 = vweird.f32 %v2568_v4 }
0x3ed7   :  { %v2581_v39 = vor.u32 1.1754944e-38, %v2580_v5  ;;  %vm2579_vm13 = vcmp.eq.f32.partialorder %v2578_v29, 8.507059e+37 }
0x3edb   :  { %v3554_v19 = vpop.eup %3553 }
0x3edc   :  { %v2570_v54 = vmul.f32 %v3554_v19, %v2568_v4  ;;  %vm2575_vm9 = vweird.f32 %v3554_v19 }
0x3edd   :  { %vm2576_vm12 = vmor %vm2574_vm10, %vm2575_vm9 }
0x3ede   :  { %v2571_v49 = vsub.f32 1.0, %v2570_v54 }
0x3ee0   :  { %v2572_v45 = vmul.f32 %v3554_v19, %v2571_v49 }
0x3ee2   :  { %v2573_v22 = vadd.f32 %v3554_v19, %v2572_v45 }
0x3ee4   :  { %v2577_v0 = vsel %vm2576_vm12, %v3554_v19, %v2573_v22 }
0x3ee5   :  { %v2582_v40 = vsel %vm2579_vm13, %v2581_v39, %v2577_v0 }
0x3ee6   :  { %v2584_v8 = vmul.f32 2.0, %v2582_v40 }
0x3ee8   :  { %v3351_v2 = vadd.f32 -1.0, %v2584_v8 }
0x3eea   :  { %v2586_v23 = vsel %vm4092_vm15, %v3351_v2, %v2582_v40 }
0x3eeb   :  { %2589 = vrot.lane.b32.xlu2 %v2586_v23, %s3614_s15  ;;  %v2587_v13 = vmul.f32 %v2586_v23, %v2531_v25 }
0x3f45   :  { %v2590_v31 = vpop.permute.xlu2 %2589 }
0x3f46   :  { %v2592_v21 = vmul.f32 %v2590_v31, %v2586_v23 }
0x3f48   :  { %2594 = vrot.lane.b32.xlu0 %v2592_v21, %s3615_s26 }
0x3fba   :  { %v2595_v42 = vpop.permute.xlu0 %2594 }
0x3fbb   :  { %v2597_v58 = vadd.f32 %v2595_v42, %v2587_v13 }
0x3fbd   :  { %3555 = vtanh.f32 %v2597_v58 }
0x3fc3   :  { %v3556_v59 = vpop.eup %3555 }
0x3fc4   :  { %2600 = vrot.lane.b32.xlu1 %v3556_v59, %s3614_s15 }
0x4036   :  { %v2601_v60 = vpop.permute.xlu1 %2600 }
0x4037   :  { %v2603_v6 = vmul.f32 %v2601_v60, %v2586_v23 }
0x4039   :  { %2606 = vrot.lane.b32.xlu2 %v2603_v6, %s3615_s26 }
0x4093   :  { %v2607_v50 = vpop.permute.xlu2 %2606 }
0x4094   :  { %3352 = vmatmul.msk.f32.vlgmr.msrb.gmra.mxu1 %vm721_vm0, %v2607_v50 }
0x4095   :  { %2886 = vmatpush.msrb.mxu1 %v4407_v52 }
0x4097   :  { %2887 = vmatpush.msrb.mxu1 %v4412_v36 }
0x4099   :  { %2888 = vmatpush.msrb.mxu1 %v4419_v24 }
0x409b   :  { %2889 = vmatpush.msrb.mxu1 %v4428_v30 }
0x4111   :  { %v2627_v51 = vpop.f32.mrf.mxu1 }
0x4112   :  { %v2630_v25 = vadd.f32 %v2627_v51, %v2075_v11 }
0x4114   :  { %v3353_v46 = vmul.f32 -1.442695, %v2630_v25 }
0x4116   :  { %3557 = vpow2.f32 %v3353_v46 }
0x411c   :  { %v3558_v35 = vpop.eup %3557 }
0x411d   :  { %v2634_v37 = vadd.f32 1.0, %v3558_v35 }
0x411f   :  { %3559 = vrcp.f32 %v2634_v37  ;;  %v2646_v17 = vand.u32 2147483648, %v2634_v37  ;;  %v2644_v4 = vand.u32 2147483647, %v2634_v37  ;;  %vm2640_vm2 = vweird.f32 %v2634_v37 }
0x4121   :  { %v2647_v54 = vor.u32 1.1754944e-38, %v2646_v17  ;;  %vm2645_vm4 = vcmp.eq.f32.partialorder %v2644_v4, 8.507059e+37 }
0x4125   :  { %v3560_v47 = vpop.eup %3559 }
0x4126   :  { %v2636_v12 = vmul.f32 %v3560_v47, %v2634_v37  ;;  %vm2641_vm14 = vweird.f32 %v3560_v47 }
0x4127   :  { %vm2642_vm3 = vmor %vm2640_vm2, %vm2641_vm14 }
0x4128   :  { %v2637_v15 = vsub.f32 1.0, %v2636_v12 }
0x412a   :  { %v2638_v9 = vmul.f32 %v3560_v47, %v2637_v15 }
0x412c   :  { %v2639_v19 = vadd.f32 %v3560_v47, %v2638_v9 }
0x412e   :  { %v2643_v49 = vsel %vm2642_vm3, %v3560_v47, %v2639_v19  ;;  %v3605_v19 = vld [vmem:[%s4849_s17 + $0x18] sm:$0xff] }
0x412f   :  { %v2648_v33 = vsel %vm2645_vm4, %v2647_v54, %v2643_v49  ;;  %v3606_v54 = vld [vmem:[%s4849_s17 + $0x10] sm:$0xff]  ;;  %v3607_v49 = vld [vmem:[%s4849_s17 + $0x8] sm:$0xff] }
0x4130   :  { %v2650_v7 = vmul.f32 2.0, %v2648_v33 }
0x4132   :  { %v3354_v11 = vadd.f32 -1.0, %v2650_v7 }
0x4134   :  { %v2652_v5 = vsel %vm4092_vm15, %v3354_v11, %v2648_v33  ;;  %v3608_v33 = vld [vmem:[%s4849_s17] sm:$0xff] }
0x4135   :  { %2655 = vrot.lane.b32.xlu0 %v2652_v5, %s3614_s15  ;;  %v2653_v22 = vmul.f32 %v2652_v5, %v2597_v58 }
0x41a7   :  { %v2656_v45 = vpop.permute.xlu0 %2655 }
0x41a8   :  { %v2658_v29 = vmul.f32 %v2656_v45, %v2652_v5 }
0x41aa   :  { %2660 = vrot.lane.b32.xlu1 %v2658_v29, %s3615_s26 }
0x421c   :  { %v2661_v39 = vpop.permute.xlu1 %2660 }
0x421d   :  { %v2663_v0 = vadd.f32 %v2661_v39, %v2653_v22 }
0x421f   :  { %3561 = vtanh.f32 %v2663_v0 }
0x4225   :  { %v3562_v40 = vpop.eup %3561 }
0x4226   :  { %2666 = vrot.lane.b32.xlu2 %v3562_v40, %s3614_s15 }
0x4280   :  { %v2667_v8 = vpop.permute.xlu2 %2666 }
0x4281   :  { %v2669_v2 = vmul.f32 %v2667_v8, %v2652_v5 }
0x4283   :  { %2672 = vrot.lane.b32.xlu0 %v2669_v2, %s3615_s26 }
0x42f5   :  { %v2673_v23 = vpop.permute.xlu0 %2672 }
0x42f6   :  { %3355 = vmatmul.msk.f32.vlgmr.msrb.gmra.mxu2 %vm721_vm0, %v2673_v23 }
0x42f7   :  { %2952 = vmatpush.msrb.mxu2 %v4407_v52 }
0x42f9   :  { %2953 = vmatpush.msrb.mxu2 %v4412_v36 }
0x42fb   :  { %2954 = vmatpush.msrb.mxu2 %v4419_v24 }
0x42fd   :  { %2955 = vmatpush.msrb.mxu2 %v4428_v30 }
0x4379   :  { %v2693_v31 = vpop.f32.mrf.mxu2 }
0x437a   :  { %v2696_v21 = vadd.f32 %v2693_v31, %v2069_v28 }
0x437c   :  { %v3356_v13 = vmul.f32 -1.442695, %v2696_v21 }
0x437e   :  { %3563 = vpow2.f32 %v3356_v13 }
0x4384   :  { %v3564_v42 = vpop.eup %3563 }
0x4385   :  { %v2700_v58 = vadd.f32 1.0, %v3564_v42 }
0x4387   :  { %3565 = vrcp.f32 %v2700_v58  ;;  %v2712_v36 = vand.u32 2147483648, %v2700_v58  ;;  %v2710_v24 = vand.u32 2147483647, %v2700_v58  ;;  %vm2706_vm5 = vweird.f32 %v2700_v58 }
0x4389   :  { %v2713_v50 = vor.u32 1.1754944e-38, %v2712_v36  ;;  %vm2711_vm7 = vcmp.eq.f32.partialorder %v2710_v24, 8.507059e+37 }
0x438d   :  { %v3566_v59 = vpop.eup %3565 }
0x438e   :  { %v2702_v52 = vmul.f32 %v3566_v59, %v2700_v58  ;;  %vm2707_vm11 = vweird.f32 %v3566_v59 }
0x438f   :  { %vm2708_vm6 = vmor %vm2706_vm5, %vm2707_vm11 }
0x4390   :  { %v2703_v60 = vsub.f32 1.0, %v2702_v52 }
0x4392   :  { %v2704_v6 = vmul.f32 %v3566_v59, %v2703_v60 }
0x4394   :  { %v2705_v30 = vadd.f32 %v3566_v59, %v2704_v6 }
0x4396   :  { %v2709_v51 = vsel %vm2708_vm6, %v3566_v59, %v2705_v30 }
0x4397   :  { %v2714_v18 = vsel %vm2711_vm7, %v2713_v50, %v2709_v51 }
0x4398   :  { %v2716_v27 = vmul.f32 2.0, %v2714_v18 }
0x439a   :  { %v3357_v28 = vadd.f32 -1.0, %v2716_v27 }
0x439c   :  { %v2718_v25 = vsel %vm4092_vm15, %v3357_v28, %v2714_v18 }
0x439d   :  { %2721 = vrot.lane.b32.xlu1 %v2718_v25, %s3614_s15  ;;  %v2719_v37 = vmul.f32 %v2718_v25, %v2663_v0 }
0x440f   :  { %v2722_v46 = vpop.permute.xlu1 %2721 }
0x4410   :  { %v2724_v35 = vmul.f32 %v2722_v46, %v2718_v25 }
0x4412   :  { %2726 = vrot.lane.b32.xlu2 %v2724_v35, %s3615_s26 }
0x446c   :  { %v2727_v47 = vpop.permute.xlu2 %2726 }
0x446d   :  { %v2729_v12 = vadd.f32 %v2727_v47, %v2719_v37 }
0x446f   :  { %3567 = vtanh.f32 %v2729_v12 }
0x4475   :  { %v3568_v15 = vpop.eup %3567 }
0x4476   :  { %2732 = vrot.lane.b32.xlu0 %v3568_v15, %s3614_s15 }
0x44e8   :  { %v2733_v17 = vpop.permute.xlu0 %2732 }
0x44e9   :  { %v2735_v9 = vmul.f32 %v2733_v17, %v2718_v25 }
0x44eb   :  { %2738 = vrot.lane.b32.xlu1 %v2735_v9, %s3615_s26 }
0x455d   :  { %v2739_v4 = vpop.permute.xlu1 %2738 }
0x455e   :  { %3358 = vmatmul.msk.f32.vlgmr.msra.gmra.mxu1 %vm721_vm0, %v2739_v4 }
0x455f   :  { %3018 = vmatpush.msra.mxu1 %v3605_v19 }
0x4561   :  { %3019 = vmatpush.msra.mxu1 %v3606_v54 }
0x4563   :  { %3020 = vmatpush.msra.mxu1 %v3607_v49 }
0x4565   :  { %3021 = vmatpush.msra.mxu1 %v3608_v33 }
0x45db   :  { %v2759_v7 = vpop.f32.mrf.mxu1 }
0x45dc   :  { %v2762_v11 = vadd.f32 %v2759_v7, %v2063_v14 }
0x45de   :  { %v3359_v5 = vmul.f32 -1.442695, %v2762_v11 }
0x45e0   :  { %3569 = vpow2.f32 %v3359_v5 }
0x45e6   :  { %v3570_v45 = vpop.eup %3569 }
0x45e7   :  { %v2766_v29 = vadd.f32 1.0, %v3570_v45 }
0x45e9   :  { %3571 = vrcp.f32 %v2766_v29  ;;  %v2778_v40 = vand.u32 2147483648, %v2766_v29  ;;  %v2776_v2 = vand.u32 2147483647, %v2766_v29  ;;  %vm2772_vm10 = vweird.f32 %v2766_v29 }
0x45eb   :  { %v2779_v31 = vor.u32 1.1754944e-38, %v2778_v40  ;;  %vm2777_vm13 = vcmp.eq.f32.partialorder %v2776_v2, 8.507059e+37 }
0x45ef   :  { %v3572_v22 = vpop.eup %3571 }
0x45f0   :  { %v2768_v39 = vmul.f32 %v3572_v22, %v2766_v29  ;;  %vm2773_vm9 = vweird.f32 %v3572_v22 }
0x45f1   :  { %vm2774_vm12 = vmor %vm2772_vm10, %vm2773_vm9 }
0x45f2   :  { %v2769_v0 = vsub.f32 1.0, %v2768_v39 }
0x45f4   :  { %v2770_v8 = vmul.f32 %v3572_v22, %v2769_v0 }
0x45f6   :  { %v2771_v23 = vadd.f32 %v3572_v22, %v2770_v8 }
0x45f8   :  { %v2775_v21 = vsel %vm2774_vm12, %v3572_v22, %v2771_v23 }
0x45f9   :  { %v2780_v38 = vsel %vm2777_vm13, %v2779_v31, %v2775_v21 }
0x45fa   :  { %v2782_v10 = vmul.f32 2.0, %v2780_v38 }
0x45fc   :  { %v3360_v14 = vadd.f32 -1.0, %v2782_v10 }
0x45fe   :  { %v2784_v13 = vsel %vm4092_vm15, %v3360_v14, %v2780_v38 }
0x45ff   :  { %2787 = vrot.lane.b32.xlu2 %v2784_v13, %s3614_s15  ;;  %v2785_v59 = vmul.f32 %v2784_v13, %v2729_v12 }
0x4659   :  { %v2788_v42 = vpop.permute.xlu2 %2787 }
0x465a   :  { %v2790_v58 = vmul.f32 %v2788_v42, %v2784_v13 }
0x465c   :  { %2792 = vrot.lane.b32.xlu0 %v2790_v58, %s3615_s26 }
0x46ce   :  { %v2793_v52 = vpop.permute.xlu0 %2792 }
0x46cf   :  { %v2795_v60 = vadd.f32 %v2793_v52, %v2785_v59 }
0x46d1   :  { %3573 = vtanh.f32 %v2795_v60 }
0x46d7   :  { %v3574_v36 = vpop.eup %3573 }
0x46d8   :  { %2798 = vrot.lane.b32.xlu1 %v3574_v36, %s3614_s15 }
0x474a   :  { %v2799_v6 = vpop.permute.xlu1 %2798 }
0x474b   :  { %v2801_v24 = vmul.f32 %v2799_v6, %v2784_v13 }
0x474d   :  { %2804 = vrot.lane.b32.xlu2 %v2801_v24, %s3615_s26 }
0x47a7   :  { %v2805_v30 = vpop.permute.xlu2 %2804 }
0x47a8   :  { %3361 = vmatmul.msk.f32.vlgmr.msra.gmra.mxu2 %vm721_vm0, %v2805_v30 }
0x47a9   :  { %3084 = vmatpush.msra.mxu2 %v3605_v19 }
0x47ab   :  { %3085 = vmatpush.msra.mxu2 %v3606_v54 }
0x47ad   :  { %3086 = vmatpush.msra.mxu2 %v3607_v49 }
0x47af   :  { %3087 = vmatpush.msra.mxu2 %v3608_v33 }
0x482b   :  { %v2825_v50 = vpop.f32.mrf.mxu2 }
0x482c   :  { %v2828_v51 = vadd.f32 %v2825_v50, %v2057_v32 }
0x482e   :  { %v3362_v18 = vmul.f32 -1.442695, %v2828_v51 }
0x4830   :  { %3575 = vpow2.f32 %v3362_v18 }
0x4836   :  { %v3576_v27 = vpop.eup %3575 }
0x4837   :  { %v2832_v28 = vadd.f32 1.0, %v3576_v27 }
0x4839   :  { %3577 = vrcp.f32 %v2832_v28  ;;  %v2844_v37 = vand.u32 2147483648, %v2832_v28  ;;  %v2842_v12 = vand.u32 2147483647, %v2832_v28  ;;  %vm2838_vm2 = vweird.f32 %v2832_v28 }
0x483b   :  { %v2845_v17 = vor.u32 1.1754944e-38, %v2844_v37  ;;  %vm2843_vm4 = vcmp.eq.f32.partialorder %v2842_v12, 8.507059e+37 }
0x483f   :  { %v3578_v25 = vpop.eup %3577 }
0x4840   :  { %v2834_v46 = vmul.f32 %v3578_v25, %v2832_v28  ;;  %vm2839_vm14 = vweird.f32 %v3578_v25 }
0x4841   :  { %vm2840_vm3 = vmor %vm2838_vm2, %vm2839_vm14 }
0x4842   :  { %v2835_v35 = vsub.f32 1.0, %v2834_v46 }
0x4844   :  { %v2836_v47 = vmul.f32 %v3578_v25, %v2835_v35 }
0x4846   :  { %v2837_v15 = vadd.f32 %v3578_v25, %v2836_v47 }
0x4848   :  { %v2841_v9 = vsel %vm2840_vm3, %v3578_v25, %v2837_v15 }
0x4849   :  { %v2846_v26 = vsel %vm2843_vm4, %v2845_v17, %v2841_v9 }
0x484a   :  { %v2848_v43 = vmul.f32 2.0, %v2846_v26 }
0x484c   :  { %v3363_v32 = vadd.f32 -1.0, %v2848_v43 }
0x484e   :  { %v2850_v4 = vsel %vm4092_vm15, %v3363_v32, %v2846_v26 }
0x484f   :  { %2853 = vrot.lane.b32.xlu0 %v2850_v4, %s3614_s15  ;;  %v2851_v49 = vmul.f32 %v2850_v4, %v2795_v60 }
0x48c1   :  { %v2854_v19 = vpop.permute.xlu0 %2853 }
0x48c2   :  { %v2856_v54 = vmul.f32 %v2854_v19, %v2850_v4 }
0x48c4   :  { %2858 = vrot.lane.b32.xlu1 %v2856_v54, %s3615_s26 }
0x4936   :  { %v2859_v33 = vpop.permute.xlu1 %2858 }
0x4937   :  { %v2861_v7 = vadd.f32 %v2859_v33, %v2851_v49 }
0x4939   :  { %3579 = vtanh.f32 %v2861_v7 }
0x493f   :  { %v3580_v11 = vpop.eup %3579 }
0x4940   :  { %2864 = vrot.lane.b32.xlu2 %v3580_v11, %s3614_s15 }
0x499a   :  { %v2865_v5 = vpop.permute.xlu2 %2864 }
0x499b   :  { %v2867_v45 = vmul.f32 %v2865_v5, %v2850_v4 }
0x499d   :  { %2870 = vrot.lane.b32.xlu0 %v2867_v45, %s3615_s26 }
0x4a0f   :  { %v2871_v29 = vpop.permute.xlu0 %2870 }
0x4a10   :  { %3364 = vmatmul.msk.f32.vlgmr.msrb.gmra.mxu1 %vm721_vm0, %v2871_v29 }
0x4a8d   :  { %v2891_v22 = vpop.f32.mrf.mxu1 }
0x4a8e   :  { %v2894_v39 = vadd.f32 %v2891_v22, %v2051_v34 }
0x4a90   :  { %v3365_v0 = vmul.f32 -1.442695, %v2894_v39 }
0x4a92   :  { %3581 = vpow2.f32 %v3365_v0 }
0x4a98   :  { %v3582_v40 = vpop.eup %3581 }
0x4a99   :  { %v2898_v8 = vadd.f32 1.0, %v3582_v40 }
0x4a9b   :  { %3583 = vrcp.f32 %v2898_v8  ;;  %v2910_v21 = vand.u32 2147483648, %v2898_v8  ;;  %v2908_v10 = vand.u32 2147483647, %v2898_v8  ;;  %vm2904_vm5 = vweird.f32 %v2898_v8 }
0x4a9d   :  { %v2911_v13 = vor.u32 1.1754944e-38, %v2910_v21  ;;  %vm2909_vm7 = vcmp.eq.f32.partialorder %v2908_v10, 8.507059e+37 }
0x4aa1   :  { %v3584_v2 = vpop.eup %3583 }
0x4aa2   :  { %v2900_v23 = vmul.f32 %v3584_v2, %v2898_v8  ;;  %vm2905_vm11 = vweird.f32 %v3584_v2 }
0x4aa3   :  { %vm2906_vm6 = vmor %vm2904_vm5, %vm2905_vm11 }
0x4aa4   :  { %v2901_v31 = vsub.f32 1.0, %v2900_v23 }
0x4aa6   :  { %v2902_v38 = vmul.f32 %v3584_v2, %v2901_v31 }
0x4aa8   :  { %v2903_v14 = vadd.f32 %v3584_v2, %v2902_v38 }
0x4aaa   :  { %v2907_v42 = vsel %vm2906_vm6, %v3584_v2, %v2903_v14 }
0x4aab   :  { %v2912_v16 = vsel %vm2909_vm7, %v2911_v13, %v2907_v42 }
0x4aac   :  { %v2914_v56 = vmul.f32 2.0, %v2912_v16 }
0x4aae   :  { %v3366_v34 = vadd.f32 -1.0, %v2914_v56 }
0x4ab0   :  { %v2916_v58 = vsel %vm4092_vm15, %v3366_v34, %v2912_v16 }
0x4ab1   :  { %2919 = vrot.lane.b32.xlu1 %v2916_v58, %s3614_s15  ;;  %v2917_v60 = vmul.f32 %v2916_v58, %v2861_v7 }
0x4b23   :  { %v2920_v59 = vpop.permute.xlu1 %2919 }
0x4b24   :  { %v2922_v52 = vmul.f32 %v2920_v59, %v2916_v58 }
0x4b26   :  { %2924 = vrot.lane.b32.xlu2 %v2922_v52, %s3615_s26 }
0x4b80   :  { %v2925_v36 = vpop.permute.xlu2 %2924 }
0x4b81   :  { %v2927_v6 = vadd.f32 %v2925_v36, %v2917_v60 }
0x4b83   :  { %3585 = vtanh.f32 %v2927_v6 }
0x4b89   :  { %v3586_v24 = vpop.eup %3585 }
0x4b8a   :  { %2930 = vrot.lane.b32.xlu0 %v3586_v24, %s3614_s15 }
0x4bfc   :  { %v2931_v30 = vpop.permute.xlu0 %2930 }
0x4bfd   :  { %v2933_v50 = vmul.f32 %v2931_v30, %v2916_v58 }
0x4bff   :  { %2936 = vrot.lane.b32.xlu1 %v2933_v50, %s3615_s26 }
0x4c71   :  { %v2937_v51 = vpop.permute.xlu1 %2936 }
0x4c72   :  { %3367 = vmatmul.msk.f32.vlgmr.msrb.gmra.mxu2 %vm721_vm0, %v2937_v51 }
0x4cf5   :  { %v2957_v18 = vpop.f32.mrf.mxu2 }
0x4cf6   :  { %v2960_v27 = vadd.f32 %v2957_v18, %v2045_v57 }
0x4cf8   :  { %v3368_v28 = vmul.f32 -1.442695, %v2960_v27 }
0x4cfa   :  { %3587 = vpow2.f32 %v3368_v28 }
0x4d00   :  { %v3588_v25 = vpop.eup %3587 }
0x4d01   :  { %v2964_v46 = vadd.f32 1.0, %v3588_v25 }
0x4d03   :  { %3589 = vrcp.f32 %v2964_v46  ;;  %v2976_v12 = vand.u32 2147483648, %v2964_v46  ;;  %v2974_v17 = vand.u32 2147483647, %v2964_v46  ;;  %vm2970_vm10 = vweird.f32 %v2964_v46 }
0x4d05   :  { %v2977_v26 = vor.u32 1.1754944e-38, %v2976_v12  ;;  %vm2975_vm13 = vcmp.eq.f32.partialorder %v2974_v17, 8.507059e+37 }
0x4d09   :  { %v3590_v35 = vpop.eup %3589 }
0x4d0a   :  { %v2966_v37 = vmul.f32 %v3590_v35, %v2964_v46  ;;  %vm2971_vm9 = vweird.f32 %v3590_v35 }
0x4d0b   :  { %vm2972_vm12 = vmor %vm2970_vm10, %vm2971_vm9 }
0x4d0c   :  { %v2967_v47 = vsub.f32 1.0, %v2966_v37 }
0x4d0e   :  { %v2968_v15 = vmul.f32 %v3590_v35, %v2967_v47 }
0x4d10   :  { %v2969_v9 = vadd.f32 %v3590_v35, %v2968_v15 }
0x4d12   :  { %v2973_v43 = vsel %vm2972_vm12, %v3590_v35, %v2969_v9 }
0x4d13   :  { %v2978_v53 = vsel %vm2975_vm13, %v2977_v26, %v2973_v43 }
0x4d14   :  { %v2980_v55 = vmul.f32 2.0, %v2978_v53 }
0x4d16   :  { %v3369_v57 = vadd.f32 -1.0, %v2980_v55 }
0x4d18   :  { %v2982_v32 = vsel %vm4092_vm15, %v3369_v57, %v2978_v53  ;;  %v3141_v57 = vld [vmem:[%s4850_s19 + $0x18] sm:$0xff] }
0x4d19   :  { %2985 = vrot.lane.b32.xlu2 %v2982_v32, %s3614_s15  ;;  %v2983_v54 = vmul.f32 %v2982_v32, %v2927_v6  ;;  %3161 = vmatpush.msrb.mxu1 %v3141_v57 }
0x4d1b   :  { %3162 = vmatpush.msrb.mxu1 %v3140_v62 }
0x4d73   :  { %v2986_v4 = vpop.permute.xlu2 %2985 }
0x4d74   :  { %v2988_v19 = vmul.f32 %v2986_v4, %v2982_v32  ;;  %v3138_v4 = vld [vmem:[%s4850_s19] sm:$0xff] }
0x4d76   :  { %2990 = vrot.lane.b32.xlu0 %v2988_v19, %s3615_s26 }
0x4de8   :  { %v2991_v49 = vpop.permute.xlu0 %2990 }
0x4de9   :  { %v2993_v33 = vadd.f32 %v2991_v49, %v2983_v54  ;;  %v3177_v49 = vld [vmem:[%s4852_s21 + $0x38] sm:$0xff] }
0x4deb   :  { %3591 = vtanh.f32 %v2993_v33 }
0x4df1   :  { %v3592_v7 = vpop.eup %3591 }
0x4df2   :  { %2996 = vrot.lane.b32.xlu1 %v3592_v7, %s3614_s15  ;;  %v3175_v7 = vld [vmem:[%s4852_s21 + $0x28] sm:$0xff] }
0x4e64   :  { %v2997_v11 = vpop.permute.xlu1 %2996 }
0x4e65   :  { %v2999_v5 = vmul.f32 %v2997_v11, %v2982_v32  ;;  %v3139_v32 = vld [vmem:[%s4850_s19 + $0x8] sm:$0xff]  ;;  %v3174_v11 = vld [vmem:[%s4852_s21 + $0x20] sm:$0xff] }
0x4e66   :  { %3163 = vmatpush.msrb.mxu1 %v3139_v32 }
0x4e67   :  { %3002 = vrot.lane.b32.xlu2 %v2999_v5, %s3615_s26  ;;  %v3173_v5 = vld [vmem:[%s4852_s21 + $0x18] sm:$0xff] }
0x4e68   :  { %3164 = vmatpush.msrb.mxu1 %v3138_v4 }
0x4ec1   :  { %v3003_v45 = vpop.permute.xlu2 %3002 }
0x4ec2   :  { %3370 = vmatmul.msk.f32.vlgmr.msra.gmra.mxu1 %vm721_vm0, %v3003_v45 }
0x4ec3   :  { %3194 = vmatpush.msra.mxu1 %v3177_v49 }
0x4f3f   :  { %v3023_v29 = vpop.f32.mrf.mxu1 }
0x4f40   :  { %v3026_v22 = vadd.f32 %v3023_v29, %v2039_v20 }
0x4f42   :  { %v3371_v39 = vmul.f32 -1.442695, %v3026_v22  ;;  %v3172_v22 = vld [vmem:[%s4852_s21 + $0x10] sm:$0xff] }
0x4f44   :  { %3593 = vpow2.f32 %v3371_v39  ;;  %v3171_v39 = vld [vmem:[%s4852_s21 + $0x8] sm:$0xff] }
0x4f4a   :  { %v3594_v0 = vpop.eup %3593 }
0x4f4b   :  { %v3030_v40 = vadd.f32 1.0, %v3594_v0  ;;  %v3170_v0 = vld [vmem:[%s4852_s21] sm:$0xff] }
0x4f4d   :  { %3595 = vrcp.f32 %v3030_v40  ;;  %v3042_v31 = vand.u32 2147483648, %v3030_v40  ;;  %v3040_v38 = vand.u32 2147483647, %v3030_v40  ;;  %vm3036_vm2 = vweird.f32 %v3030_v40 }
0x4f4f   :  { %v3043_v14 = vor.u32 1.1754944e-38, %v3042_v31  ;;  %vm3041_vm4 = vcmp.eq.f32.partialorder %v3040_v38, 8.507059e+37  ;;  %v3207_v31 = vld [vmem:[%s4854_s23] sm:$0xff] }
0x4f53   :  { %v3596_v8 = vpop.eup %3595 }
0x4f54   :  { %v3032_v2 = vmul.f32 %v3596_v8, %v3030_v40  ;;  %vm3037_vm14 = vweird.f32 %v3596_v8  ;;  %v3396_v40 = vld [vmem:[%s4851_s20] ss:$0 sm:$0xff] }
0x4f55   :  { %vm3038_vm3 = vmor %vm3036_vm2, %vm3037_vm14 }
0x4f56   :  { %v3033_v23 = vsub.f32 1.0, %v3032_v2 }
0x4f58   :  { %v3034_v21 = vmul.f32 %v3596_v8, %v3033_v23 }
0x4f5a   :  { %v3035_v10 = vadd.f32 %v3596_v8, %v3034_v21  ;;  %v3397_v21 = vld [vmem:[%s4853_s22] ss:$0 sm:$0xff] }
0x4f5c   :  { %v3039_v13 = vsel %vm3038_vm3, %v3596_v8, %v3035_v10 }
0x4f5d   :  { %v3044_v44 = vsel %vm3041_vm4, %v3043_v14, %v3039_v13  ;;  %v3398_v13 = vld [vmem:[%s4855_s24] ss:$0 sm:$0xff] }
0x4f5e   :  { %v3046_v48 = vmul.f32 2.0, %v3044_v44 }
0x4f60   :  { %v3372_v20 = vadd.f32 -1.0, %v3046_v48 }
0x4f62   :  { %v3048_v42 = vsel %vm4092_vm15, %v3372_v20, %v3044_v44 }
0x4f63   :  { %3051 = vrot.lane.b32.xlu0 %v3048_v42, %s3614_s15  ;;  %v3049_v34 = vmul.f32 %v3048_v42, %v2993_v33  ;;  %v3176_v33 = vld [vmem:[%s4852_s21 + $0x30] sm:$0xff] }
0x4f64   :  { %3195 = vmatpush.msra.mxu1 %v3176_v33 }
0x4f66   :  { %3196 = vmatpush.msra.mxu1 %v3175_v7 }
0x4f68   :  { %3197 = vmatpush.msra.mxu1 %v3174_v11 }
0x4f6a   :  { %3198 = vmatpush.msra.mxu1 %v3173_v5 }
0x4f6c   :  { %3199 = vmatpush.msra.mxu1 %v3172_v22 }
0x4f6e   :  { %3200 = vmatpush.msra.mxu1 %v3171_v39 }
0x4f70   :  { %3201 = vmatpush.msra.mxu1 %v3170_v0 }
0x4fd5   :  { %v3052_v16 = vpop.permute.xlu0 %3051 }
0x4fd6   :  { %v3054_v56 = vmul.f32 %v3052_v16, %v3048_v42 }
0x4fd8   :  { %3056 = vrot.lane.b32.xlu1 %v3054_v56, %s3615_s26 }
0x504a   :  { %v3057_v58 = vpop.permute.xlu1 %3056 }
0x504b   :  { %v3059_v59 = vadd.f32 %v3057_v58, %v3049_v34 }
0x504d   :  { %3597 = vtanh.f32 %v3059_v59 }
0x5053   :  { %v3598_v52 = vpop.eup %3597 }
0x5054   :  { %3062 = vrot.lane.b32.xlu2 %v3598_v52, %s3614_s15 }
0x50ae   :  { %v3063_v60 = vpop.permute.xlu2 %3062 }
0x50af   :  { %v3065_v36 = vmul.f32 %v3063_v60, %v3048_v42 }
0x50b1   :  { %3068 = vrot.lane.b32.xlu0 %v3065_v36, %s3615_s26 }
0x5123   :  { %v3069_v6 = vpop.permute.xlu0 %3068 }
0x5124   :  { %3373 = vmatmul.msk.f32.vlgmr.msra.gmra.mxu2 %vm721_vm0, %v3069_v6 }
0x51a7   :  { %v3089_v24 = vpop.f32.mrf.mxu2 }
0x51a8   :  { %v3092_v30 = vadd.f32 %v3089_v24, %v2033_v3 }
0x51aa   :  { %v3374_v50 = vmul.f32 -1.442695, %v3092_v30 }
0x51ac   :  { %3599 = vpow2.f32 %v3374_v50 }
0x51b2   :  { %v3600_v51 = vpop.eup %3599 }
0x51b3   :  { %v3096_v18 = vadd.f32 1.0, %v3600_v51 }
0x51b5   :  { %3601 = vrcp.f32 %v3096_v18  ;;  %v3108_v46 = vand.u32 2147483648, %v3096_v18  ;;  %v3106_v37 = vand.u32 2147483647, %v3096_v18  ;;  %vm3102_vm5 = vweird.f32 %v3096_v18 }
0x51b7   :  { %v3109_v61 = vor.u32 1.1754944e-38, %v3108_v46  ;;  %vm3107_vm7 = vcmp.eq.f32.partialorder %v3106_v37, 8.507059e+37 }
0x51bb   :  { %v3602_v27 = vpop.eup %3601 }
0x51bc   :  { %v3098_v28 = vmul.f32 %v3602_v27, %v3096_v18  ;;  %vm3103_vm11 = vweird.f32 %v3602_v27 }
0x51bd   :  { %vm3104_vm6 = vmor %vm3102_vm5, %vm3103_vm11 }
0x51be   :  { %v3099_v25 = vsub.f32 1.0, %v3098_v28 }
0x51c0   :  { %v3100_v35 = vmul.f32 %v3602_v27, %v3099_v25 }
0x51c2   :  { %v3101_v47 = vadd.f32 %v3602_v27, %v3100_v35 }
0x51c4   :  { %v3105_v12 = vsel %vm3104_vm6, %v3602_v27, %v3101_v47 }
0x51c5   :  { %v3110_v1 = vsel %vm3107_vm7, %v3109_v61, %v3105_v12 }
0x51c6   :  { %v3112_v63 = vmul.f32 2.0, %v3110_v1 }
0x51c8   :  { %v3375_v3 = vadd.f32 -1.0, %v3112_v63 }
0x51ca   :  { %v3114_v15 = vsel %vm4092_vm15, %v3375_v3, %v3110_v1  ;;  %vm3236_vm15 = vcmask 15360  }
0x51cb   :  { %3117 = vrot.lane.b32.xlu1 %v3114_v15, %s3614_s15  ;;  %v3115_v26 = vmul.f32 %v3114_v15, %v3059_v59 }
0x523d   :  { %v3118_v17 = vpop.permute.xlu1 %3117 }
0x523e   :  { %v3120_v9 = vmul.f32 %v3118_v17, %v3114_v15 }
0x5240   :  { %3122 = vrot.lane.b32.xlu2 %v3120_v9, %s3615_s26 }
0x529a   :  { %v3123_v43 = vpop.permute.xlu2 %3122 }
0x529b   :  { %v3125_v53 = vadd.f32 %v3123_v43, %v3115_v26 }
0x529d   :  { %3603 = vtanh.f32 %v3125_v53 }
0x52a3   :  { %v3604_v55 = vpop.eup %3603 }
0x52a4   :  { %3128 = vrot.lane.b32.xlu0 %v3604_v55, %s3614_s15 }
0x5316   :  { %v3129_v19 = vpop.permute.xlu0 %3128 }
0x5317   :  { %v3131_v54 = vmul.f32 %v3129_v19, %v3114_v15 }
0x5319   :  { %3133 = vrot.lane.b32.xlu1 %v3131_v54, %s3615_s26 }
0x538b   :  { %v3134_v45 = vpop.permute.xlu1 %3133 }
0x538c   :  { %v3137_v29 = vsel %vm1826_vm1, %v3134_v45, %v4547_v41  ;;  %v3208_v41 = vld [vmem:[%s4854_s23 + $0x8] sm:$0xff] }
0x538d   :  { %3376 = vmatmul.msk.f32.vlgmr.msrb.gmra.mxu1 %vm721_vm0, %v3137_v29  ;;  %3230 = vmatpush.msrb.mxu2 %v3208_v41 }
0x538f   :  { %3231 = vmatpush.msrb.mxu2 %v3207_v31 }
0x540a   :  { %v3166_v8 = vpop.f32.mrf.mxu1 }
0x540b   :  { %v3167_v2 = vadd.f32 %v3396_v40, %v3166_v8 }
0x540d   :  { %v3169_v23 = vmax.f32 %v3167_v2, 0.0 }
0x540f   :  { %3377 = vmatmul.msk.f32.vlgmr.msra.gmra.mxu1 %vm3182_vm8, %v3169_v23 }
0x548c   :  { %v3203_v38 = vpop.f32.mrf.mxu1 }
0x548d   :  { %v3204_v10 = vadd.f32 %v3397_v21, %v3203_v38 }
0x548f   :  { %v3206_v14 = vmax.f32 %v3204_v10, 0.0 }
0x5491   :  { %3378 = vmatmul.msk.f32.vlgmr.msrb.gmra.mxu2 %vm1826_vm1, %v3206_v14 }
0x5514   :  { %v3233_v44 = vpop.f32.mrf.mxu2 }
0x5515   :  { %v3234_v48 = vadd.f32 %v3398_v13, %v3233_v44 }
0x5517   :  { %3237 = vst.msk [vmem:[%s4856_s25] sm:$0xff] %vm3236_vm15, %v3234_v48 }

</bundles_post_ra>
